<compile_context>
chip_gen: v6e
topology: v6e:2x2x1
jax: 0.10.0
libtpu: 0.0.40
codegen_flags: <defaults>
</compile_context>

<pallas_src>
import functools

import numpy as np
import jax
import jax.numpy as jnp
from jax.experimental import pallas as pl
from jax.experimental.pallas import tpu as pltpu

# ---------------- small config (module defaults, shrunk) --------------------
D_X = 4          # number of covariate tokens
D_Y = 1          # number of outcomes
K = 2            # treatment arms
Y_BINS = 32      # outcome bins
D_MODEL = 32     # token embedding width
NUM_LAYERS = 2   # encoder depth
NHEAD = 4        # attention heads
DIM_FF = 64      # feed-forward width
SEQ_LEN = D_X + 2 * D_Y + 3
BATCH = 2
LN_EPS = 1e-5
HEAD_DIM = D_MODEL // NHEAD


# ---------------- Pallas kernel: tokens + encoder stack + head_Y -------------
def encoder_kernel(t_idx_ref,                                   # SMEM (B,)
                   x_ref, base_ref, num_w_ref, tok_t_ref, mask_ref, ysel_ref,
                   wq_ref, wk_ref, wv_ref, bq_ref, bk_ref, bv_ref,
                   wo_ref, bo_ref,
                   ln1g_ref, ln1b_ref, ln2g_ref, ln2b_ref,
                   w1_ref, b1_ref, w2_ref, b2_ref,
                   why_ref, bhy_ref,
                   out_ref,
                   *, num_layers, nhead, b_tile, seq_len, d_x, d_y, n_treat):
    D = base_ref.shape[-1]
    M = b_tile * seq_len

    def layernorm(z, g, b):
        mu = jnp.mean(z, axis=-1, keepdims=True)
        var = jnp.mean((z - mu) ** 2, axis=-1, keepdims=True)
        return (z - mu) * jax.lax.rsqrt(var + LN_EPS) * g + b

    def softmax_rows(s):
        m = jnp.max(s, axis=-1, keepdims=True)
        e = jnp.exp(s - m)
        inv = pl.reciprocal(jnp.sum(e, axis=-1, keepdims=True), approx=True)
        return e * inv

    # ---- fused token assembly: build the (b_tile*seq_len, D) slab -----------
    base = base_ref[...]                                    # (S, D): pos + static embeds
    b0 = pl.program_id(0) * b_tile
    rows = []
    for bi in range(b_tile):                                # static unroll (tiny tile)
        num_part = x_ref[bi] * num_w_ref[...]               # (d_x,1)*(d_x,D) -> (d_x,D)
        t_sel = t_idx_ref[b0 + bi]                          # scalar from SMEM
        t_tok = jnp.zeros((1, D), jnp.float32)
        for kk in range(n_treat):                           # one-hot select of tok_T row
            t_tok = t_tok + (t_sel == kk).astype(jnp.float32) * tok_t_ref[kk:kk + 1, :]
        rows.append(jnp.concatenate([
            base[0:1],                                      # CLS
            base[1:1 + d_x] + num_part,                     # numeric tokens
            base[1 + d_x:2 + d_x],                          # TOK_T marker
            base[2 + d_x:3 + d_x] + t_tok,                  # treatment token
            base[3 + d_x:],                                 # (TOK_Y marker, y-NaN) pairs
        ], axis=0))
    h = jnp.concatenate(rows, axis=0)                       # (M, D)

    mask = mask_ref[...]                                    # block-diagonal additive mask
    for l in range(num_layers):                             # static unroll (L=2)
        # ---- multi-head self attention, batch folded into M -----------------
        attn = jnp.zeros((M, D), jnp.float32)
        for hh in range(nhead):                             # static unroll (H=4)
            q = jnp.dot(h, wq_ref[l, hh],
                        preferred_element_type=jnp.float32) + bq_ref[l, hh]
            k = jnp.dot(h, wk_ref[l, hh],
                        preferred_element_type=jnp.float32) + bk_ref[l, hh]
            v = jnp.dot(h, wv_ref[l, hh],
                        preferred_element_type=jnp.float32) + bv_ref[l, hh]
            # 1/sqrt(hd) already folded into wq/bq
            s = jax.lax.dot_general(q, k, (((1,), (1,)), ((), ())),
                                    preferred_element_type=jnp.float32) + mask
            p = softmax_rows(s)
            ctx = jnp.dot(p, v, preferred_element_type=jnp.float32)     # (M, hd)
            attn = attn + jnp.dot(ctx, wo_ref[l, hh],
                                  preferred_element_type=jnp.float32)   # (M, D)
        attn = attn + bo_ref[l]
        h = layernorm(h + attn, ln1g_ref[l], ln1b_ref[l])

        # ---- feed-forward (ReLU) --------------------------------------------
        ff = jnp.dot(h, w1_ref[l], preferred_element_type=jnp.float32) + b1_ref[l]
        ff = jnp.maximum(ff, 0.0)
        ff = jnp.dot(ff, w2_ref[l], preferred_element_type=jnp.float32) + b2_ref[l]
        h = layernorm(h + ff, ln2g_ref[l], ln2b_ref[l])

    # ---- head_Y: gather all y rows via selection matmul, one dot, one store -
    xy = jnp.dot(ysel_ref[...], h, preferred_element_type=jnp.float32)   # (bt*d_y, D)
    out_ref[0] = (jnp.dot(xy, why_ref[...], preferred_element_type=jnp.float32)
                  + bhy_ref[...])


# ---------------- parameter init (deterministic, synthetic) -----------------
def init_params(key):
    keys = iter(jax.random.split(key, 32))

    def nrm(shape, s=0.05):
        return s * jax.random.normal(next(keys), shape, dtype=jnp.float32)

    p = {}
    p['num_w'] = nrm((D_X, D_MODEL))          # NumEmbed weights (per feature)
    p['num_b'] = nrm((D_X, D_MODEL))
    p['tok_T'] = nrm((K + 1, D_MODEL))
    p['tok_Y'] = nrm((Y_BINS + 1, D_MODEL))
    p['tok_special'] = nrm((3, D_MODEL))
    p['pos'] = nrm((SEQ_LEN + 1, D_MODEL))
    p['wqkv'] = nrm((NUM_LAYERS, D_MODEL, 3 * D_MODEL))
    p['bqkv'] = nrm((NUM_LAYERS, 1, 3 * D_MODEL))
    p['wo'] = nrm((NUM_LAYERS, D_MODEL, D_MODEL))
    p['bo'] = nrm((NUM_LAYERS, 1, D_MODEL))
    p['ln1g'] = jnp.ones((NUM_LAYERS, 1, D_MODEL), jnp.float32)
    p['ln1b'] = jnp.zeros((NUM_LAYERS, 1, D_MODEL), jnp.float32)
    p['ln2g'] = jnp.ones((NUM_LAYERS, 1, D_MODEL), jnp.float32)
    p['ln2b'] = jnp.zeros((NUM_LAYERS, 1, D_MODEL), jnp.float32)
    p['w1'] = nrm((NUM_LAYERS, D_MODEL, DIM_FF))
    p['b1'] = nrm((NUM_LAYERS, 1, DIM_FF))
    p['w2'] = nrm((NUM_LAYERS, DIM_FF, D_MODEL))
    p['b2'] = nrm((NUM_LAYERS, 1, D_MODEL))
    p['why'] = nrm((D_MODEL, Y_BINS))
    p['bhy'] = nrm((1, Y_BINS))
    return p


# ---------------- params-only layout prep (head split, scale fold, base) ----
def _prep_kernel_inputs(params):
    L, D, hd = NUM_LAYERS, D_MODEL, HEAD_DIM
    scale = 1.0 / float(hd) ** 0.5

    wqkv = params['wqkv']                             # (L, D, 3D), x @ W layout
    bqkv = params['bqkv'][:, 0, :]                    # (L, 3D)
    wq = (wqkv[:, :, :D] * scale).reshape(L, D, NHEAD, hd).transpose(0, 2, 1, 3)
    wk = wqkv[:, :, D:2 * D].reshape(L, D, NHEAD, hd).transpose(0, 2, 1, 3)
    wv = wqkv[:, :, 2 * D:].reshape(L, D, NHEAD, hd).transpose(0, 2, 1, 3)
    bq = (bqkv[:, :D] * scale).reshape(L, NHEAD, 1, hd)
    bk = bqkv[:, D:2 * D].reshape(L, NHEAD, 1, hd)
    bv = bqkv[:, 2 * D:].reshape(L, NHEAD, 1, hd)
    wo = params['wo'].reshape(L, NHEAD, hd, D)        # rows = concatenated heads

    # static per-position token content (pos + everything not depending on x,t)
    base = params['pos'][:SEQ_LEN]
    base = base.at[0].add(params['tok_special'][0])                    # CLS
    base = base.at[1:1 + D_X].add(params['num_b'])                     # NumEmbed bias
    base = base.at[1 + D_X].add(params['tok_special'][1])              # TOK_T marker
    for j in range(D_Y):
        base = base.at[D_X + 3 + 2 * j].add(params['tok_special'][2])  # TOK_Y marker
        base = base.at[D_X + 4 + 2 * j].add(params['tok_Y'][Y_BINS])   # y = NaN token
    return wq, wk, wv, bq, bk, bv, wo, base


def _static_mats(b_tile):
    """Block-diagonal attention mask and y-row selection matrix (constants)."""
    M = b_tile * SEQ_LEN
    bid = np.arange(M) // SEQ_LEN
    mask = np.where(bid[:, None] == bid[None, :], 0.0, -1e30).astype(np.float32)
    ysel = np.zeros((b_tile * D_Y, M), np.float32)
    for bi in range(b_tile):
        for j in range(D_Y):
            ysel[bi * D_Y + j, bi * SEQ_LEN + D_X + 4 + 2 * j] = 1.0
    return jnp.asarray(mask), jnp.asarray(ysel)


# ---------------- forward: pallas_call wrapper -------------------------------
def forward(params, x, t, *, b_tile=None):
    B = x.shape[0]
    if b_tile is None:
        b_tile = B                       # one tile at small batch (grid = (1,))
    assert B % b_tile == 0
    n_tiles = B // b_tile

    wq, wk, wv, bq, bk, bv, wo, base = _prep_kernel_inputs(params)
    mask, ysel = _static_mats(b_tile)

    t_idx = jnp.where(t == -1, K, t).astype(jnp.int32)          # (B,) scalar prefetch
    x3 = x.astype(jnp.float32)[:, :, None]                      # (B, d_x, 1)

    kernel = functools.partial(
        encoder_kernel, num_layers=NUM_LAYERS, nhead=NHEAD,
        b_tile=b_tile, seq_len=SEQ_LEN, d_x=D_X, d_y=D_Y, n_treat=K + 1)

    def pin(rank):
        zeros = (0,) * rank
        return lambda i, t_ref: zeros

    in_specs = [
        pl.BlockSpec((b_tile, D_X, 1), lambda i, t_ref: (i, 0, 0)),   # x, batch-tiled
        pl.BlockSpec(base.shape, pin(2)),
        pl.BlockSpec(params['num_w'].shape, pin(2)),
        pl.BlockSpec(params['tok_T'].shape, pin(2)),
        pl.BlockSpec(mask.shape, pin(2)),
        pl.BlockSpec(ysel.shape, pin(2)),
        pl.BlockSpec(wq.shape, pin(4)),
        pl.BlockSpec(wk.shape, pin(4)),
        pl.BlockSpec(wv.shape, pin(4)),
        pl.BlockSpec(bq.shape, pin(4)),
        pl.BlockSpec(bk.shape, pin(4)),
        pl.BlockSpec(bv.shape, pin(4)),
        pl.BlockSpec(wo.shape, pin(4)),
        pl.BlockSpec(params['bo'].shape, pin(3)),
        pl.BlockSpec(params['ln1g'].shape, pin(3)),
        pl.BlockSpec(params['ln1b'].shape, pin(3)),
        pl.BlockSpec(params['ln2g'].shape, pin(3)),
        pl.BlockSpec(params['ln2b'].shape, pin(3)),
        pl.BlockSpec(params['w1'].shape, pin(3)),
        pl.BlockSpec(params['b1'].shape, pin(3)),
        pl.BlockSpec(params['w2'].shape, pin(3)),
        pl.BlockSpec(params['b2'].shape, pin(3)),
        pl.BlockSpec(params['why'].shape, pin(2)),
        pl.BlockSpec(params['bhy'].shape, pin(2)),
    ]

    out = pl.pallas_call(
        kernel,
        out_shape=jax.ShapeDtypeStruct((n_tiles, b_tile * D_Y, Y_BINS), jnp.float32),
        grid_spec=pltpu.PrefetchScalarGridSpec(
            num_scalar_prefetch=1,
            grid=(n_tiles,),
            in_specs=in_specs,
            out_specs=pl.BlockSpec((1, b_tile * D_Y, Y_BINS),
                                   lambda i, t_ref: (i, 0, 0)),
        ),
        compiler_params=pltpu.CompilerParams(
            dimension_semantics=("parallel",),      # batch tiles shard across TCs (v7x)
            vmem_limit_bytes=32 * 1024 * 1024,
        ),
    )(t_idx, x3, base, params['num_w'], params['tok_T'], mask, ysel,
      wq, wk, wv, bq, bk, bv, wo, params['bo'],
      params['ln1g'], params['ln1b'], params['ln2g'], params['ln2b'],
      params['w1'], params['b1'], params['w2'], params['b2'],
      params['why'], params['bhy'])

    return out.reshape(B, D_Y, Y_BINS)


# ---------------- pure-JAX reference (for correctness check) -----------------
def _build_tokens_ref(params, x, t):
    b = x.shape[0]
    cls = jnp.broadcast_to(params['tok_special'][0], (b, 1, D_MODEL))
    x_tok = x[:, :, None] * params['num_w'][None] + params['num_b'][None]
    tok_t_marker = jnp.broadcast_to(params['tok_special'][1], (b, 1, D_MODEL))
    t_idx = jnp.where(t == -1, K, t).astype(jnp.int32)
    t_tok = params['tok_T'][t_idx][:, None, :]
    parts = [cls, x_tok, tok_t_marker, t_tok]
    tok_y_marker = jnp.broadcast_to(params['tok_special'][2], (b, 1, D_MODEL))
    y_nan_tok = jnp.broadcast_to(params['tok_Y'][Y_BINS], (b, 1, D_MODEL))
    for _ in range(D_Y):
        parts.append(tok_y_marker)
        parts.append(y_nan_tok)
    return jnp.concatenate(parts, axis=1)


def reference(params, x, t):
    tokens = _build_tokens_ref(params, x, t)
    h = tokens + params['pos'][:SEQ_LEN][None]
    hd = HEAD_DIM
    scale = 1.0 / float(hd) ** 0.5
    B = x.shape[0]

    def ln(z, g, b):
        mu = z.mean(-1, keepdims=True)
        var = ((z - mu) ** 2).mean(-1, keepdims=True)
        return (z - mu) / jnp.sqrt(var + LN_EPS) * g + b

    for l in range(NUM_LAYERS):
        qkv = h @ params['wqkv'][l] + params['bqkv'][l]
        q, k, v = jnp.split(qkv, 3, axis=-1)
        q = q.reshape(B, SEQ_LEN, NHEAD, hd).transpose(0, 2, 1, 3)
        k = k.reshape(B, SEQ_LEN, NHEAD, hd).transpose(0, 2, 1, 3)
        v = v.reshape(B, SEQ_LEN, NHEAD, hd).transpose(0, 2, 1, 3)
        s = jnp.einsum('bhqd,bhkd->bhqk', q, k) * scale
        p = jax.nn.softmax(s, -1)
        a = jnp.einsum('bhqk,bhkd->bhqd', p, v)
        a = a.transpose(0, 2, 1, 3).reshape(B, SEQ_LEN, D_MODEL)
        a = a @ params['wo'][l] + params['bo'][l]
        h = ln(h + a, params['ln1g'][l], params['ln1b'][l])
        ff = jnp.maximum(h @ params['w1'][l] + params['b1'][l], 0.0)
        ff = ff @ params['w2'][l] + params['b2'][l]
        h = ln(h + ff, params['ln2g'][l], params['ln2b'][l])
    outs = []
    for j in range(D_Y):
        outs.append(h[:, D_X + 4 + 2 * j] @ params['why'] + params['bhy'][0])
    return jnp.stack(outs, axis=1)


if __name__ == "__main__":
    key = jax.random.PRNGKey(0)
    pkey, xkey = jax.random.split(key)
    params = init_params(pkey)

    x = jax.random.normal(xkey, (BATCH, D_X), dtype=jnp.float32)
    t = jnp.array([0, 1], dtype=jnp.int32)

    fwd = jax.jit(forward)               # prep + glue + pallas_call in one program
    out = jax.block_until_ready(fwd(params, x, t))
    assert out.shape == (BATCH, D_Y, Y_BINS)

    ref = jax.block_until_ready(reference(params, x, t))
    max_err = float(jnp.max(jnp.abs(out - ref)))
    if not jnp.allclose(out, ref, atol=2e-3, rtol=2e-3):
        raise AssertionError(
            f"Pallas kernel mismatch vs pure-JAX reference (max abs err {max_err:.3e})")

    print("KERNEL_OK")
</pallas_src>

<mosaic_0001>
module attributes {stable_mosaic.version = 11 : i64} {
  func.func @encoder_kernel(%arg0: i32, %arg1: memref<2xi32, #tpu.memory_space<smem>>, %arg2: memref<2x4x1xf32, #tpu.memory_space<vmem>>, %arg3: memref<9x32xf32, #tpu.memory_space<vmem>>, %arg4: memref<4x32xf32, #tpu.memory_space<vmem>>, %arg5: memref<3x32xf32, #tpu.memory_space<vmem>>, %arg6: memref<18x18xf32, #tpu.memory_space<vmem>>, %arg7: memref<2x18xf32, #tpu.memory_space<vmem>>, %arg8: memref<2x4x32x8xf32, #tpu.memory_space<vmem>>, %arg9: memref<2x4x32x8xf32, #tpu.memory_space<vmem>>, %arg10: memref<2x4x32x8xf32, #tpu.memory_space<vmem>>, %arg11: memref<2x4x1x8xf32, #tpu.memory_space<vmem>>, %arg12: memref<2x4x1x8xf32, #tpu.memory_space<vmem>>, %arg13: memref<2x4x1x8xf32, #tpu.memory_space<vmem>>, %arg14: memref<2x4x8x32xf32, #tpu.memory_space<vmem>>, %arg15: memref<2x1x32xf32, #tpu.memory_space<vmem>>, %arg16: memref<2x1x32xf32, #tpu.memory_space<vmem>>, %arg17: memref<2x1x32xf32, #tpu.memory_space<vmem>>, %arg18: memref<2x1x32xf32, #tpu.memory_space<vmem>>, %arg19: memref<2x1x32xf32, #tpu.memory_space<vmem>>, %arg20: memref<2x32x64xf32, #tpu.memory_space<vmem>>, %arg21: memref<2x1x64xf32, #tpu.memory_space<vmem>>, %arg22: memref<2x64x32xf32, #tpu.memory_space<vmem>>, %arg23: memref<2x1x32xf32, #tpu.memory_space<vmem>>, %arg24: memref<32x32xf32, #tpu.memory_space<vmem>>, %arg25: memref<1x32xf32, #tpu.memory_space<vmem>>, %arg26: memref<1x2x32xf32, #tpu.memory_space<vmem>>) attributes {dimension_semantics = [#tpu.dimension_semantics<parallel>], iteration_bounds = array<i64: 1>, scalar_prefetch = 1 : i64, scratch_operands = 0 : i64, tpu.core_type = #tpu.core_type<tc>, window_params = [{transform_indices = @transform_0, window_bounds = array<i64: 2, 4, 1>}, {pipeline_mode = #tpu.pipeline_mode<synchronous>, transform_indices = @transform_1, window_bounds = array<i64: 9, 32>}, {pipeline_mode = #tpu.pipeline_mode<synchronous>, transform_indices = @transform_2, window_bounds = array<i64: 4, 32>}, {pipeline_mode = #tpu.pipeline_mode<synchronous>, transform_indices = @transform_3, window_bounds = array<i64: 3, 32>}, {pipeline_mode = #tpu.pipeline_mode<synchronous>, transform_indices = @transform_4, window_bounds = array<i64: 18, 18>}, {pipeline_mode = #tpu.pipeline_mode<synchronous>, transform_indices = @transform_5, window_bounds = array<i64: 2, 18>}, {pipeline_mode = #tpu.pipeline_mode<synchronous>, transform_indices = @transform_6, window_bounds = array<i64: 2, 4, 32, 8>}, {pipeline_mode = #tpu.pipeline_mode<synchronous>, transform_indices = @transform_7, window_bounds = array<i64: 2, 4, 32, 8>}, {pipeline_mode = #tpu.pipeline_mode<synchronous>, transform_indices = @transform_8, window_bounds = array<i64: 2, 4, 32, 8>}, {pipeline_mode = #tpu.pipeline_mode<synchronous>, transform_indices = @transform_9, window_bounds = array<i64: 2, 4, 1, 8>}, {pipeline_mode = #tpu.pipeline_mode<synchronous>, transform_indices = @transform_10, window_bounds = array<i64: 2, 4, 1, 8>}, {pipeline_mode = #tpu.pipeline_mode<synchronous>, transform_indices = @transform_11, window_bounds = array<i64: 2, 4, 1, 8>}, {pipeline_mode = #tpu.pipeline_mode<synchronous>, transform_indices = @transform_12, window_bounds = array<i64: 2, 4, 8, 32>}, {pipeline_mode = #tpu.pipeline_mode<synchronous>, transform_indices = @transform_13, window_bounds = array<i64: 2, 1, 32>}, {pipeline_mode = #tpu.pipeline_mode<synchronous>, transform_indices = @transform_14, window_bounds = array<i64: 2, 1, 32>}, {pipeline_mode = #tpu.pipeline_mode<synchronous>, transform_indices = @transform_15, window_bounds = array<i64: 2, 1, 32>}, {pipeline_mode = #tpu.pipeline_mode<synchronous>, transform_indices = @transform_16, window_bounds = array<i64: 2, 1, 32>}, {pipeline_mode = #tpu.pipeline_mode<synchronous>, transform_indices = @transform_17, window_bounds = array<i64: 2, 1, 32>}, {pipeline_mode = #tpu.pipeline_mode<synchronous>, transform_indices = @transform_18, window_bounds = array<i64: 2, 32, 64>}, {pipeline_mode = #tpu.pipeline_mode<synchronous>, transform_indices = @transform_19, window_bounds = array<i64: 2, 1, 64>}, {pipeline_mode = #tpu.pipeline_mode<synchronous>, transform_indices = @transform_20, window_bounds = array<i64: 2, 64, 32>}, {pipeline_mode = #tpu.pipeline_mode<synchronous>, transform_indices = @transform_21, window_bounds = array<i64: 2, 1, 32>}, {pipeline_mode = #tpu.pipeline_mode<synchronous>, transform_indices = @transform_22, window_bounds = array<i64: 32, 32>}, {pipeline_mode = #tpu.pipeline_mode<synchronous>, transform_indices = @transform_23, window_bounds = array<i64: 1, 32>}, {transform_indices = @transform_24, window_bounds = array<i64: 1, 2, 32>}]} {
    %c0 = arith.constant 0 : index
    %c0_0 = arith.constant 0 : index
    %0 = vector.load %arg3[%c0, %c0_0] : memref<9x32xf32, #tpu.memory_space<vmem>>, vector<9x32xf32>
    %c2_i32 = arith.constant 2 : i32
    %1 = arith.muli %arg0, %c2_i32 : i32
    %c0_1 = arith.constant 0 : index
    %c0_2 = arith.constant 0 : index
    %c0_3 = arith.constant 0 : index
    %2 = vector.load %arg2[%c0_1, %c0_2, %c0_3] : memref<2x4x1xf32, #tpu.memory_space<vmem>>, vector<1x4x1xf32>
    %3 = vector.shape_cast %2 : vector<1x4x1xf32> to vector<4x1xf32>
    %c0_4 = arith.constant 0 : index
    %c0_5 = arith.constant 0 : index
    %4 = vector.load %arg4[%c0_4, %c0_5] : memref<4x32xf32, #tpu.memory_space<vmem>>, vector<4x32xf32>
    %5 = vector.broadcast %3 : vector<4x1xf32> to vector<4x32xf32>
    %6 = arith.mulf %5, %4 : vector<4x32xf32>
    %c0_i32 = arith.constant 0 : i32
    %7 = arith.addi %1, %c0_i32 : i32
    %8 = arith.index_cast %7 : i32 to index
    %9 = memref.load %arg1[%8] : memref<2xi32, #tpu.memory_space<smem>>
    %cst = arith.constant 0.000000e+00 : f32
    %10 = vector.broadcast %cst : f32 to vector<1x32xf32>
    %c0_i32_6 = arith.constant 0 : i32
    %11 = arith.cmpi eq, %9, %c0_i32_6 : i32
    %12 = arith.extui %11 : i1 to i32
    %13 = arith.sitofp %12 : i32 to f32
    %c0_7 = arith.constant 0 : index
    %c0_8 = arith.constant 0 : index
    %14 = vector.load %arg5[%c0_7, %c0_8] : memref<3x32xf32, #tpu.memory_space<vmem>>, vector<1x32xf32>
    %15 = vector.broadcast %13 : f32 to vector<1x32xf32>
    %16 = arith.mulf %15, %14 : vector<1x32xf32>
    %17 = arith.addf %10, %16 : vector<1x32xf32>
    %c1_i32 = arith.constant 1 : i32
    %18 = arith.cmpi eq, %9, %c1_i32 : i32
    %19 = arith.extui %18 : i1 to i32
    %20 = arith.sitofp %19 : i32 to f32
    %c1 = arith.constant 1 : index
    %c0_9 = arith.constant 0 : index
    %21 = vector.load %arg5[%c1, %c0_9] : memref<3x32xf32, #tpu.memory_space<vmem>>, vector<1x32xf32>
    %22 = vector.broadcast %20 : f32 to vector<1x32xf32>
    %23 = arith.mulf %22, %21 : vector<1x32xf32>
    %24 = arith.addf %17, %23 : vector<1x32xf32>
    %c2_i32_10 = arith.constant 2 : i32
    %25 = arith.cmpi eq, %9, %c2_i32_10 : i32
    %26 = arith.extui %25 : i1 to i32
    %27 = arith.sitofp %26 : i32 to f32
    %c2 = arith.constant 2 : index
    %c0_11 = arith.constant 0 : index
    %28 = vector.load %arg5[%c2, %c0_11] : memref<3x32xf32, #tpu.memory_space<vmem>>, vector<1x32xf32>
    %29 = vector.broadcast %27 : f32 to vector<1x32xf32>
    %30 = arith.mulf %29, %28 : vector<1x32xf32>
    %31 = arith.addf %24, %30 : vector<1x32xf32>
    %32 = vector.extract_strided_slice %0 {offsets = [0, 0], sizes = [1, 32], strides = [1, 1]} : vector<9x32xf32> to vector<1x32xf32>
    %33 = vector.extract_strided_slice %0 {offsets = [1, 0], sizes = [4, 32], strides = [1, 1]} : vector<9x32xf32> to vector<4x32xf32>
    %34 = arith.addf %33, %6 : vector<4x32xf32>
    %35 = vector.extract_strided_slice %0 {offsets = [5, 0], sizes = [1, 32], strides = [1, 1]} : vector<9x32xf32> to vector<1x32xf32>
    %36 = vector.extract_strided_slice %0 {offsets = [6, 0], sizes = [1, 32], strides = [1, 1]} : vector<9x32xf32> to vector<1x32xf32>
    %37 = arith.addf %36, %31 : vector<1x32xf32>
    %38 = vector.extract_strided_slice %0 {offsets = [7, 0], sizes = [2, 32], strides = [1, 1]} : vector<9x32xf32> to vector<2x32xf32>
    %39 = tpu.concatenate %32, %34, %35, %37, %38 in 0 : vector<1x32xf32>, vector<4x32xf32>, vector<1x32xf32>, vector<1x32xf32>, vector<2x32xf32> -> vector<9x32xf32>
    %c1_12 = arith.constant 1 : index
    %c0_13 = arith.constant 0 : index
    %c0_14 = arith.constant 0 : index
    %40 = vector.load %arg2[%c1_12, %c0_13, %c0_14] : memref<2x4x1xf32, #tpu.memory_space<vmem>>, vector<1x4x1xf32>
    %41 = vector.shape_cast %40 : vector<1x4x1xf32> to vector<4x1xf32>
    %c0_15 = arith.constant 0 : index
    %c0_16 = arith.constant 0 : index
    %42 = vector.load %arg4[%c0_15, %c0_16] : memref<4x32xf32, #tpu.memory_space<vmem>>, vector<4x32xf32>
    %43 = vector.broadcast %41 : vector<4x1xf32> to vector<4x32xf32>
    %44 = arith.mulf %43, %42 : vector<4x32xf32>
    %c1_i32_17 = arith.constant 1 : i32
    %45 = arith.addi %1, %c1_i32_17 : i32
    %46 = arith.index_cast %45 : i32 to index
    %47 = memref.load %arg1[%46] : memref<2xi32, #tpu.memory_space<smem>>
    %cst_18 = arith.constant 0.000000e+00 : f32
    %48 = vector.broadcast %cst_18 : f32 to vector<1x32xf32>
    %c0_i32_19 = arith.constant 0 : i32
    %49 = arith.cmpi eq, %47, %c0_i32_19 : i32
    %50 = arith.extui %49 : i1 to i32
    %51 = arith.sitofp %50 : i32 to f32
    %c0_20 = arith.constant 0 : index
    %c0_21 = arith.constant 0 : index
    %52 = vector.load %arg5[%c0_20, %c0_21] : memref<3x32xf32, #tpu.memory_space<vmem>>, vector<1x32xf32>
    %53 = vector.broadcast %51 : f32 to vector<1x32xf32>
    %54 = arith.mulf %53, %52 : vector<1x32xf32>
    %55 = arith.addf %48, %54 : vector<1x32xf32>
    %c1_i32_22 = arith.constant 1 : i32
    %56 = arith.cmpi eq, %47, %c1_i32_22 : i32
    %57 = arith.extui %56 : i1 to i32
    %58 = arith.sitofp %57 : i32 to f32
    %c1_23 = arith.constant 1 : index
    %c0_24 = arith.constant 0 : index
    %59 = vector.load %arg5[%c1_23, %c0_24] : memref<3x32xf32, #tpu.memory_space<vmem>>, vector<1x32xf32>
    %60 = vector.broadcast %58 : f32 to vector<1x32xf32>
    %61 = arith.mulf %60, %59 : vector<1x32xf32>
    %62 = arith.addf %55, %61 : vector<1x32xf32>
    %c2_i32_25 = arith.constant 2 : i32
    %63 = arith.cmpi eq, %47, %c2_i32_25 : i32
    %64 = arith.extui %63 : i1 to i32
    %65 = arith.sitofp %64 : i32 to f32
    %c2_26 = arith.constant 2 : index
    %c0_27 = arith.constant 0 : index
    %66 = vector.load %arg5[%c2_26, %c0_27] : memref<3x32xf32, #tpu.memory_space<vmem>>, vector<1x32xf32>
    %67 = vector.broadcast %65 : f32 to vector<1x32xf32>
    %68 = arith.mulf %67, %66 : vector<1x32xf32>
    %69 = arith.addf %62, %68 : vector<1x32xf32>
    %70 = vector.extract_strided_slice %0 {offsets = [0, 0], sizes = [1, 32], strides = [1, 1]} : vector<9x32xf32> to vector<1x32xf32>
    %71 = vector.extract_strided_slice %0 {offsets = [1, 0], sizes = [4, 32], strides = [1, 1]} : vector<9x32xf32> to vector<4x32xf32>
    %72 = arith.addf %71, %44 : vector<4x32xf32>
    %73 = vector.extract_strided_slice %0 {offsets = [5, 0], sizes = [1, 32], strides = [1, 1]} : vector<9x32xf32> to vector<1x32xf32>
    %74 = vector.extract_strided_slice %0 {offsets = [6, 0], sizes = [1, 32], strides = [1, 1]} : vector<9x32xf32> to vector<1x32xf32>
    %75 = arith.addf %74, %69 : vector<1x32xf32>
    %76 = vector.extract_strided_slice %0 {offsets = [7, 0], sizes = [2, 32], strides = [1, 1]} : vector<9x32xf32> to vector<2x32xf32>
    %77 = tpu.concatenate %70, %72, %73, %75, %76 in 0 : vector<1x32xf32>, vector<4x32xf32>, vector<1x32xf32>, vector<1x32xf32>, vector<2x32xf32> -> vector<9x32xf32>
    %78 = tpu.concatenate %39, %77 in 0 : vector<9x32xf32>, vector<9x32xf32> -> vector<18x32xf32>
    %c0_28 = arith.constant 0 : index
    %c0_29 = arith.constant 0 : index
    %79 = vector.load %arg6[%c0_28, %c0_29] : memref<18x18xf32, #tpu.memory_space<vmem>>, vector<18x18xf32>
    %cst_30 = arith.constant 0.000000e+00 : f32
    %80 = vector.broadcast %cst_30 : f32 to vector<18x32xf32>
    %c0_31 = arith.constant 0 : index
    %c0_32 = arith.constant 0 : index
    %c0_33 = arith.constant 0 : index
    %c0_34 = arith.constant 0 : index
    %81 = vector.load %arg8[%c0_31, %c0_32, %c0_33, %c0_34] : memref<2x4x32x8xf32, #tpu.memory_space<vmem>>, vector<1x1x32x8xf32>
    %82 = vector.shape_cast %81 : vector<1x1x32x8xf32> to vector<32x8xf32>
    %cst_35 = arith.constant dense<0.000000e+00> : vector<18x8xf32>
    %83 = tpu.matmul %78, %82, %cst_35 {dimension_numbers = #tpu.dot_dimension_numbers<[1], [0], [0], [1], [0, 0, 1, 1], [], []>} : vector<18x32xf32>, vector<32x8xf32>, vector<18x8xf32> -> vector<18x8xf32>
    %c0_36 = arith.constant 0 : index
    %c0_37 = arith.constant 0 : index
    %c0_38 = arith.constant 0 : index
    %c0_39 = arith.constant 0 : index
    %84 = vector.load %arg11[%c0_36, %c0_37, %c0_38, %c0_39] : memref<2x4x1x8xf32, #tpu.memory_space<vmem>>, vector<1x1x1x8xf32>
    %85 = vector.shape_cast %84 : vector<1x1x1x8xf32> to vector<1x8xf32>
    %86 = vector.broadcast %85 : vector<1x8xf32> to vector<18x8xf32>
    %87 = arith.addf %83, %86 : vector<18x8xf32>
    %c0_40 = arith.constant 0 : index
    %c0_41 = arith.constant 0 : index
    %c0_42 = arith.constant 0 : index
    %c0_43 = arith.constant 0 : index
    %88 = vector.load %arg9[%c0_40, %c0_41, %c0_42, %c0_43] : memref<2x4x32x8xf32, #tpu.memory_space<vmem>>, vector<1x1x32x8xf32>
    %89 = vector.shape_cast %88 : vector<1x1x32x8xf32> to vector<32x8xf32>
    %cst_44 = arith.constant dense<0.000000e+00> : vector<18x8xf32>
    %90 = tpu.matmul %78, %89, %cst_44 {dimension_numbers = #tpu.dot_dimension_numbers<[1], [0], [0], [1], [0, 0, 1, 1], [], []>} : vector<18x32xf32>, vector<32x8xf32>, vector<18x8xf32> -> vector<18x8xf32>
    %c0_45 = arith.constant 0 : index
    %c0_46 = arith.constant 0 : index
    %c0_47 = arith.constant 0 : index
    %c0_48 = arith.constant 0 : index
    %91 = vector.load %arg12[%c0_45, %c0_46, %c0_47, %c0_48] : memref<2x4x1x8xf32, #tpu.memory_space<vmem>>, vector<1x1x1x8xf32>
    %92 = vector.shape_cast %91 : vector<1x1x1x8xf32> to vector<1x8xf32>
    %93 = vector.broadcast %92 : vector<1x8xf32> to vector<18x8xf32>
    %94 = arith.addf %90, %93 : vector<18x8xf32>
    %c0_49 = arith.constant 0 : index
    %c0_50 = arith.constant 0 : index
    %c0_51 = arith.constant 0 : index
    %c0_52 = arith.constant 0 : index
    %95 = vector.load %arg10[%c0_49, %c0_50, %c0_51, %c0_52] : memref<2x4x32x8xf32, #tpu.memory_space<vmem>>, vector<1x1x32x8xf32>
    %96 = vector.shape_cast %95 : vector<1x1x32x8xf32> to vector<32x8xf32>
    %cst_53 = arith.constant dense<0.000000e+00> : vector<18x8xf32>
    %97 = tpu.matmul %78, %96, %cst_53 {dimension_numbers = #tpu.dot_dimension_numbers<[1], [0], [0], [1], [0, 0, 1, 1], [], []>} : vector<18x32xf32>, vector<32x8xf32>, vector<18x8xf32> -> vector<18x8xf32>
    %c0_54 = arith.constant 0 : index
    %c0_55 = arith.constant 0 : index
    %c0_56 = arith.constant 0 : index
    %c0_57 = arith.constant 0 : index
    %98 = vector.load %arg13[%c0_54, %c0_55, %c0_56, %c0_57] : memref<2x4x1x8xf32, #tpu.memory_space<vmem>>, vector<1x1x1x8xf32>
    %99 = vector.shape_cast %98 : vector<1x1x1x8xf32> to vector<1x8xf32>
    %100 = vector.broadcast %99 : vector<1x8xf32> to vector<18x8xf32>
    %101 = arith.addf %97, %100 : vector<18x8xf32>
    %cst_58 = arith.constant dense<0.000000e+00> : vector<18x18xf32>
    %102 = tpu.matmul %87, %94, %cst_58 {dimension_numbers = #tpu.dot_dimension_numbers<[1], [1], [0], [0], [0, 0, 1, 0], [], []>} : vector<18x8xf32>, vector<18x8xf32>, vector<18x18xf32> -> vector<18x18xf32>
    %103 = arith.addf %102, %79 : vector<18x18xf32>
    %cst_59 = arith.constant dense<0xFF800000> : vector<18xf32>
    %104 = vector.multi_reduction <maximumf>, %103, %cst_59 [1] : vector<18x18xf32> to vector<18xf32>
    %105 = vector.shape_cast %104 : vector<18xf32> to vector<18x1xf32>
    %106 = vector.broadcast %105 : vector<18x1xf32> to vector<18x18xf32>
    %107 = arith.subf %103, %106 : vector<18x18xf32>
    %108 = math.exp %107 : vector<18x18xf32>
    %cst_60 = arith.constant dense<0.000000e+00> : vector<18xf32>
    %109 = vector.multi_reduction <add>, %108, %cst_60 [1] : vector<18x18xf32> to vector<18xf32>
    %110 = vector.shape_cast %109 : vector<18xf32> to vector<18x1xf32>
    %111 = tpu.reciprocal %110 {approx = true} : vector<18x1xf32> -> vector<18x1xf32>
    %112 = vector.broadcast %111 : vector<18x1xf32> to vector<18x18xf32>
    %113 = arith.mulf %108, %112 : vector<18x18xf32>
    %cst_61 = arith.constant dense<0.000000e+00> : vector<18x8xf32>
    %114 = tpu.matmul %113, %101, %cst_61 {dimension_numbers = #tpu.dot_dimension_numbers<[1], [0], [0], [1], [0, 0, 1, 1], [], []>} : vector<18x18xf32>, vector<18x8xf32>, vector<18x8xf32> -> vector<18x8xf32>
    %c0_62 = arith.constant 0 : index
    %c0_63 = arith.constant 0 : index
    %c0_64 = arith.constant 0 : index
    %c0_65 = arith.constant 0 : index
    %115 = vector.load %arg14[%c0_62, %c0_63, %c0_64, %c0_65] : memref<2x4x8x32xf32, #tpu.memory_space<vmem>>, vector<1x1x8x32xf32>
    %116 = vector.shape_cast %115 : vector<1x1x8x32xf32> to vector<8x32xf32>
    %cst_66 = arith.constant dense<0.000000e+00> : vector<18x32xf32>
    %117 = tpu.matmul %114, %116, %cst_66 {dimension_numbers = #tpu.dot_dimension_numbers<[1], [0], [0], [1], [0, 0, 1, 1], [], []>} : vector<18x8xf32>, vector<8x32xf32>, vector<18x32xf32> -> vector<18x32xf32>
    %118 = arith.addf %80, %117 : vector<18x32xf32>
    %c0_67 = arith.constant 0 : index
    %c1_68 = arith.constant 1 : index
    %c0_69 = arith.constant 0 : index
    %c0_70 = arith.constant 0 : index
    %119 = vector.load %arg8[%c0_67, %c1_68, %c0_69, %c0_70] : memref<2x4x32x8xf32, #tpu.memory_space<vmem>>, vector<1x1x32x8xf32>
    %120 = vector.shape_cast %119 : vector<1x1x32x8xf32> to vector<32x8xf32>
    %cst_71 = arith.constant dense<0.000000e+00> : vector<18x8xf32>
    %121 = tpu.matmul %78, %120, %cst_71 {dimension_numbers = #tpu.dot_dimension_numbers<[1], [0], [0], [1], [0, 0, 1, 1], [], []>} : vector<18x32xf32>, vector<32x8xf32>, vector<18x8xf32> -> vector<18x8xf32>
    %c0_72 = arith.constant 0 : index
    %c1_73 = arith.constant 1 : index
    %c0_74 = arith.constant 0 : index
    %c0_75 = arith.constant 0 : index
    %122 = vector.load %arg11[%c0_72, %c1_73, %c0_74, %c0_75] : memref<2x4x1x8xf32, #tpu.memory_space<vmem>>, vector<1x1x1x8xf32>
    %123 = vector.shape_cast %122 : vector<1x1x1x8xf32> to vector<1x8xf32>
    %124 = vector.broadcast %123 : vector<1x8xf32> to vector<18x8xf32>
    %125 = arith.addf %121, %124 : vector<18x8xf32>
    %c0_76 = arith.constant 0 : index
    %c1_77 = arith.constant 1 : index
    %c0_78 = arith.constant 0 : index
    %c0_79 = arith.constant 0 : index
    %126 = vector.load %arg9[%c0_76, %c1_77, %c0_78, %c0_79] : memref<2x4x32x8xf32, #tpu.memory_space<vmem>>, vector<1x1x32x8xf32>
    %127 = vector.shape_cast %126 : vector<1x1x32x8xf32> to vector<32x8xf32>
    %cst_80 = arith.constant dense<0.000000e+00> : vector<18x8xf32>
    %128 = tpu.matmul %78, %127, %cst_80 {dimension_numbers = #tpu.dot_dimension_numbers<[1], [0], [0], [1], [0, 0, 1, 1], [], []>} : vector<18x32xf32>, vector<32x8xf32>, vector<18x8xf32> -> vector<18x8xf32>
    %c0_81 = arith.constant 0 : index
    %c1_82 = arith.constant 1 : index
    %c0_83 = arith.constant 0 : index
    %c0_84 = arith.constant 0 : index
    %129 = vector.load %arg12[%c0_81, %c1_82, %c0_83, %c0_84] : memref<2x4x1x8xf32, #tpu.memory_space<vmem>>, vector<1x1x1x8xf32>
    %130 = vector.shape_cast %129 : vector<1x1x1x8xf32> to vector<1x8xf32>
    %131 = vector.broadcast %130 : vector<1x8xf32> to vector<18x8xf32>
    %132 = arith.addf %128, %131 : vector<18x8xf32>
    %c0_85 = arith.constant 0 : index
    %c1_86 = arith.constant 1 : index
    %c0_87 = arith.constant 0 : index
    %c0_88 = arith.constant 0 : index
    %133 = vector.load %arg10[%c0_85, %c1_86, %c0_87, %c0_88] : memref<2x4x32x8xf32, #tpu.memory_space<vmem>>, vector<1x1x32x8xf32>
    %134 = vector.shape_cast %133 : vector<1x1x32x8xf32> to vector<32x8xf32>
    %cst_89 = arith.constant dense<0.000000e+00> : vector<18x8xf32>
    %135 = tpu.matmul %78, %134, %cst_89 {dimension_numbers = #tpu.dot_dimension_numbers<[1], [0], [0], [1], [0, 0, 1, 1], [], []>} : vector<18x32xf32>, vector<32x8xf32>, vector<18x8xf32> -> vector<18x8xf32>
    %c0_90 = arith.constant 0 : index
    %c1_91 = arith.constant 1 : index
    %c0_92 = arith.constant 0 : index
    %c0_93 = arith.constant 0 : index
    %136 = vector.load %arg13[%c0_90, %c1_91, %c0_92, %c0_93] : memref<2x4x1x8xf32, #tpu.memory_space<vmem>>, vector<1x1x1x8xf32>
    %137 = vector.shape_cast %136 : vector<1x1x1x8xf32> to vector<1x8xf32>
    %138 = vector.broadcast %137 : vector<1x8xf32> to vector<18x8xf32>
    %139 = arith.addf %135, %138 : vector<18x8xf32>
    %cst_94 = arith.constant dense<0.000000e+00> : vector<18x18xf32>
    %140 = tpu.matmul %125, %132, %cst_94 {dimension_numbers = #tpu.dot_dimension_numbers<[1], [1], [0], [0], [0, 0, 1, 0], [], []>} : vector<18x8xf32>, vector<18x8xf32>, vector<18x18xf32> -> vector<18x18xf32>
    %141 = arith.addf %140, %79 : vector<18x18xf32>
    %cst_95 = arith.constant dense<0xFF800000> : vector<18xf32>
    %142 = vector.multi_reduction <maximumf>, %141, %cst_95 [1] : vector<18x18xf32> to vector<18xf32>
    %143 = vector.shape_cast %142 : vector<18xf32> to vector<18x1xf32>
    %144 = vector.broadcast %143 : vector<18x1xf32> to vector<18x18xf32>
    %145 = arith.subf %141, %144 : vector<18x18xf32>
    %146 = math.exp %145 : vector<18x18xf32>
    %cst_96 = arith.constant dense<0.000000e+00> : vector<18xf32>
    %147 = vector.multi_reduction <add>, %146, %cst_96 [1] : vector<18x18xf32> to vector<18xf32>
    %148 = vector.shape_cast %147 : vector<18xf32> to vector<18x1xf32>
    %149 = tpu.reciprocal %148 {approx = true} : vector<18x1xf32> -> vector<18x1xf32>
    %150 = vector.broadcast %149 : vector<18x1xf32> to vector<18x18xf32>
    %151 = arith.mulf %146, %150 : vector<18x18xf32>
    %cst_97 = arith.constant dense<0.000000e+00> : vector<18x8xf32>
    %152 = tpu.matmul %151, %139, %cst_97 {dimension_numbers = #tpu.dot_dimension_numbers<[1], [0], [0], [1], [0, 0, 1, 1], [], []>} : vector<18x18xf32>, vector<18x8xf32>, vector<18x8xf32> -> vector<18x8xf32>
    %c0_98 = arith.constant 0 : index
    %c1_99 = arith.constant 1 : index
    %c0_100 = arith.constant 0 : index
    %c0_101 = arith.constant 0 : index
    %153 = vector.load %arg14[%c0_98, %c1_99, %c0_100, %c0_101] : memref<2x4x8x32xf32, #tpu.memory_space<vmem>>, vector<1x1x8x32xf32>
    %154 = vector.shape_cast %153 : vector<1x1x8x32xf32> to vector<8x32xf32>
    %cst_102 = arith.constant dense<0.000000e+00> : vector<18x32xf32>
    %155 = tpu.matmul %152, %154, %cst_102 {dimension_numbers = #tpu.dot_dimension_numbers<[1], [0], [0], [1], [0, 0, 1, 1], [], []>} : vector<18x8xf32>, vector<8x32xf32>, vector<18x32xf32> -> vector<18x32xf32>
    %156 = arith.addf %118, %155 : vector<18x32xf32>
    %c0_103 = arith.constant 0 : index
    %c2_104 = arith.constant 2 : index
    %c0_105 = arith.constant 0 : index
    %c0_106 = arith.constant 0 : index
    %157 = vector.load %arg8[%c0_103, %c2_104, %c0_105, %c0_106] : memref<2x4x32x8xf32, #tpu.memory_space<vmem>>, vector<1x1x32x8xf32>
    %158 = vector.shape_cast %157 : vector<1x1x32x8xf32> to vector<32x8xf32>
    %cst_107 = arith.constant dense<0.000000e+00> : vector<18x8xf32>
    %159 = tpu.matmul %78, %158, %cst_107 {dimension_numbers = #tpu.dot_dimension_numbers<[1], [0], [0], [1], [0, 0, 1, 1], [], []>} : vector<18x32xf32>, vector<32x8xf32>, vector<18x8xf32> -> vector<18x8xf32>
    %c0_108 = arith.constant 0 : index
    %c2_109 = arith.constant 2 : index
    %c0_110 = arith.constant 0 : index
    %c0_111 = arith.constant 0 : index
    %160 = vector.load %arg11[%c0_108, %c2_109, %c0_110, %c0_111] : memref<2x4x1x8xf32, #tpu.memory_space<vmem>>, vector<1x1x1x8xf32>
    %161 = vector.shape_cast %160 : vector<1x1x1x8xf32> to vector<1x8xf32>
    %162 = vector.broadcast %161 : vector<1x8xf32> to vector<18x8xf32>
    %163 = arith.addf %159, %162 : vector<18x8xf32>
    %c0_112 = arith.constant 0 : index
    %c2_113 = arith.constant 2 : index
    %c0_114 = arith.constant 0 : index
    %c0_115 = arith.constant 0 : index
    %164 = vector.load %arg9[%c0_112, %c2_113, %c0_114, %c0_115] : memref<2x4x32x8xf32, #tpu.memory_space<vmem>>, vector<1x1x32x8xf32>
    %165 = vector.shape_cast %164 : vector<1x1x32x8xf32> to vector<32x8xf32>
    %cst_116 = arith.constant dense<0.000000e+00> : vector<18x8xf32>
    %166 = tpu.matmul %78, %165, %cst_116 {dimension_numbers = #tpu.dot_dimension_numbers<[1], [0], [0], [1], [0, 0, 1, 1], [], []>} : vector<18x32xf32>, vector<32x8xf32>, vector<18x8xf32> -> vector<18x8xf32>
    %c0_117 = arith.constant 0 : index
    %c2_118 = arith.constant 2 : index
    %c0_119 = arith.constant 0 : index
    %c0_120 = arith.constant 0 : index
    %167 = vector.load %arg12[%c0_117, %c2_118, %c0_119, %c0_120] : memref<2x4x1x8xf32, #tpu.memory_space<vmem>>, vector<1x1x1x8xf32>
    %168 = vector.shape_cast %167 : vector<1x1x1x8xf32> to vector<1x8xf32>
    %169 = vector.broadcast %168 : vector<1x8xf32> to vector<18x8xf32>
    %170 = arith.addf %166, %169 : vector<18x8xf32>
    %c0_121 = arith.constant 0 : index
    %c2_122 = arith.constant 2 : index
    %c0_123 = arith.constant 0 : index
    %c0_124 = arith.constant 0 : index
    %171 = vector.load %arg10[%c0_121, %c2_122, %c0_123, %c0_124] : memref<2x4x32x8xf32, #tpu.memory_space<vmem>>, vector<1x1x32x8xf32>
    %172 = vector.shape_cast %171 : vector<1x1x32x8xf32> to vector<32x8xf32>
    %cst_125 = arith.constant dense<0.000000e+00> : vector<18x8xf32>
    %173 = tpu.matmul %78, %172, %cst_125 {dimension_numbers = #tpu.dot_dimension_numbers<[1], [0], [0], [1], [0, 0, 1, 1], [], []>} : vector<18x32xf32>, vector<32x8xf32>, vector<18x8xf32> -> vector<18x8xf32>
    %c0_126 = arith.constant 0 : index
    %c2_127 = arith.constant 2 : index
    %c0_128 = arith.constant 0 : index
    %c0_129 = arith.constant 0 : index
    %174 = vector.load %arg13[%c0_126, %c2_127, %c0_128, %c0_129] : memref<2x4x1x8xf32, #tpu.memory_space<vmem>>, vector<1x1x1x8xf32>
    %175 = vector.shape_cast %174 : vector<1x1x1x8xf32> to vector<1x8xf32>
    %176 = vector.broadcast %175 : vector<1x8xf32> to vector<18x8xf32>
    %177 = arith.addf %173, %176 : vector<18x8xf32>
    %cst_130 = arith.constant dense<0.000000e+00> : vector<18x18xf32>
    %178 = tpu.matmul %163, %170, %cst_130 {dimension_numbers = #tpu.dot_dimension_numbers<[1], [1], [0], [0], [0, 0, 1, 0], [], []>} : vector<18x8xf32>, vector<18x8xf32>, vector<18x18xf32> -> vector<18x18xf32>
    %179 = arith.addf %178, %79 : vector<18x18xf32>
    %cst_131 = arith.constant dense<0xFF800000> : vector<18xf32>
    %180 = vector.multi_reduction <maximumf>, %179, %cst_131 [1] : vector<18x18xf32> to vector<18xf32>
    %181 = vector.shape_cast %180 : vector<18xf32> to vector<18x1xf32>
    %182 = vector.broadcast %181 : vector<18x1xf32> to vector<18x18xf32>
    %183 = arith.subf %179, %182 : vector<18x18xf32>
    %184 = math.exp %183 : vector<18x18xf32>
    %cst_132 = arith.constant dense<0.000000e+00> : vector<18xf32>
    %185 = vector.multi_reduction <add>, %184, %cst_132 [1] : vector<18x18xf32> to vector<18xf32>
    %186 = vector.shape_cast %185 : vector<18xf32> to vector<18x1xf32>
    %187 = tpu.reciprocal %186 {approx = true} : vector<18x1xf32> -> vector<18x1xf32>
    %188 = vector.broadcast %187 : vector<18x1xf32> to vector<18x18xf32>
    %189 = arith.mulf %184, %188 : vector<18x18xf32>
    %cst_133 = arith.constant dense<0.000000e+00> : vector<18x8xf32>
    %190 = tpu.matmul %189, %177, %cst_133 {dimension_numbers = #tpu.dot_dimension_numbers<[1], [0], [0], [1], [0, 0, 1, 1], [], []>} : vector<18x18xf32>, vector<18x8xf32>, vector<18x8xf32> -> vector<18x8xf32>
    %c0_134 = arith.constant 0 : index
    %c2_135 = arith.constant 2 : index
    %c0_136 = arith.constant 0 : index
    %c0_137 = arith.constant 0 : index
    %191 = vector.load %arg14[%c0_134, %c2_135, %c0_136, %c0_137] : memref<2x4x8x32xf32, #tpu.memory_space<vmem>>, vector<1x1x8x32xf32>
    %192 = vector.shape_cast %191 : vector<1x1x8x32xf32> to vector<8x32xf32>
    %cst_138 = arith.constant dense<0.000000e+00> : vector<18x32xf32>
    %193 = tpu.matmul %190, %192, %cst_138 {dimension_numbers = #tpu.dot_dimension_numbers<[1], [0], [0], [1], [0, 0, 1, 1], [], []>} : vector<18x8xf32>, vector<8x32xf32>, vector<18x32xf32> -> vector<18x32xf32>
    %194 = arith.addf %156, %193 : vector<18x32xf32>
    %c0_139 = arith.constant 0 : index
    %c3 = arith.constant 3 : index
    %c0_140 = arith.constant 0 : index
    %c0_141 = arith.constant 0 : index
    %195 = vector.load %arg8[%c0_139, %c3, %c0_140, %c0_141] : memref<2x4x32x8xf32, #tpu.memory_space<vmem>>, vector<1x1x32x8xf32>
    %196 = vector.shape_cast %195 : vector<1x1x32x8xf32> to vector<32x8xf32>
    %cst_142 = arith.constant dense<0.000000e+00> : vector<18x8xf32>
    %197 = tpu.matmul %78, %196, %cst_142 {dimension_numbers = #tpu.dot_dimension_numbers<[1], [0], [0], [1], [0, 0, 1, 1], [], []>} : vector<18x32xf32>, vector<32x8xf32>, vector<18x8xf32> -> vector<18x8xf32>
    %c0_143 = arith.constant 0 : index
    %c3_144 = arith.constant 3 : index
    %c0_145 = arith.constant 0 : index
    %c0_146 = arith.constant 0 : index
    %198 = vector.load %arg11[%c0_143, %c3_144, %c0_145, %c0_146] : memref<2x4x1x8xf32, #tpu.memory_space<vmem>>, vector<1x1x1x8xf32>
    %199 = vector.shape_cast %198 : vector<1x1x1x8xf32> to vector<1x8xf32>
    %200 = vector.broadcast %199 : vector<1x8xf32> to vector<18x8xf32>
    %201 = arith.addf %197, %200 : vector<18x8xf32>
    %c0_147 = arith.constant 0 : index
    %c3_148 = arith.constant 3 : index
    %c0_149 = arith.constant 0 : index
    %c0_150 = arith.constant 0 : index
    %202 = vector.load %arg9[%c0_147, %c3_148, %c0_149, %c0_150] : memref<2x4x32x8xf32, #tpu.memory_space<vmem>>, vector<1x1x32x8xf32>
    %203 = vector.shape_cast %202 : vector<1x1x32x8xf32> to vector<32x8xf32>
    %cst_151 = arith.constant dense<0.000000e+00> : vector<18x8xf32>
    %204 = tpu.matmul %78, %203, %cst_151 {dimension_numbers = #tpu.dot_dimension_numbers<[1], [0], [0], [1], [0, 0, 1, 1], [], []>} : vector<18x32xf32>, vector<32x8xf32>, vector<18x8xf32> -> vector<18x8xf32>
    %c0_152 = arith.constant 0 : index
    %c3_153 = arith.constant 3 : index
    %c0_154 = arith.constant 0 : index
    %c0_155 = arith.constant 0 : index
    %205 = vector.load %arg12[%c0_152, %c3_153, %c0_154, %c0_155] : memref<2x4x1x8xf32, #tpu.memory_space<vmem>>, vector<1x1x1x8xf32>
    %206 = vector.shape_cast %205 : vector<1x1x1x8xf32> to vector<1x8xf32>
    %207 = vector.broadcast %206 : vector<1x8xf32> to vector<18x8xf32>
    %208 = arith.addf %204, %207 : vector<18x8xf32>
    %c0_156 = arith.constant 0 : index
    %c3_157 = arith.constant 3 : index
    %c0_158 = arith.constant 0 : index
    %c0_159 = arith.constant 0 : index
    %209 = vector.load %arg10[%c0_156, %c3_157, %c0_158, %c0_159] : memref<2x4x32x8xf32, #tpu.memory_space<vmem>>, vector<1x1x32x8xf32>
    %210 = vector.shape_cast %209 : vector<1x1x32x8xf32> to vector<32x8xf32>
    %cst_160 = arith.constant dense<0.000000e+00> : vector<18x8xf32>
    %211 = tpu.matmul %78, %210, %cst_160 {dimension_numbers = #tpu.dot_dimension_numbers<[1], [0], [0], [1], [0, 0, 1, 1], [], []>} : vector<18x32xf32>, vector<32x8xf32>, vector<18x8xf32> -> vector<18x8xf32>
    %c0_161 = arith.constant 0 : index
    %c3_162 = arith.constant 3 : index
    %c0_163 = arith.constant 0 : index
    %c0_164 = arith.constant 0 : index
    %212 = vector.load %arg13[%c0_161, %c3_162, %c0_163, %c0_164] : memref<2x4x1x8xf32, #tpu.memory_space<vmem>>, vector<1x1x1x8xf32>
    %213 = vector.shape_cast %212 : vector<1x1x1x8xf32> to vector<1x8xf32>
    %214 = vector.broadcast %213 : vector<1x8xf32> to vector<18x8xf32>
    %215 = arith.addf %211, %214 : vector<18x8xf32>
    %cst_165 = arith.constant dense<0.000000e+00> : vector<18x18xf32>
    %216 = tpu.matmul %201, %208, %cst_165 {dimension_numbers = #tpu.dot_dimension_numbers<[1], [1], [0], [0], [0, 0, 1, 0], [], []>} : vector<18x8xf32>, vector<18x8xf32>, vector<18x18xf32> -> vector<18x18xf32>
    %217 = arith.addf %216, %79 : vector<18x18xf32>
    %cst_166 = arith.constant dense<0xFF800000> : vector<18xf32>
    %218 = vector.multi_reduction <maximumf>, %217, %cst_166 [1] : vector<18x18xf32> to vector<18xf32>
    %219 = vector.shape_cast %218 : vector<18xf32> to vector<18x1xf32>
    %220 = vector.broadcast %219 : vector<18x1xf32> to vector<18x18xf32>
    %221 = arith.subf %217, %220 : vector<18x18xf32>
    %222 = math.exp %221 : vector<18x18xf32>
    %cst_167 = arith.constant dense<0.000000e+00> : vector<18xf32>
    %223 = vector.multi_reduction <add>, %222, %cst_167 [1] : vector<18x18xf32> to vector<18xf32>
    %224 = vector.shape_cast %223 : vector<18xf32> to vector<18x1xf32>
    %225 = tpu.reciprocal %224 {approx = true} : vector<18x1xf32> -> vector<18x1xf32>
    %226 = vector.broadcast %225 : vector<18x1xf32> to vector<18x18xf32>
    %227 = arith.mulf %222, %226 : vector<18x18xf32>
    %cst_168 = arith.constant dense<0.000000e+00> : vector<18x8xf32>
    %228 = tpu.matmul %227, %215, %cst_168 {dimension_numbers = #tpu.dot_dimension_numbers<[1], [0], [0], [1], [0, 0, 1, 1], [], []>} : vector<18x18xf32>, vector<18x8xf32>, vector<18x8xf32> -> vector<18x8xf32>
    %c0_169 = arith.constant 0 : index
    %c3_170 = arith.constant 3 : index
    %c0_171 = arith.constant 0 : index
    %c0_172 = arith.constant 0 : index
    %229 = vector.load %arg14[%c0_169, %c3_170, %c0_171, %c0_172] : memref<2x4x8x32xf32, #tpu.memory_space<vmem>>, vector<1x1x8x32xf32>
    %230 = vector.shape_cast %229 : vector<1x1x8x32xf32> to vector<8x32xf32>
    %cst_173 = arith.constant dense<0.000000e+00> : vector<18x32xf32>
    %231 = tpu.matmul %228, %230, %cst_173 {dimension_numbers = #tpu.dot_dimension_numbers<[1], [0], [0], [1], [0, 0, 1, 1], [], []>} : vector<18x8xf32>, vector<8x32xf32>, vector<18x32xf32> -> vector<18x32xf32>
    %232 = arith.addf %194, %231 : vector<18x32xf32>
    %c0_174 = arith.constant 0 : index
    %c0_175 = arith.constant 0 : index
    %c0_176 = arith.constant 0 : index
    %233 = vector.load %arg15[%c0_174, %c0_175, %c0_176] : memref<2x1x32xf32, #tpu.memory_space<vmem>>, vector<1x1x32xf32>
    %234 = vector.shape_cast %233 : vector<1x1x32xf32> to vector<1x32xf32>
    %235 = vector.broadcast %234 : vector<1x32xf32> to vector<18x32xf32>
    %236 = arith.addf %232, %235 : vector<18x32xf32>
    %237 = arith.addf %78, %236 : vector<18x32xf32>
    %c0_177 = arith.constant 0 : index
    %c0_178 = arith.constant 0 : index
    %c0_179 = arith.constant 0 : index
    %238 = vector.load %arg16[%c0_177, %c0_178, %c0_179] : memref<2x1x32xf32, #tpu.memory_space<vmem>>, vector<1x1x32xf32>
    %239 = vector.shape_cast %238 : vector<1x1x32xf32> to vector<1x32xf32>
    %c0_180 = arith.constant 0 : index
    %c0_181 = arith.constant 0 : index
    %c0_182 = arith.constant 0 : index
    %240 = vector.load %arg17[%c0_180, %c0_181, %c0_182] : memref<2x1x32xf32, #tpu.memory_space<vmem>>, vector<1x1x32xf32>
    %241 = vector.shape_cast %240 : vector<1x1x32xf32> to vector<1x32xf32>
    %cst_183 = arith.constant dense<0.000000e+00> : vector<18xf32>
    %242 = vector.multi_reduction <add>, %237, %cst_183 [1] : vector<18x32xf32> to vector<18xf32>
    %243 = vector.shape_cast %242 : vector<18xf32> to vector<18x1xf32>
    %cst_184 = arith.constant 3.200000e+01 : f32
    %244 = vector.broadcast %cst_184 : f32 to vector<18x1xf32>
    %245 = arith.divf %243, %244 : vector<18x1xf32>
    %246 = vector.broadcast %245 : vector<18x1xf32> to vector<18x32xf32>
    %247 = arith.subf %237, %246 : vector<18x32xf32>
    %248 = arith.mulf %247, %247 : vector<18x32xf32>
    %cst_185 = arith.constant dense<0.000000e+00> : vector<18xf32>
    %249 = vector.multi_reduction <add>, %248, %cst_185 [1] : vector<18x32xf32> to vector<18xf32>
    %250 = vector.shape_cast %249 : vector<18xf32> to vector<18x1xf32>
    %cst_186 = arith.constant 3.200000e+01 : f32
    %251 = vector.broadcast %cst_186 : f32 to vector<18x1xf32>
    %252 = arith.divf %250, %251 : vector<18x1xf32>
    %253 = vector.broadcast %245 : vector<18x1xf32> to vector<18x32xf32>
    %254 = arith.subf %237, %253 : vector<18x32xf32>
    %cst_187 = arith.constant 9.99999974E-6 : f32
    %255 = vector.broadcast %cst_187 : f32 to vector<18x1xf32>
    %256 = arith.addf %252, %255 : vector<18x1xf32>
    %257 = math.rsqrt %256 : vector<18x1xf32>
    %258 = vector.broadcast %257 : vector<18x1xf32> to vector<18x32xf32>
    %259 = arith.mulf %254, %258 : vector<18x32xf32>
    %260 = vector.broadcast %239 : vector<1x32xf32> to vector<18x32xf32>
    %261 = arith.mulf %259, %260 : vector<18x32xf32>
    %262 = vector.broadcast %241 : vector<1x32xf32> to vector<18x32xf32>
    %263 = arith.addf %261, %262 : vector<18x32xf32>
    %c0_188 = arith.constant 0 : index
    %c0_189 = arith.constant 0 : index
    %c0_190 = arith.constant 0 : index
    %264 = vector.load %arg20[%c0_188, %c0_189, %c0_190] : memref<2x32x64xf32, #tpu.memory_space<vmem>>, vector<1x32x64xf32>
    %265 = vector.shape_cast %264 : vector<1x32x64xf32> to vector<32x64xf32>
    %cst_191 = arith.constant dense<0.000000e+00> : vector<18x64xf32>
    %266 = tpu.matmul %263, %265, %cst_191 {dimension_numbers = #tpu.dot_dimension_numbers<[1], [0], [0], [1], [0, 0, 1, 1], [], []>} : vector<18x32xf32>, vector<32x64xf32>, vector<18x64xf32> -> vector<18x64xf32>
    %c0_192 = arith.constant 0 : index
    %c0_193 = arith.constant 0 : index
    %c0_194 = arith.constant 0 : index
    %267 = vector.load %arg21[%c0_192, %c0_193, %c0_194] : memref<2x1x64xf32, #tpu.memory_space<vmem>>, vector<1x1x64xf32>
    %268 = vector.shape_cast %267 : vector<1x1x64xf32> to vector<1x64xf32>
    %269 = vector.broadcast %268 : vector<1x64xf32> to vector<18x64xf32>
    %270 = arith.addf %266, %269 : vector<18x64xf32>
    %cst_195 = arith.constant 0.000000e+00 : f32
    %271 = vector.broadcast %cst_195 : f32 to vector<18x64xf32>
    %272 = arith.maximumf %270, %271 : vector<18x64xf32>
    %c0_196 = arith.constant 0 : index
    %c0_197 = arith.constant 0 : index
    %c0_198 = arith.constant 0 : index
    %273 = vector.load %arg22[%c0_196, %c0_197, %c0_198] : memref<2x64x32xf32, #tpu.memory_space<vmem>>, vector<1x64x32xf32>
    %274 = vector.shape_cast %273 : vector<1x64x32xf32> to vector<64x32xf32>
    %cst_199 = arith.constant dense<0.000000e+00> : vector<18x32xf32>
    %275 = tpu.matmul %272, %274, %cst_199 {dimension_numbers = #tpu.dot_dimension_numbers<[1], [0], [0], [1], [0, 0, 1, 1], [], []>} : vector<18x64xf32>, vector<64x32xf32>, vector<18x32xf32> -> vector<18x32xf32>
    %c0_200 = arith.constant 0 : index
    %c0_201 = arith.constant 0 : index
    %c0_202 = arith.constant 0 : index
    %276 = vector.load %arg23[%c0_200, %c0_201, %c0_202] : memref<2x1x32xf32, #tpu.memory_space<vmem>>, vector<1x1x32xf32>
    %277 = vector.shape_cast %276 : vector<1x1x32xf32> to vector<1x32xf32>
    %278 = vector.broadcast %277 : vector<1x32xf32> to vector<18x32xf32>
    %279 = arith.addf %275, %278 : vector<18x32xf32>
    %280 = arith.addf %263, %279 : vector<18x32xf32>
    %c0_203 = arith.constant 0 : index
    %c0_204 = arith.constant 0 : index
    %c0_205 = arith.constant 0 : index
    %281 = vector.load %arg18[%c0_203, %c0_204, %c0_205] : memref<2x1x32xf32, #tpu.memory_space<vmem>>, vector<1x1x32xf32>
    %282 = vector.shape_cast %281 : vector<1x1x32xf32> to vector<1x32xf32>
    %c0_206 = arith.constant 0 : index
    %c0_207 = arith.constant 0 : index
    %c0_208 = arith.constant 0 : index
    %283 = vector.load %arg19[%c0_206, %c0_207, %c0_208] : memref<2x1x32xf32, #tpu.memory_space<vmem>>, vector<1x1x32xf32>
    %284 = vector.shape_cast %283 : vector<1x1x32xf32> to vector<1x32xf32>
    %cst_209 = arith.constant dense<0.000000e+00> : vector<18xf32>
    %285 = vector.multi_reduction <add>, %280, %cst_209 [1] : vector<18x32xf32> to vector<18xf32>
    %286 = vector.shape_cast %285 : vector<18xf32> to vector<18x1xf32>
    %cst_210 = arith.constant 3.200000e+01 : f32
    %287 = vector.broadcast %cst_210 : f32 to vector<18x1xf32>
    %288 = arith.divf %286, %287 : vector<18x1xf32>
    %289 = vector.broadcast %288 : vector<18x1xf32> to vector<18x32xf32>
    %290 = arith.subf %280, %289 : vector<18x32xf32>
    %291 = arith.mulf %290, %290 : vector<18x32xf32>
    %cst_211 = arith.constant dense<0.000000e+00> : vector<18xf32>
    %292 = vector.multi_reduction <add>, %291, %cst_211 [1] : vector<18x32xf32> to vector<18xf32>
    %293 = vector.shape_cast %292 : vector<18xf32> to vector<18x1xf32>
    %cst_212 = arith.constant 3.200000e+01 : f32
    %294 = vector.broadcast %cst_212 : f32 to vector<18x1xf32>
    %295 = arith.divf %293, %294 : vector<18x1xf32>
    %296 = vector.broadcast %288 : vector<18x1xf32> to vector<18x32xf32>
    %297 = arith.subf %280, %296 : vector<18x32xf32>
    %cst_213 = arith.constant 9.99999974E-6 : f32
    %298 = vector.broadcast %cst_213 : f32 to vector<18x1xf32>
    %299 = arith.addf %295, %298 : vector<18x1xf32>
    %300 = math.rsqrt %299 : vector<18x1xf32>
    %301 = vector.broadcast %300 : vector<18x1xf32> to vector<18x32xf32>
    %302 = arith.mulf %297, %301 : vector<18x32xf32>
    %303 = vector.broadcast %282 : vector<1x32xf32> to vector<18x32xf32>
    %304 = arith.mulf %302, %303 : vector<18x32xf32>
    %305 = vector.broadcast %284 : vector<1x32xf32> to vector<18x32xf32>
    %306 = arith.addf %304, %305 : vector<18x32xf32>
    %cst_214 = arith.constant 0.000000e+00 : f32
    %307 = vector.broadcast %cst_214 : f32 to vector<18x32xf32>
    %c1_215 = arith.constant 1 : index
    %c0_216 = arith.constant 0 : index
    %c0_217 = arith.constant 0 : index
    %c0_218 = arith.constant 0 : index
    %308 = vector.load %arg8[%c1_215, %c0_216, %c0_217, %c0_218] : memref<2x4x32x8xf32, #tpu.memory_space<vmem>>, vector<1x1x32x8xf32>
    %309 = vector.shape_cast %308 : vector<1x1x32x8xf32> to vector<32x8xf32>
    %cst_219 = arith.constant dense<0.000000e+00> : vector<18x8xf32>
    %310 = tpu.matmul %306, %309, %cst_219 {dimension_numbers = #tpu.dot_dimension_numbers<[1], [0], [0], [1], [0, 0, 1, 1], [], []>} : vector<18x32xf32>, vector<32x8xf32>, vector<18x8xf32> -> vector<18x8xf32>
    %c1_220 = arith.constant 1 : index
    %c0_221 = arith.constant 0 : index
    %c0_222 = arith.constant 0 : index
    %c0_223 = arith.constant 0 : index
    %311 = vector.load %arg11[%c1_220, %c0_221, %c0_222, %c0_223] : memref<2x4x1x8xf32, #tpu.memory_space<vmem>>, vector<1x1x1x8xf32>
    %312 = vector.shape_cast %311 : vector<1x1x1x8xf32> to vector<1x8xf32>
    %313 = vector.broadcast %312 : vector<1x8xf32> to vector<18x8xf32>
    %314 = arith.addf %310, %313 : vector<18x8xf32>
    %c1_224 = arith.constant 1 : index
    %c0_225 = arith.constant 0 : index
    %c0_226 = arith.constant 0 : index
    %c0_227 = arith.constant 0 : index
    %315 = vector.load %arg9[%c1_224, %c0_225, %c0_226, %c0_227] : memref<2x4x32x8xf32, #tpu.memory_space<vmem>>, vector<1x1x32x8xf32>
    %316 = vector.shape_cast %315 : vector<1x1x32x8xf32> to vector<32x8xf32>
    %cst_228 = arith.constant dense<0.000000e+00> : vector<18x8xf32>
    %317 = tpu.matmul %306, %316, %cst_228 {dimension_numbers = #tpu.dot_dimension_numbers<[1], [0], [0], [1], [0, 0, 1, 1], [], []>} : vector<18x32xf32>, vector<32x8xf32>, vector<18x8xf32> -> vector<18x8xf32>
    %c1_229 = arith.constant 1 : index
    %c0_230 = arith.constant 0 : index
    %c0_231 = arith.constant 0 : index
    %c0_232 = arith.constant 0 : index
    %318 = vector.load %arg12[%c1_229, %c0_230, %c0_231, %c0_232] : memref<2x4x1x8xf32, #tpu.memory_space<vmem>>, vector<1x1x1x8xf32>
    %319 = vector.shape_cast %318 : vector<1x1x1x8xf32> to vector<1x8xf32>
    %320 = vector.broadcast %319 : vector<1x8xf32> to vector<18x8xf32>
    %321 = arith.addf %317, %320 : vector<18x8xf32>
    %c1_233 = arith.constant 1 : index
    %c0_234 = arith.constant 0 : index
    %c0_235 = arith.constant 0 : index
    %c0_236 = arith.constant 0 : index
    %322 = vector.load %arg10[%c1_233, %c0_234, %c0_235, %c0_236] : memref<2x4x32x8xf32, #tpu.memory_space<vmem>>, vector<1x1x32x8xf32>
    %323 = vector.shape_cast %322 : vector<1x1x32x8xf32> to vector<32x8xf32>
    %cst_237 = arith.constant dense<0.000000e+00> : vector<18x8xf32>
    %324 = tpu.matmul %306, %323, %cst_237 {dimension_numbers = #tpu.dot_dimension_numbers<[1], [0], [0], [1], [0, 0, 1, 1], [], []>} : vector<18x32xf32>, vector<32x8xf32>, vector<18x8xf32> -> vector<18x8xf32>
    %c1_238 = arith.constant 1 : index
    %c0_239 = arith.constant 0 : index
    %c0_240 = arith.constant 0 : index
    %c0_241 = arith.constant 0 : index
    %325 = vector.load %arg13[%c1_238, %c0_239, %c0_240, %c0_241] : memref<2x4x1x8xf32, #tpu.memory_space<vmem>>, vector<1x1x1x8xf32>
    %326 = vector.shape_cast %325 : vector<1x1x1x8xf32> to vector<1x8xf32>
    %327 = vector.broadcast %326 : vector<1x8xf32> to vector<18x8xf32>
    %328 = arith.addf %324, %327 : vector<18x8xf32>
    %cst_242 = arith.constant dense<0.000000e+00> : vector<18x18xf32>
    %329 = tpu.matmul %314, %321, %cst_242 {dimension_numbers = #tpu.dot_dimension_numbers<[1], [1], [0], [0], [0, 0, 1, 0], [], []>} : vector<18x8xf32>, vector<18x8xf32>, vector<18x18xf32> -> vector<18x18xf32>
    %330 = arith.addf %329, %79 : vector<18x18xf32>
    %cst_243 = arith.constant dense<0xFF800000> : vector<18xf32>
    %331 = vector.multi_reduction <maximumf>, %330, %cst_243 [1] : vector<18x18xf32> to vector<18xf32>
    %332 = vector.shape_cast %331 : vector<18xf32> to vector<18x1xf32>
    %333 = vector.broadcast %332 : vector<18x1xf32> to vector<18x18xf32>
    %334 = arith.subf %330, %333 : vector<18x18xf32>
    %335 = math.exp %334 : vector<18x18xf32>
    %cst_244 = arith.constant dense<0.000000e+00> : vector<18xf32>
    %336 = vector.multi_reduction <add>, %335, %cst_244 [1] : vector<18x18xf32> to vector<18xf32>
    %337 = vector.shape_cast %336 : vector<18xf32> to vector<18x1xf32>
    %338 = tpu.reciprocal %337 {approx = true} : vector<18x1xf32> -> vector<18x1xf32>
    %339 = vector.broadcast %338 : vector<18x1xf32> to vector<18x18xf32>
    %340 = arith.mulf %335, %339 : vector<18x18xf32>
    %cst_245 = arith.constant dense<0.000000e+00> : vector<18x8xf32>
    %341 = tpu.matmul %340, %328, %cst_245 {dimension_numbers = #tpu.dot_dimension_numbers<[1], [0], [0], [1], [0, 0, 1, 1], [], []>} : vector<18x18xf32>, vector<18x8xf32>, vector<18x8xf32> -> vector<18x8xf32>
    %c1_246 = arith.constant 1 : index
    %c0_247 = arith.constant 0 : index
    %c0_248 = arith.constant 0 : index
    %c0_249 = arith.constant 0 : index
    %342 = vector.load %arg14[%c1_246, %c0_247, %c0_248, %c0_249] : memref<2x4x8x32xf32, #tpu.memory_space<vmem>>, vector<1x1x8x32xf32>
    %343 = vector.shape_cast %342 : vector<1x1x8x32xf32> to vector<8x32xf32>
    %cst_250 = arith.constant dense<0.000000e+00> : vector<18x32xf32>
    %344 = tpu.matmul %341, %343, %cst_250 {dimension_numbers = #tpu.dot_dimension_numbers<[1], [0], [0], [1], [0, 0, 1, 1], [], []>} : vector<18x8xf32>, vector<8x32xf32>, vector<18x32xf32> -> vector<18x32xf32>
    %345 = arith.addf %307, %344 : vector<18x32xf32>
    %c1_251 = arith.constant 1 : index
    %c1_252 = arith.constant 1 : index
    %c0_253 = arith.constant 0 : index
    %c0_254 = arith.constant 0 : index
    %346 = vector.load %arg8[%c1_251, %c1_252, %c0_253, %c0_254] : memref<2x4x32x8xf32, #tpu.memory_space<vmem>>, vector<1x1x32x8xf32>
    %347 = vector.shape_cast %346 : vector<1x1x32x8xf32> to vector<32x8xf32>
    %cst_255 = arith.constant dense<0.000000e+00> : vector<18x8xf32>
    %348 = tpu.matmul %306, %347, %cst_255 {dimension_numbers = #tpu.dot_dimension_numbers<[1], [0], [0], [1], [0, 0, 1, 1], [], []>} : vector<18x32xf32>, vector<32x8xf32>, vector<18x8xf32> -> vector<18x8xf32>
    %c1_256 = arith.constant 1 : index
    %c1_257 = arith.constant 1 : index
    %c0_258 = arith.constant 0 : index
    %c0_259 = arith.constant 0 : index
    %349 = vector.load %arg11[%c1_256, %c1_257, %c0_258, %c0_259] : memref<2x4x1x8xf32, #tpu.memory_space<vmem>>, vector<1x1x1x8xf32>
    %350 = vector.shape_cast %349 : vector<1x1x1x8xf32> to vector<1x8xf32>
    %351 = vector.broadcast %350 : vector<1x8xf32> to vector<18x8xf32>
    %352 = arith.addf %348, %351 : vector<18x8xf32>
    %c1_260 = arith.constant 1 : index
    %c1_261 = arith.constant 1 : index
    %c0_262 = arith.constant 0 : index
    %c0_263 = arith.constant 0 : index
    %353 = vector.load %arg9[%c1_260, %c1_261, %c0_262, %c0_263] : memref<2x4x32x8xf32, #tpu.memory_space<vmem>>, vector<1x1x32x8xf32>
    %354 = vector.shape_cast %353 : vector<1x1x32x8xf32> to vector<32x8xf32>
    %cst_264 = arith.constant dense<0.000000e+00> : vector<18x8xf32>
    %355 = tpu.matmul %306, %354, %cst_264 {dimension_numbers = #tpu.dot_dimension_numbers<[1], [0], [0], [1], [0, 0, 1, 1], [], []>} : vector<18x32xf32>, vector<32x8xf32>, vector<18x8xf32> -> vector<18x8xf32>
    %c1_265 = arith.constant 1 : index
    %c1_266 = arith.constant 1 : index
    %c0_267 = arith.constant 0 : index
    %c0_268 = arith.constant 0 : index
    %356 = vector.load %arg12[%c1_265, %c1_266, %c0_267, %c0_268] : memref<2x4x1x8xf32, #tpu.memory_space<vmem>>, vector<1x1x1x8xf32>
    %357 = vector.shape_cast %356 : vector<1x1x1x8xf32> to vector<1x8xf32>
    %358 = vector.broadcast %357 : vector<1x8xf32> to vector<18x8xf32>
    %359 = arith.addf %355, %358 : vector<18x8xf32>
    %c1_269 = arith.constant 1 : index
    %c1_270 = arith.constant 1 : index
    %c0_271 = arith.constant 0 : index
    %c0_272 = arith.constant 0 : index
    %360 = vector.load %arg10[%c1_269, %c1_270, %c0_271, %c0_272] : memref<2x4x32x8xf32, #tpu.memory_space<vmem>>, vector<1x1x32x8xf32>
    %361 = vector.shape_cast %360 : vector<1x1x32x8xf32> to vector<32x8xf32>
    %cst_273 = arith.constant dense<0.000000e+00> : vector<18x8xf32>
    %362 = tpu.matmul %306, %361, %cst_273 {dimension_numbers = #tpu.dot_dimension_numbers<[1], [0], [0], [1], [0, 0, 1, 1], [], []>} : vector<18x32xf32>, vector<32x8xf32>, vector<18x8xf32> -> vector<18x8xf32>
    %c1_274 = arith.constant 1 : index
    %c1_275 = arith.constant 1 : index
    %c0_276 = arith.constant 0 : index
    %c0_277 = arith.constant 0 : index
    %363 = vector.load %arg13[%c1_274, %c1_275, %c0_276, %c0_277] : memref<2x4x1x8xf32, #tpu.memory_space<vmem>>, vector<1x1x1x8xf32>
    %364 = vector.shape_cast %363 : vector<1x1x1x8xf32> to vector<1x8xf32>
    %365 = vector.broadcast %364 : vector<1x8xf32> to vector<18x8xf32>
    %366 = arith.addf %362, %365 : vector<18x8xf32>
    %cst_278 = arith.constant dense<0.000000e+00> : vector<18x18xf32>
    %367 = tpu.matmul %352, %359, %cst_278 {dimension_numbers = #tpu.dot_dimension_numbers<[1], [1], [0], [0], [0, 0, 1, 0], [], []>} : vector<18x8xf32>, vector<18x8xf32>, vector<18x18xf32> -> vector<18x18xf32>
    %368 = arith.addf %367, %79 : vector<18x18xf32>
    %cst_279 = arith.constant dense<0xFF800000> : vector<18xf32>
    %369 = vector.multi_reduction <maximumf>, %368, %cst_279 [1] : vector<18x18xf32> to vector<18xf32>
    %370 = vector.shape_cast %369 : vector<18xf32> to vector<18x1xf32>
    %371 = vector.broadcast %370 : vector<18x1xf32> to vector<18x18xf32>
    %372 = arith.subf %368, %371 : vector<18x18xf32>
    %373 = math.exp %372 : vector<18x18xf32>
    %cst_280 = arith.constant dense<0.000000e+00> : vector<18xf32>
    %374 = vector.multi_reduction <add>, %373, %cst_280 [1] : vector<18x18xf32> to vector<18xf32>
    %375 = vector.shape_cast %374 : vector<18xf32> to vector<18x1xf32>
    %376 = tpu.reciprocal %375 {approx = true} : vector<18x1xf32> -> vector<18x1xf32>
    %377 = vector.broadcast %376 : vector<18x1xf32> to vector<18x18xf32>
    %378 = arith.mulf %373, %377 : vector<18x18xf32>
    %cst_281 = arith.constant dense<0.000000e+00> : vector<18x8xf32>
    %379 = tpu.matmul %378, %366, %cst_281 {dimension_numbers = #tpu.dot_dimension_numbers<[1], [0], [0], [1], [0, 0, 1, 1], [], []>} : vector<18x18xf32>, vector<18x8xf32>, vector<18x8xf32> -> vector<18x8xf32>
    %c1_282 = arith.constant 1 : index
    %c1_283 = arith.constant 1 : index
    %c0_284 = arith.constant 0 : index
    %c0_285 = arith.constant 0 : index
    %380 = vector.load %arg14[%c1_282, %c1_283, %c0_284, %c0_285] : memref<2x4x8x32xf32, #tpu.memory_space<vmem>>, vector<1x1x8x32xf32>
    %381 = vector.shape_cast %380 : vector<1x1x8x32xf32> to vector<8x32xf32>
    %cst_286 = arith.constant dense<0.000000e+00> : vector<18x32xf32>
    %382 = tpu.matmul %379, %381, %cst_286 {dimension_numbers = #tpu.dot_dimension_numbers<[1], [0], [0], [1], [0, 0, 1, 1], [], []>} : vector<18x8xf32>, vector<8x32xf32>, vector<18x32xf32> -> vector<18x32xf32>
    %383 = arith.addf %345, %382 : vector<18x32xf32>
    %c1_287 = arith.constant 1 : index
    %c2_288 = arith.constant 2 : index
    %c0_289 = arith.constant 0 : index
    %c0_290 = arith.constant 0 : index
    %384 = vector.load %arg8[%c1_287, %c2_288, %c0_289, %c0_290] : memref<2x4x32x8xf32, #tpu.memory_space<vmem>>, vector<1x1x32x8xf32>
    %385 = vector.shape_cast %384 : vector<1x1x32x8xf32> to vector<32x8xf32>
    %cst_291 = arith.constant dense<0.000000e+00> : vector<18x8xf32>
    %386 = tpu.matmul %306, %385, %cst_291 {dimension_numbers = #tpu.dot_dimension_numbers<[1], [0], [0], [1], [0, 0, 1, 1], [], []>} : vector<18x32xf32>, vector<32x8xf32>, vector<18x8xf32> -> vector<18x8xf32>
    %c1_292 = arith.constant 1 : index
    %c2_293 = arith.constant 2 : index
    %c0_294 = arith.constant 0 : index
    %c0_295 = arith.constant 0 : index
    %387 = vector.load %arg11[%c1_292, %c2_293, %c0_294, %c0_295] : memref<2x4x1x8xf32, #tpu.memory_space<vmem>>, vector<1x1x1x8xf32>
    %388 = vector.shape_cast %387 : vector<1x1x1x8xf32> to vector<1x8xf32>
    %389 = vector.broadcast %388 : vector<1x8xf32> to vector<18x8xf32>
    %390 = arith.addf %386, %389 : vector<18x8xf32>
    %c1_296 = arith.constant 1 : index
    %c2_297 = arith.constant 2 : index
    %c0_298 = arith.constant 0 : index
    %c0_299 = arith.constant 0 : index
    %391 = vector.load %arg9[%c1_296, %c2_297, %c0_298, %c0_299] : memref<2x4x32x8xf32, #tpu.memory_space<vmem>>, vector<1x1x32x8xf32>
    %392 = vector.shape_cast %391 : vector<1x1x32x8xf32> to vector<32x8xf32>
    %cst_300 = arith.constant dense<0.000000e+00> : vector<18x8xf32>
    %393 = tpu.matmul %306, %392, %cst_300 {dimension_numbers = #tpu.dot_dimension_numbers<[1], [0], [0], [1], [0, 0, 1, 1], [], []>} : vector<18x32xf32>, vector<32x8xf32>, vector<18x8xf32> -> vector<18x8xf32>
    %c1_301 = arith.constant 1 : index
    %c2_302 = arith.constant 2 : index
    %c0_303 = arith.constant 0 : index
    %c0_304 = arith.constant 0 : index
    %394 = vector.load %arg12[%c1_301, %c2_302, %c0_303, %c0_304] : memref<2x4x1x8xf32, #tpu.memory_space<vmem>>, vector<1x1x1x8xf32>
    %395 = vector.shape_cast %394 : vector<1x1x1x8xf32> to vector<1x8xf32>
    %396 = vector.broadcast %395 : vector<1x8xf32> to vector<18x8xf32>
    %397 = arith.addf %393, %396 : vector<18x8xf32>
    %c1_305 = arith.constant 1 : index
    %c2_306 = arith.constant 2 : index
    %c0_307 = arith.constant 0 : index
    %c0_308 = arith.constant 0 : index
    %398 = vector.load %arg10[%c1_305, %c2_306, %c0_307, %c0_308] : memref<2x4x32x8xf32, #tpu.memory_space<vmem>>, vector<1x1x32x8xf32>
    %399 = vector.shape_cast %398 : vector<1x1x32x8xf32> to vector<32x8xf32>
    %cst_309 = arith.constant dense<0.000000e+00> : vector<18x8xf32>
    %400 = tpu.matmul %306, %399, %cst_309 {dimension_numbers = #tpu.dot_dimension_numbers<[1], [0], [0], [1], [0, 0, 1, 1], [], []>} : vector<18x32xf32>, vector<32x8xf32>, vector<18x8xf32> -> vector<18x8xf32>
    %c1_310 = arith.constant 1 : index
    %c2_311 = arith.constant 2 : index
    %c0_312 = arith.constant 0 : index
    %c0_313 = arith.constant 0 : index
    %401 = vector.load %arg13[%c1_310, %c2_311, %c0_312, %c0_313] : memref<2x4x1x8xf32, #tpu.memory_space<vmem>>, vector<1x1x1x8xf32>
    %402 = vector.shape_cast %401 : vector<1x1x1x8xf32> to vector<1x8xf32>
    %403 = vector.broadcast %402 : vector<1x8xf32> to vector<18x8xf32>
    %404 = arith.addf %400, %403 : vector<18x8xf32>
    %cst_314 = arith.constant dense<0.000000e+00> : vector<18x18xf32>
    %405 = tpu.matmul %390, %397, %cst_314 {dimension_numbers = #tpu.dot_dimension_numbers<[1], [1], [0], [0], [0, 0, 1, 0], [], []>} : vector<18x8xf32>, vector<18x8xf32>, vector<18x18xf32> -> vector<18x18xf32>
    %406 = arith.addf %405, %79 : vector<18x18xf32>
    %cst_315 = arith.constant dense<0xFF800000> : vector<18xf32>
    %407 = vector.multi_reduction <maximumf>, %406, %cst_315 [1] : vector<18x18xf32> to vector<18xf32>
    %408 = vector.shape_cast %407 : vector<18xf32> to vector<18x1xf32>
    %409 = vector.broadcast %408 : vector<18x1xf32> to vector<18x18xf32>
    %410 = arith.subf %406, %409 : vector<18x18xf32>
    %411 = math.exp %410 : vector<18x18xf32>
    %cst_316 = arith.constant dense<0.000000e+00> : vector<18xf32>
    %412 = vector.multi_reduction <add>, %411, %cst_316 [1] : vector<18x18xf32> to vector<18xf32>
    %413 = vector.shape_cast %412 : vector<18xf32> to vector<18x1xf32>
    %414 = tpu.reciprocal %413 {approx = true} : vector<18x1xf32> -> vector<18x1xf32>
    %415 = vector.broadcast %414 : vector<18x1xf32> to vector<18x18xf32>
    %416 = arith.mulf %411, %415 : vector<18x18xf32>
    %cst_317 = arith.constant dense<0.000000e+00> : vector<18x8xf32>
    %417 = tpu.matmul %416, %404, %cst_317 {dimension_numbers = #tpu.dot_dimension_numbers<[1], [0], [0], [1], [0, 0, 1, 1], [], []>} : vector<18x18xf32>, vector<18x8xf32>, vector<18x8xf32> -> vector<18x8xf32>
    %c1_318 = arith.constant 1 : index
    %c2_319 = arith.constant 2 : index
    %c0_320 = arith.constant 0 : index
    %c0_321 = arith.constant 0 : index
    %418 = vector.load %arg14[%c1_318, %c2_319, %c0_320, %c0_321] : memref<2x4x8x32xf32, #tpu.memory_space<vmem>>, vector<1x1x8x32xf32>
    %419 = vector.shape_cast %418 : vector<1x1x8x32xf32> to vector<8x32xf32>
    %cst_322 = arith.constant dense<0.000000e+00> : vector<18x32xf32>
    %420 = tpu.matmul %417, %419, %cst_322 {dimension_numbers = #tpu.dot_dimension_numbers<[1], [0], [0], [1], [0, 0, 1, 1], [], []>} : vector<18x8xf32>, vector<8x32xf32>, vector<18x32xf32> -> vector<18x32xf32>
    %421 = arith.addf %383, %420 : vector<18x32xf32>
    %c1_323 = arith.constant 1 : index
    %c3_324 = arith.constant 3 : index
    %c0_325 = arith.constant 0 : index
    %c0_326 = arith.constant 0 : index
    %422 = vector.load %arg8[%c1_323, %c3_324, %c0_325, %c0_326] : memref<2x4x32x8xf32, #tpu.memory_space<vmem>>, vector<1x1x32x8xf32>
    %423 = vector.shape_cast %422 : vector<1x1x32x8xf32> to vector<32x8xf32>
    %cst_327 = arith.constant dense<0.000000e+00> : vector<18x8xf32>
    %424 = tpu.matmul %306, %423, %cst_327 {dimension_numbers = #tpu.dot_dimension_numbers<[1], [0], [0], [1], [0, 0, 1, 1], [], []>} : vector<18x32xf32>, vector<32x8xf32>, vector<18x8xf32> -> vector<18x8xf32>
    %c1_328 = arith.constant 1 : index
    %c3_329 = arith.constant 3 : index
    %c0_330 = arith.constant 0 : index
    %c0_331 = arith.constant 0 : index
    %425 = vector.load %arg11[%c1_328, %c3_329, %c0_330, %c0_331] : memref<2x4x1x8xf32, #tpu.memory_space<vmem>>, vector<1x1x1x8xf32>
    %426 = vector.shape_cast %425 : vector<1x1x1x8xf32> to vector<1x8xf32>
    %427 = vector.broadcast %426 : vector<1x8xf32> to vector<18x8xf32>
    %428 = arith.addf %424, %427 : vector<18x8xf32>
    %c1_332 = arith.constant 1 : index
    %c3_333 = arith.constant 3 : index
    %c0_334 = arith.constant 0 : index
    %c0_335 = arith.constant 0 : index
    %429 = vector.load %arg9[%c1_332, %c3_333, %c0_334, %c0_335] : memref<2x4x32x8xf32, #tpu.memory_space<vmem>>, vector<1x1x32x8xf32>
    %430 = vector.shape_cast %429 : vector<1x1x32x8xf32> to vector<32x8xf32>
    %cst_336 = arith.constant dense<0.000000e+00> : vector<18x8xf32>
    %431 = tpu.matmul %306, %430, %cst_336 {dimension_numbers = #tpu.dot_dimension_numbers<[1], [0], [0], [1], [0, 0, 1, 1], [], []>} : vector<18x32xf32>, vector<32x8xf32>, vector<18x8xf32> -> vector<18x8xf32>
    %c1_337 = arith.constant 1 : index
    %c3_338 = arith.constant 3 : index
    %c0_339 = arith.constant 0 : index
    %c0_340 = arith.constant 0 : index
    %432 = vector.load %arg12[%c1_337, %c3_338, %c0_339, %c0_340] : memref<2x4x1x8xf32, #tpu.memory_space<vmem>>, vector<1x1x1x8xf32>
    %433 = vector.shape_cast %432 : vector<1x1x1x8xf32> to vector<1x8xf32>
    %434 = vector.broadcast %433 : vector<1x8xf32> to vector<18x8xf32>
    %435 = arith.addf %431, %434 : vector<18x8xf32>
    %c1_341 = arith.constant 1 : index
    %c3_342 = arith.constant 3 : index
    %c0_343 = arith.constant 0 : index
    %c0_344 = arith.constant 0 : index
    %436 = vector.load %arg10[%c1_341, %c3_342, %c0_343, %c0_344] : memref<2x4x32x8xf32, #tpu.memory_space<vmem>>, vector<1x1x32x8xf32>
    %437 = vector.shape_cast %436 : vector<1x1x32x8xf32> to vector<32x8xf32>
    %cst_345 = arith.constant dense<0.000000e+00> : vector<18x8xf32>
    %438 = tpu.matmul %306, %437, %cst_345 {dimension_numbers = #tpu.dot_dimension_numbers<[1], [0], [0], [1], [0, 0, 1, 1], [], []>} : vector<18x32xf32>, vector<32x8xf32>, vector<18x8xf32> -> vector<18x8xf32>
    %c1_346 = arith.constant 1 : index
    %c3_347 = arith.constant 3 : index
    %c0_348 = arith.constant 0 : index
    %c0_349 = arith.constant 0 : index
    %439 = vector.load %arg13[%c1_346, %c3_347, %c0_348, %c0_349] : memref<2x4x1x8xf32, #tpu.memory_space<vmem>>, vector<1x1x1x8xf32>
    %440 = vector.shape_cast %439 : vector<1x1x1x8xf32> to vector<1x8xf32>
    %441 = vector.broadcast %440 : vector<1x8xf32> to vector<18x8xf32>
    %442 = arith.addf %438, %441 : vector<18x8xf32>
    %cst_350 = arith.constant dense<0.000000e+00> : vector<18x18xf32>
    %443 = tpu.matmul %428, %435, %cst_350 {dimension_numbers = #tpu.dot_dimension_numbers<[1], [1], [0], [0], [0, 0, 1, 0], [], []>} : vector<18x8xf32>, vector<18x8xf32>, vector<18x18xf32> -> vector<18x18xf32>
    %444 = arith.addf %443, %79 : vector<18x18xf32>
    %cst_351 = arith.constant dense<0xFF800000> : vector<18xf32>
    %445 = vector.multi_reduction <maximumf>, %444, %cst_351 [1] : vector<18x18xf32> to vector<18xf32>
    %446 = vector.shape_cast %445 : vector<18xf32> to vector<18x1xf32>
    %447 = vector.broadcast %446 : vector<18x1xf32> to vector<18x18xf32>
    %448 = arith.subf %444, %447 : vector<18x18xf32>
    %449 = math.exp %448 : vector<18x18xf32>
    %cst_352 = arith.constant dense<0.000000e+00> : vector<18xf32>
    %450 = vector.multi_reduction <add>, %449, %cst_352 [1] : vector<18x18xf32> to vector<18xf32>
    %451 = vector.shape_cast %450 : vector<18xf32> to vector<18x1xf32>
    %452 = tpu.reciprocal %451 {approx = true} : vector<18x1xf32> -> vector<18x1xf32>
    %453 = vector.broadcast %452 : vector<18x1xf32> to vector<18x18xf32>
    %454 = arith.mulf %449, %453 : vector<18x18xf32>
    %cst_353 = arith.constant dense<0.000000e+00> : vector<18x8xf32>
    %455 = tpu.matmul %454, %442, %cst_353 {dimension_numbers = #tpu.dot_dimension_numbers<[1], [0], [0], [1], [0, 0, 1, 1], [], []>} : vector<18x18xf32>, vector<18x8xf32>, vector<18x8xf32> -> vector<18x8xf32>
    %c1_354 = arith.constant 1 : index
    %c3_355 = arith.constant 3 : index
    %c0_356 = arith.constant 0 : index
    %c0_357 = arith.constant 0 : index
    %456 = vector.load %arg14[%c1_354, %c3_355, %c0_356, %c0_357] : memref<2x4x8x32xf32, #tpu.memory_space<vmem>>, vector<1x1x8x32xf32>
    %457 = vector.shape_cast %456 : vector<1x1x8x32xf32> to vector<8x32xf32>
    %cst_358 = arith.constant dense<0.000000e+00> : vector<18x32xf32>
    %458 = tpu.matmul %455, %457, %cst_358 {dimension_numbers = #tpu.dot_dimension_numbers<[1], [0], [0], [1], [0, 0, 1, 1], [], []>} : vector<18x8xf32>, vector<8x32xf32>, vector<18x32xf32> -> vector<18x32xf32>
    %459 = arith.addf %421, %458 : vector<18x32xf32>
    %c1_359 = arith.constant 1 : index
    %c0_360 = arith.constant 0 : index
    %c0_361 = arith.constant 0 : index
    %460 = vector.load %arg15[%c1_359, %c0_360, %c0_361] : memref<2x1x32xf32, #tpu.memory_space<vmem>>, vector<1x1x32xf32>
    %461 = vector.shape_cast %460 : vector<1x1x32xf32> to vector<1x32xf32>
    %462 = vector.broadcast %461 : vector<1x32xf32> to vector<18x32xf32>
    %463 = arith.addf %459, %462 : vector<18x32xf32>
    %464 = arith.addf %306, %463 : vector<18x32xf32>
    %c1_362 = arith.constant 1 : index
    %c0_363 = arith.constant 0 : index
    %c0_364 = arith.constant 0 : index
    %465 = vector.load %arg16[%c1_362, %c0_363, %c0_364] : memref<2x1x32xf32, #tpu.memory_space<vmem>>, vector<1x1x32xf32>
    %466 = vector.shape_cast %465 : vector<1x1x32xf32> to vector<1x32xf32>
    %c1_365 = arith.constant 1 : index
    %c0_366 = arith.constant 0 : index
    %c0_367 = arith.constant 0 : index
    %467 = vector.load %arg17[%c1_365, %c0_366, %c0_367] : memref<2x1x32xf32, #tpu.memory_space<vmem>>, vector<1x1x32xf32>
    %468 = vector.shape_cast %467 : vector<1x1x32xf32> to vector<1x32xf32>
    %cst_368 = arith.constant dense<0.000000e+00> : vector<18xf32>
    %469 = vector.multi_reduction <add>, %464, %cst_368 [1] : vector<18x32xf32> to vector<18xf32>
    %470 = vector.shape_cast %469 : vector<18xf32> to vector<18x1xf32>
    %cst_369 = arith.constant 3.200000e+01 : f32
    %471 = vector.broadcast %cst_369 : f32 to vector<18x1xf32>
    %472 = arith.divf %470, %471 : vector<18x1xf32>
    %473 = vector.broadcast %472 : vector<18x1xf32> to vector<18x32xf32>
    %474 = arith.subf %464, %473 : vector<18x32xf32>
    %475 = arith.mulf %474, %474 : vector<18x32xf32>
    %cst_370 = arith.constant dense<0.000000e+00> : vector<18xf32>
    %476 = vector.multi_reduction <add>, %475, %cst_370 [1] : vector<18x32xf32> to vector<18xf32>
    %477 = vector.shape_cast %476 : vector<18xf32> to vector<18x1xf32>
    %cst_371 = arith.constant 3.200000e+01 : f32
    %478 = vector.broadcast %cst_371 : f32 to vector<18x1xf32>
    %479 = arith.divf %477, %478 : vector<18x1xf32>
    %480 = vector.broadcast %472 : vector<18x1xf32> to vector<18x32xf32>
    %481 = arith.subf %464, %480 : vector<18x32xf32>
    %cst_372 = arith.constant 9.99999974E-6 : f32
    %482 = vector.broadcast %cst_372 : f32 to vector<18x1xf32>
    %483 = arith.addf %479, %482 : vector<18x1xf32>
    %484 = math.rsqrt %483 : vector<18x1xf32>
    %485 = vector.broadcast %484 : vector<18x1xf32> to vector<18x32xf32>
    %486 = arith.mulf %481, %485 : vector<18x32xf32>
    %487 = vector.broadcast %466 : vector<1x32xf32> to vector<18x32xf32>
    %488 = arith.mulf %486, %487 : vector<18x32xf32>
    %489 = vector.broadcast %468 : vector<1x32xf32> to vector<18x32xf32>
    %490 = arith.addf %488, %489 : vector<18x32xf32>
    %c1_373 = arith.constant 1 : index
    %c0_374 = arith.constant 0 : index
    %c0_375 = arith.constant 0 : index
    %491 = vector.load %arg20[%c1_373, %c0_374, %c0_375] : memref<2x32x64xf32, #tpu.memory_space<vmem>>, vector<1x32x64xf32>
    %492 = vector.shape_cast %491 : vector<1x32x64xf32> to vector<32x64xf32>
    %cst_376 = arith.constant dense<0.000000e+00> : vector<18x64xf32>
    %493 = tpu.matmul %490, %492, %cst_376 {dimension_numbers = #tpu.dot_dimension_numbers<[1], [0], [0], [1], [0, 0, 1, 1], [], []>} : vector<18x32xf32>, vector<32x64xf32>, vector<18x64xf32> -> vector<18x64xf32>
    %c1_377 = arith.constant 1 : index
    %c0_378 = arith.constant 0 : index
    %c0_379 = arith.constant 0 : index
    %494 = vector.load %arg21[%c1_377, %c0_378, %c0_379] : memref<2x1x64xf32, #tpu.memory_space<vmem>>, vector<1x1x64xf32>
    %495 = vector.shape_cast %494 : vector<1x1x64xf32> to vector<1x64xf32>
    %496 = vector.broadcast %495 : vector<1x64xf32> to vector<18x64xf32>
    %497 = arith.addf %493, %496 : vector<18x64xf32>
    %cst_380 = arith.constant 0.000000e+00 : f32
    %498 = vector.broadcast %cst_380 : f32 to vector<18x64xf32>
    %499 = arith.maximumf %497, %498 : vector<18x64xf32>
    %c1_381 = arith.constant 1 : index
    %c0_382 = arith.constant 0 : index
    %c0_383 = arith.constant 0 : index
    %500 = vector.load %arg22[%c1_381, %c0_382, %c0_383] : memref<2x64x32xf32, #tpu.memory_space<vmem>>, vector<1x64x32xf32>
    %501 = vector.shape_cast %500 : vector<1x64x32xf32> to vector<64x32xf32>
    %cst_384 = arith.constant dense<0.000000e+00> : vector<18x32xf32>
    %502 = tpu.matmul %499, %501, %cst_384 {dimension_numbers = #tpu.dot_dimension_numbers<[1], [0], [0], [1], [0, 0, 1, 1], [], []>} : vector<18x64xf32>, vector<64x32xf32>, vector<18x32xf32> -> vector<18x32xf32>
    %c1_385 = arith.constant 1 : index
    %c0_386 = arith.constant 0 : index
    %c0_387 = arith.constant 0 : index
    %503 = vector.load %arg23[%c1_385, %c0_386, %c0_387] : memref<2x1x32xf32, #tpu.memory_space<vmem>>, vector<1x1x32xf32>
    %504 = vector.shape_cast %503 : vector<1x1x32xf32> to vector<1x32xf32>
    %505 = vector.broadcast %504 : vector<1x32xf32> to vector<18x32xf32>
    %506 = arith.addf %502, %505 : vector<18x32xf32>
    %507 = arith.addf %490, %506 : vector<18x32xf32>
    %c1_388 = arith.constant 1 : index
    %c0_389 = arith.constant 0 : index
    %c0_390 = arith.constant 0 : index
    %508 = vector.load %arg18[%c1_388, %c0_389, %c0_390] : memref<2x1x32xf32, #tpu.memory_space<vmem>>, vector<1x1x32xf32>
    %509 = vector.shape_cast %508 : vector<1x1x32xf32> to vector<1x32xf32>
    %c1_391 = arith.constant 1 : index
    %c0_392 = arith.constant 0 : index
    %c0_393 = arith.constant 0 : index
    %510 = vector.load %arg19[%c1_391, %c0_392, %c0_393] : memref<2x1x32xf32, #tpu.memory_space<vmem>>, vector<1x1x32xf32>
    %511 = vector.shape_cast %510 : vector<1x1x32xf32> to vector<1x32xf32>
    %cst_394 = arith.constant dense<0.000000e+00> : vector<18xf32>
    %512 = vector.multi_reduction <add>, %507, %cst_394 [1] : vector<18x32xf32> to vector<18xf32>
    %513 = vector.shape_cast %512 : vector<18xf32> to vector<18x1xf32>
    %cst_395 = arith.constant 3.200000e+01 : f32
    %514 = vector.broadcast %cst_395 : f32 to vector<18x1xf32>
    %515 = arith.divf %513, %514 : vector<18x1xf32>
    %516 = vector.broadcast %515 : vector<18x1xf32> to vector<18x32xf32>
    %517 = arith.subf %507, %516 : vector<18x32xf32>
    %518 = arith.mulf %517, %517 : vector<18x32xf32>
    %cst_396 = arith.constant dense<0.000000e+00> : vector<18xf32>
    %519 = vector.multi_reduction <add>, %518, %cst_396 [1] : vector<18x32xf32> to vector<18xf32>
    %520 = vector.shape_cast %519 : vector<18xf32> to vector<18x1xf32>
    %cst_397 = arith.constant 3.200000e+01 : f32
    %521 = vector.broadcast %cst_397 : f32 to vector<18x1xf32>
    %522 = arith.divf %520, %521 : vector<18x1xf32>
    %523 = vector.broadcast %515 : vector<18x1xf32> to vector<18x32xf32>
    %524 = arith.subf %507, %523 : vector<18x32xf32>
    %cst_398 = arith.constant 9.99999974E-6 : f32
    %525 = vector.broadcast %cst_398 : f32 to vector<18x1xf32>
    %526 = arith.addf %522, %525 : vector<18x1xf32>
    %527 = math.rsqrt %526 : vector<18x1xf32>
    %528 = vector.broadcast %527 : vector<18x1xf32> to vector<18x32xf32>
    %529 = arith.mulf %524, %528 : vector<18x32xf32>
    %530 = vector.broadcast %509 : vector<1x32xf32> to vector<18x32xf32>
    %531 = arith.mulf %529, %530 : vector<18x32xf32>
    %532 = vector.broadcast %511 : vector<1x32xf32> to vector<18x32xf32>
    %533 = arith.addf %531, %532 : vector<18x32xf32>
    %c0_399 = arith.constant 0 : index
    %c0_400 = arith.constant 0 : index
    %534 = vector.load %arg7[%c0_399, %c0_400] : memref<2x18xf32, #tpu.memory_space<vmem>>, vector<2x18xf32>
    %cst_401 = arith.constant dense<0.000000e+00> : vector<2x32xf32>
    %535 = tpu.matmul %534, %533, %cst_401 {dimension_numbers = #tpu.dot_dimension_numbers<[1], [0], [0], [1], [0, 0, 1, 1], [], []>} : vector<2x18xf32>, vector<18x32xf32>, vector<2x32xf32> -> vector<2x32xf32>
    %c0_402 = arith.constant 0 : index
    %c0_403 = arith.constant 0 : index
    %536 = vector.load %arg24[%c0_402, %c0_403] : memref<32x32xf32, #tpu.memory_space<vmem>>, vector<32x32xf32>
    %cst_404 = arith.constant dense<0.000000e+00> : vector<2x32xf32>
    %537 = tpu.matmul %535, %536, %cst_404 {dimension_numbers = #tpu.dot_dimension_numbers<[1], [0], [0], [1], [0, 0, 1, 1], [], []>} : vector<2x32xf32>, vector<32x32xf32>, vector<2x32xf32> -> vector<2x32xf32>
    %c0_405 = arith.constant 0 : index
    %c0_406 = arith.constant 0 : index
    %538 = vector.load %arg25[%c0_405, %c0_406] : memref<1x32xf32, #tpu.memory_space<vmem>>, vector<1x32xf32>
    %539 = vector.broadcast %538 : vector<1x32xf32> to vector<2x32xf32>
    %540 = arith.addf %537, %539 : vector<2x32xf32>
    %c0_407 = arith.constant 0 : index
    %c0_408 = arith.constant 0 : index
    %c0_409 = arith.constant 0 : index
    %541 = vector.load %arg26[%c0_407, %c0_408, %c0_409] : memref<1x2x32xf32, #tpu.memory_space<vmem>>, vector<1x2x32xf32>
    %542 = vector.shape_cast %541 : vector<1x2x32xf32> to vector<2x32xf32>
    %543 = vector.shape_cast %540 : vector<2x32xf32> to vector<1x2x32xf32>
    tpu.vector_store %arg26[%c0_407, %c0_408, %c0_409], %543 {strides = array<i32>} : memref<1x2x32xf32, #tpu.memory_space<vmem>>, vector<1x2x32xf32>,
    return
  }
  func.func @transform_0(%arg0: i32, %arg1: memref<2xi32, #tpu.memory_space<smem>>) -> (i32, i32, i32) {
    %c0_i32 = arith.constant 0 : i32
    %c0_i32_0 = arith.constant 0 : i32
    %c0_i32_1 = arith.constant 0 : i32
    return %arg0, %c0_i32, %c0_i32_0 : i32, i32, i32
  }
  func.func @transform_1(%arg0: i32, %arg1: memref<2xi32, #tpu.memory_space<smem>>) -> (i32, i32) {
    %c0_i32 = arith.constant 0 : i32
    %c0_i32_0 = arith.constant 0 : i32
    %c0_i32_1 = arith.constant 0 : i32
    return %c0_i32, %c0_i32_0 : i32, i32
  }
  func.func @transform_2(%arg0: i32, %arg1: memref<2xi32, #tpu.memory_space<smem>>) -> (i32, i32) {
    %c0_i32 = arith.constant 0 : i32
    %c0_i32_0 = arith.constant 0 : i32
    %c0_i32_1 = arith.constant 0 : i32
    return %c0_i32, %c0_i32_0 : i32, i32
  }
  func.func @transform_3(%arg0: i32, %arg1: memref<2xi32, #tpu.memory_space<smem>>) -> (i32, i32) {
    %c0_i32 = arith.constant 0 : i32
    %c0_i32_0 = arith.constant 0 : i32
    %c0_i32_1 = arith.constant 0 : i32
    return %c0_i32, %c0_i32_0 : i32, i32
  }
  func.func @transform_4(%arg0: i32, %arg1: memref<2xi32, #tpu.memory_space<smem>>) -> (i32, i32) {
    %c0_i32 = arith.constant 0 : i32
    %c0_i32_0 = arith.constant 0 : i32
    %c0_i32_1 = arith.constant 0 : i32
    return %c0_i32, %c0_i32_0 : i32, i32
  }
  func.func @transform_5(%arg0: i32, %arg1: memref<2xi32, #tpu.memory_space<smem>>) -> (i32, i32) {
    %c0_i32 = arith.constant 0 : i32
    %c0_i32_0 = arith.constant 0 : i32
    %c0_i32_1 = arith.constant 0 : i32
    return %c0_i32, %c0_i32_0 : i32, i32
  }
  func.func @transform_6(%arg0: i32, %arg1: memref<2xi32, #tpu.memory_space<smem>>) -> (i32, i32, i32, i32) {
    %c0_i32 = arith.constant 0 : i32
    %c0_i32_0 = arith.constant 0 : i32
    %c0_i32_1 = arith.constant 0 : i32
    %c0_i32_2 = arith.constant 0 : i32
    %c0_i32_3 = arith.constant 0 : i32
    return %c0_i32, %c0_i32_0, %c0_i32_1, %c0_i32_2 : i32, i32, i32, i32
  }
  func.func @transform_7(%arg0: i32, %arg1: memref<2xi32, #tpu.memory_space<smem>>) -> (i32, i32, i32, i32) {
    %c0_i32 = arith.constant 0 : i32
    %c0_i32_0 = arith.constant 0 : i32
    %c0_i32_1 = arith.constant 0 : i32
    %c0_i32_2 = arith.constant 0 : i32
    %c0_i32_3 = arith.constant 0 : i32
    return %c0_i32, %c0_i32_0, %c0_i32_1, %c0_i32_2 : i32, i32, i32, i32
  }
  func.func @transform_8(%arg0: i32, %arg1: memref<2xi32, #tpu.memory_space<smem>>) -> (i32, i32, i32, i32) {
    %c0_i32 = arith.constant 0 : i32
    %c0_i32_0 = arith.constant 0 : i32
    %c0_i32_1 = arith.constant 0 : i32
    %c0_i32_2 = arith.constant 0 : i32
    %c0_i32_3 = arith.constant 0 : i32
    return %c0_i32, %c0_i32_0, %c0_i32_1, %c0_i32_2 : i32, i32, i32, i32
  }
  func.func @transform_9(%arg0: i32, %arg1: memref<2xi32, #tpu.memory_space<smem>>) -> (i32, i32, i32, i32) {
    %c0_i32 = arith.constant 0 : i32
    %c0_i32_0 = arith.constant 0 : i32
    %c0_i32_1 = arith.constant 0 : i32
    %c0_i32_2 = arith.constant 0 : i32
    %c0_i32_3 = arith.constant 0 : i32
    return %c0_i32, %c0_i32_0, %c0_i32_1, %c0_i32_2 : i32, i32, i32, i32
  }
  func.func @transform_10(%arg0: i32, %arg1: memref<2xi32, #tpu.memory_space<smem>>) -> (i32, i32, i32, i32) {
    %c0_i32 = arith.constant 0 : i32
    %c0_i32_0 = arith.constant 0 : i32
    %c0_i32_1 = arith.constant 0 : i32
    %c0_i32_2 = arith.constant 0 : i32
    %c0_i32_3 = arith.constant 0 : i32
    return %c0_i32, %c0_i32_0, %c0_i32_1, %c0_i32_2 : i32, i32, i32, i32
  }
  func.func @transform_11(%arg0: i32, %arg1: memref<2xi32, #tpu.memory_space<smem>>) -> (i32, i32, i32, i32) {
    %c0_i32 = arith.constant 0 : i32
    %c0_i32_0 = arith.constant 0 : i32
    %c0_i32_1 = arith.constant 0 : i32
    %c0_i32_2 = arith.constant 0 : i32
    %c0_i32_3 = arith.constant 0 : i32
    return %c0_i32, %c0_i32_0, %c0_i32_1, %c0_i32_2 : i32, i32, i32, i32
  }
  func.func @transform_12(%arg0: i32, %arg1: memref<2xi32, #tpu.memory_space<smem>>) -> (i32, i32, i32, i32) {
    %c0_i32 = arith.constant 0 : i32
    %c0_i32_0 = arith.constant 0 : i32
    %c0_i32_1 = arith.constant 0 : i32
    %c0_i32_2 = arith.constant 0 : i32
    %c0_i32_3 = arith.constant 0 : i32
    return %c0_i32, %c0_i32_0, %c0_i32_1, %c0_i32_2 : i32, i32, i32, i32
  }
  func.func @transform_13(%arg0: i32, %arg1: memref<2xi32, #tpu.memory_space<smem>>) -> (i32, i32, i32) {
    %c0_i32 = arith.constant 0 : i32
    %c0_i32_0 = arith.constant 0 : i32
    %c0_i32_1 = arith.constant 0 : i32
    %c0_i32_2 = arith.constant 0 : i32
    return %c0_i32, %c0_i32_0, %c0_i32_1 : i32, i32, i32
  }
  func.func @transform_14(%arg0: i32, %arg1: memref<2xi32, #tpu.memory_space<smem>>) -> (i32, i32, i32) {
    %c0_i32 = arith.constant 0 : i32
    %c0_i32_0 = arith.constant 0 : i32
    %c0_i32_1 = arith.constant 0 : i32
    %c0_i32_2 = arith.constant 0 : i32
    return %c0_i32, %c0_i32_0, %c0_i32_1 : i32, i32, i32
  }
  func.func @transform_15(%arg0: i32, %arg1: memref<2xi32, #tpu.memory_space<smem>>) -> (i32, i32, i32) {
    %c0_i32 = arith.constant 0 : i32
    %c0_i32_0 = arith.constant 0 : i32
    %c0_i32_1 = arith.constant 0 : i32
    %c0_i32_2 = arith.constant 0 : i32
    return %c0_i32, %c0_i32_0, %c0_i32_1 : i32, i32, i32
  }
  func.func @transform_16(%arg0: i32, %arg1: memref<2xi32, #tpu.memory_space<smem>>) -> (i32, i32, i32) {
    %c0_i32 = arith.constant 0 : i32
    %c0_i32_0 = arith.constant 0 : i32
    %c0_i32_1 = arith.constant 0 : i32
    %c0_i32_2 = arith.constant 0 : i32
    return %c0_i32, %c0_i32_0, %c0_i32_1 : i32, i32, i32
  }
  func.func @transform_17(%arg0: i32, %arg1: memref<2xi32, #tpu.memory_space<smem>>) -> (i32, i32, i32) {
    %c0_i32 = arith.constant 0 : i32
    %c0_i32_0 = arith.constant 0 : i32
    %c0_i32_1 = arith.constant 0 : i32
    %c0_i32_2 = arith.constant 0 : i32
    return %c0_i32, %c0_i32_0, %c0_i32_1 : i32, i32, i32
  }
  func.func @transform_18(%arg0: i32, %arg1: memref<2xi32, #tpu.memory_space<smem>>) -> (i32, i32, i32) {
    %c0_i32 = arith.constant 0 : i32
    %c0_i32_0 = arith.constant 0 : i32
    %c0_i32_1 = arith.constant 0 : i32
    %c0_i32_2 = arith.constant 0 : i32
    return %c0_i32, %c0_i32_0, %c0_i32_1 : i32, i32, i32
  }
  func.func @transform_19(%arg0: i32, %arg1: memref<2xi32, #tpu.memory_space<smem>>) -> (i32, i32, i32) {
    %c0_i32 = arith.constant 0 : i32
    %c0_i32_0 = arith.constant 0 : i32
    %c0_i32_1 = arith.constant 0 : i32
    %c0_i32_2 = arith.constant 0 : i32
    return %c0_i32, %c0_i32_0, %c0_i32_1 : i32, i32, i32
  }
  func.func @transform_20(%arg0: i32, %arg1: memref<2xi32, #tpu.memory_space<smem>>) -> (i32, i32, i32) {
    %c0_i32 = arith.constant 0 : i32
    %c0_i32_0 = arith.constant 0 : i32
    %c0_i32_1 = arith.constant 0 : i32
    %c0_i32_2 = arith.constant 0 : i32
    return %c0_i32, %c0_i32_0, %c0_i32_1 : i32, i32, i32
  }
  func.func @transform_21(%arg0: i32, %arg1: memref<2xi32, #tpu.memory_space<smem>>) -> (i32, i32, i32) {
    %c0_i32 = arith.constant 0 : i32
    %c0_i32_0 = arith.constant 0 : i32
    %c0_i32_1 = arith.constant 0 : i32
    %c0_i32_2 = arith.constant 0 : i32
    return %c0_i32, %c0_i32_0, %c0_i32_1 : i32, i32, i32
  }
  func.func @transform_22(%arg0: i32, %arg1: memref<2xi32, #tpu.memory_space<smem>>) -> (i32, i32) {
    %c0_i32 = arith.constant 0 : i32
    %c0_i32_0 = arith.constant 0 : i32
    %c0_i32_1 = arith.constant 0 : i32
    return %c0_i32, %c0_i32_0 : i32, i32
  }
  func.func @transform_23(%arg0: i32, %arg1: memref<2xi32, #tpu.memory_space<smem>>) -> (i32, i32) {
    %c0_i32 = arith.constant 0 : i32
    %c0_i32_0 = arith.constant 0 : i32
    %c0_i32_1 = arith.constant 0 : i32
    return %c0_i32, %c0_i32_0 : i32, i32
  }
  func.func @transform_24(%arg0: i32, %arg1: memref<2xi32, #tpu.memory_space<smem>>) -> (i32, i32, i32) {
    %c0_i32 = arith.constant 0 : i32
    %c0_i32_0 = arith.constant 0 : i32
    %c0_i32_1 = arith.constant 0 : i32
    return %arg0, %c0_i32, %c0_i32_0 : i32, i32, i32
  }
}

</mosaic_0001>

<bundles_post_ra>
// kernel: forward.1
= control target key start
LH: loop header
LB: loop body
LE: loop exit
PB: predicated region body
PF: predicated region fallthrough
CT: control target
= control target key end

     0   :  { %s9223_s0 = inlined_call_operand.vmem [shape: s32[2], index: 0, kind: input, shape index: {}]   ;;  %s9224_s1 = inlined_call_operand.vmem [shape: f32[2,4,1], index: 1, kind: input, shape index: {}]   ;;  %s9225_s2 = inlined_call_operand.vmem [shape: f32[9,32], index: 2, kind: input, shape index: {}]   ;;  %s9226_s3 = inlined_call_operand.vmem [shape: f32[4,32], index: 3, kind: input, shape index: {}]   ;;  %s9227_s4 = inlined_call_operand.vmem [shape: f32[3,32], index: 4, kind: input, shape index: {}]   ;;  %s9228_s5 = inlined_call_operand.vmem [shape: f32[18,18], index: 5, kind: input, shape index: {}]   ;;  %s9229_s6 = inlined_call_operand.vmem [shape: f32[2,18], index: 6, kind: input, shape index: {}]   ;;  %s9230_s7 = inlined_call_operand.vmem [shape: f32[2,4,32,8], index: 7, kind: input, shape index: {}]   ;;  %s9231_s8 = inlined_call_operand.vmem [shape: f32[2,4,32,8], index: 8, kind: input, shape index: {}]   ;;  %s9232_s9 = inlined_call_operand.vmem [shape: f32[2,4,32,8], index: 9, kind: input, shape index: {}]   ;;  %s9233_s10 = inlined_call_operand.vmem [shape: f32[2,4,1,8], index: 10, kind: input, shape index: {}]   ;;  %s9234_s11 = inlined_call_operand.vmem [shape: f32[2,4,1,8], index: 11, kind: input, shape index: {}]   ;;  %s9235_s12 = inlined_call_operand.vmem [shape: f32[2,4,1,8], index: 12, kind: input, shape index: {}]   ;;  %s9236_s13 = inlined_call_operand.vmem [shape: f32[2,4,8,32], index: 13, kind: input, shape index: {}]   ;;  %s9237_s14 = inlined_call_operand.vmem [shape: f32[2,1,32], index: 14, kind: input, shape index: {}]   ;;  %s9238_s15 = inlined_call_operand.vmem [shape: f32[2,1,32], index: 15, kind: input, shape index: {}]   ;;  %s9239_s16 = inlined_call_operand.vmem [shape: f32[2,1,32], index: 16, kind: input, shape index: {}]   ;;  %s9240_s17 = inlined_call_operand.vmem [shape: f32[2,1,32], index: 17, kind: input, shape index: {}]   ;;  %s9241_s18 = inlined_call_operand.vmem [shape: f32[2,1,32], index: 18, kind: input, shape index: {}]   ;;  %s9242_s19 = inlined_call_operand.vmem [shape: f32[2,32,64], index: 19, kind: input, shape index: {}]   ;;  %s9243_s20 = inlined_call_operand.vmem [shape: f32[2,1,64], index: 20, kind: input, shape index: {}]   ;;  %s9244_s21 = inlined_call_operand.vmem [shape: f32[2,64,32], index: 21, kind: input, shape index: {}]   ;;  %s9245_s22 = inlined_call_operand.vmem [shape: f32[2,1,32], index: 22, kind: input, shape index: {}]   ;;  %s9246_s23 = inlined_call_operand.vmem [shape: f32[32,32], index: 23, kind: input, shape index: {}]   ;;  %s9247_s24 = inlined_call_operand.vmem [shape: f32[1,32], index: 24, kind: input, shape index: {}]   ;;  %s9248_s25 = inlined_call_operand.hbm [shape: f32[1,2,32], index: 25, kind: output, shape index: {}]  }
   0x1   :  { %9258 = sst [smem:[#allocation8_spill]] %s9223_s0 }
   0x2   :  { %9259 = sst [smem:[#allocation9_spill]] %s9224_s1 }
   0x3   :  { %9260 = sst [smem:[#allocation10_spill]] %s9225_s2 }
   0x4   :  { %9261 = sst [smem:[#allocation11_spill]] %s9226_s3 }
   0x5   :  { %9262 = sst [smem:[#allocation12_spill]] %s9227_s4 }
   0x6   :  { %9263 = sst [smem:[#allocation13_spill]] %s9228_s5 }
   0x7   :  { %9264 = sst [smem:[#allocation14_spill]] %s9229_s6 }
   0x8   :  { %9265 = sst [smem:[#allocation15_spill]] %s9230_s7 }
   0x9   :  { %9266 = sst [smem:[#allocation16_spill]] %s9231_s8 }
   0xa   :  { %9267 = sst [smem:[#allocation17_spill]] %s9232_s9 }
   0xb   :  { %9268 = sst [smem:[#allocation18_spill]] %s9241_s18 }
   0xc   :  { %9269 = sst [smem:[#allocation19_spill]] %s9246_s23 }
   0xd   :  { %9270 = sst [smem:[#allocation20_spill]] %s9247_s24 }
   0xe   :  { %9271 = sst [smem:[#allocation21_spill]] %s9248_s25 }
   0xf   :  { %s9272_s6 = sld [smem:[#allocation8_spill]] }
  0x15   :  { %s30_s18 = sshll.u32 %s9272_s6, 4  ;;  %s31_s18 = int_to_ptr.vmem [resolvable:$true] %s30_s18 }
  0x16   :  { %s7499_s30 = scalar_lea.vmem %s31_s18, 16  ;;  %p7504_p1 = scmp.lt.s32.totalorder %s31_s18, %s31_s18 }
  0x17   :  { %p7500_p0 = scmp.ne.s32.totalorder %s31_s18, %s7499_s30  ;;  %p7505_p2 = scmp.lt.s32.totalorder %s7499_s30, %s7499_s30 }
  0x19   :  { %p7506_p3 = por %p7505_p2, %p7504_p1 }
  0x1b   :  { %p7507_p4 = pnand %p7506_p3, %p7500_p0 }
  0x1d   :  { %7510 = shalt.err (!%p7507_p4)  }
  0x1e   :  { %s7535_s7 = smov [#allocation3]  }
  0x1f   :  { %33 = dma.vmem_to_smem %s31_s18, 16, %s7535_s7, [#allocation2] }
  0x20   :  { %7531 = dma.done.wait [#allocation2], 16 }
  0x21   :  { %7532 = vsyncadd [#allocation2], 4294967280 }
  0x22   :  { %35 = sfence }
  0x23   :  { %s9273_s1 = sld [smem:[#allocation9_spill]]  ;;  %v7536_v1 = vmov 0   ;;  %v7537_v5 = vmov 0.0  }
  0x24   :  { %7375 = vset.pattern.permute.xlu0 %v7536_v1  ;;  %s9274_s9 = sld [smem:[#allocation15_spill]]  ;;  %6530 = vmatprep.subr.mxu0 %v7537_v5 }
  0x25   :  { %s9275_s0 = sld [smem:[#allocation16_spill]]  ;;  %6547 = vmatprep.subr.mxu1 %v7537_v5 }
  0x29   :  { %v88_v0 = vld [vmem:[%s9273_s1] sm:$0xf]  ;;  %v5826_v2 = vld [vmem:[%s9273_s1 + $0x4] sm:$0xf] }
  0x2a   :  { %92 = vperm.xlu0 %7375, %v88_v0   ;;  %v188_v3 = vld [vmem:[%s9274_s9 + $0x18] sm:$0xff]  ;;  %v187_v6 = vld [vmem:[%s9274_s9 + $0x10] sm:$0xff] }
  0x2b   :  { %v288_v4 = vld [vmem:[%s9275_s0 + $0x18] sm:$0xff]  ;;  %6531 = vmatpush3.msra.mxu0 %v188_v3  ;;  %v287_v7 = vld [vmem:[%s9275_s0 + $0x10] sm:$0xff] }
  0x2c   :  { %6548 = vmatpush3.msra.mxu1 %v288_v4 }
  0x2d   :  { %36 = vsyncpa [#allocation5], 0  ;;  %6532 = vmatprep.subr.mxu0 %v7537_v5  ;;  %v186_v8 = vld [vmem:[%s9274_s9 + $0x8] sm:$0xff]  ;;  %6549 = vmatprep.subr.mxu1 %v7537_v5  ;;  %v185_v10 = vld [vmem:[%s9274_s9] sm:$0xff]  ;;  %vm7538_vm0 = vmmov 0   ;;  %s96_s5 = sld [smem:[#allocation3]] }
  0x2e   :  { %138 = vperm.xlu0 %7375, %v5826_v2   ;;  %6533 = vmatpush3.msra.mxu0 %v187_v6  ;;  %v286_v9 = vld [vmem:[%s9275_s0 + $0x8] sm:$0xff]  ;;  %v285_v11 = vld [vmem:[%s9275_s0] sm:$0xff]  ;;  %s5827_s18 = sld [smem:[#allocation3 + $0x1]]  ;;  %vm126_vm1 = vcmask 1040384   ;;  %vm128_vm2 = vcmask 1044480   ;;  %vm130_vm3 = vcmask 1045504  }
  0x2f   :  { %6550 = vmatpush3.msra.mxu1 %v287_v7  ;;  %6534 = vmatprep.subr.mxu0 %v7537_v5  ;;  %s9276_s28 = sld [smem:[#allocation12_spill]]  ;;  %vm132_vm4 = vcmask 1046528   ;;  %vm196_vm5 = vcmask 261120   ;;  %v5832_v7 = vld [vmem:[%s9234_s11] ss:$0 sm:$0xff]  ;;  %vm467_vm6 = vcmask 64512  }
  0x30   :  { %6551 = vmatprep.subr.mxu1 %v7537_v5  ;;  %6535 = vmatpush3.msra.mxu0 %v186_v8  ;;  %vm610_vm7 = vcmask 1041408   ;;  %vm566_vm8 = vcmask 146432   ;;  %vm573_vm9 = vcmask 140288   ;;  %vm2590_vm10 = vcmask 254976  }
  0x31   :  { %6552 = vmatpush3.msra.mxu1 %v286_v9  ;;  %6536 = vmatprep.subr.mxu0 %v7537_v5  ;;  %vm2761_vm11 = vcmask 523264  }
  0x32   :  { %6553 = vmatprep.subr.mxu1 %v7537_v5  ;;  %6537 = vmatpush3.msra.mxu0 %v185_v10 }
  0x33   :  { %6538 = vmatprep.mubr.msk.f32.mxu0 %vm7538_vm0, %v7537_v5  ;;  %6554 = vmatpush3.msra.mxu1 %v285_v11  ;;  %p97_p5 = scmp.eq.s32.totalorder %s96_s5, 0  ;;  %p104_p6 = scmp.eq.s32.totalorder %s96_s5, 1 }
  0x34   :  { %6555 = vmatprep.mubr.msk.f32.mxu1 %vm7538_vm0, %v7537_v5  ;;  %6564 = vmatprep.subr.mxu0 %v7537_v5  ;;  %p111_p7 = scmp.eq.s32.totalorder %s96_s5, 2  ;;  %p144_p8 = scmp.eq.s32.totalorder %s5827_s18, 0 }
  0x35   :  { %6581 = vmatprep.subr.mxu1 %v7537_v5  ;;  %s98_s29 = scalar_select %p97_p5, 1, 0  ;;  %v100_v12 = vld [vmem:[%s9276_s28] sm:$0x1]  ;;  %v107_v14 = vld [vmem:[%s9276_s28 + $0x1] sm:$0x1] }
  0x36   :  { %s105_s2 = scalar_select %p104_p6, 1, 0  ;;  %v114_v18 = vld [vmem:[%s9276_s28 + $0x2] sm:$0x1] }
  0x37   :  { %s99_s6 = scvt.s32.f32 %s98_s29  ;;  %p150_p9 = scmp.eq.s32.totalorder %s5827_s18, 1 }
  0x38   :  { %s112_s30 = scalar_select %p111_p7, 1, 0 }
  0x39   :  { %s145_s7 = scalar_select %p144_p8, 1, 0  ;;  %v101_v13 = vstv %s99_s6 }
  0x3a   :  { %s106_s3 = scvt.s32.f32 %s105_s2  ;;  %p156_p10 = scmp.eq.s32.totalorder %s5827_s18, 2  ;;  %v102_v16 = vmul.f32 %v101_v13, %v100_v12 }
  0x3b   :  { %s151_s26 = scalar_select %p150_p9, 1, 0 }
  0x3c   :  { %s113_s1 = scvt.s32.f32 %s112_s30  ;;  %v108_v15 = vstv %s106_s3  ;;  %s146_s5 = scvt.s32.f32 %s145_s7 }
  0x3d   :  { %s157_s8 = scalar_select %p156_p10, 1, 0  ;;  %v109_v17 = vmul.f32 %v108_v15, %v107_v14 }
  0x3e   :  { %s152_s29 = scvt.s32.f32 %s151_s26  ;;  %v115_v19 = vstv %s113_s1  ;;  %v147_v20 = vstv %s146_s5  ;;  %s9277_s6 = sld [smem:[#allocation11_spill]] }
  0x3f   :  { %s158_s18 = scvt.s32.f32 %s157_s8  ;;  %v110_v22 = vadd.f32 %v109_v17, %v102_v16  ;;  %v116_v23 = vmul.f32 %v115_v19, %v114_v18  ;;  %v148_v24 = vmul.f32 %v147_v20, %v100_v12  ;;  %s9278_s7 = sld [smem:[#allocation10_spill]]  ;;  %v5828_v17 = vld [vmem:[%s9233_s10] ss:$0 sm:$0xff] }
  0x40   :  { %v153_v21 = vstv %s152_s29  ;;  %s9279_s1 = sld [smem:[#allocation17_spill]] }
  0x41   :  { %v154_v25 = vmul.f32 %v153_v21, %v107_v14  ;;  %v159_v26 = vstv %s158_s18  ;;  %v117_v27 = vadd.f32 %v116_v23, %v110_v22  ;;  %v5836_v21 = vld [vmem:[%s9235_s12] ss:$0 sm:$0xff]  ;;  %s9280_s8 = sld [smem:[#allocation13_spill]] }
  0x42   :  { %v160_v29 = vmul.f32 %v159_v26, %v114_v18  ;;  %s9281_s2 = sld [smem:[#allocation18_spill]] }
  0x43   :  { %v155_v28 = vadd.f32 %v154_v25, %v148_v24  ;;  %v123_v32 = vrot.slane %v117_v27, 2  ;;  %v5853_v24 = vld [vmem:[%s9274_s9 + $0x38] sm:$0xff]  ;;  %s9282_s18 = sld [smem:[#allocation14_spill]] }
  0x44   :  { %v89_v30 = vld [vmem:[%s9277_s6] sm:$0xf]  ;;  %s9283_s6 = sld [smem:[#allocation19_spill]] }
  0x45   :  { %v161_v34 = vadd.f32 %v160_v29, %v155_v28  ;;  %v85_v35 = vld [vmem:[%s9278_s7] sm:$0xff]  ;;  %v86_v54 = vld [vmem:[%s9278_s7 + $0x8] sm:$0x1]  ;;  %v5852_v29 = vld [vmem:[%s9274_s9 + $0x30] sm:$0xff] }
  0x46   :  { %v125_v39 = vadd.f32 %v123_v32, %v85_v35  ;;  %v379_v49 = vld [vmem:[%s9279_s1 + $0x18] sm:$0xff]  ;;  %v378_v52 = vld [vmem:[%s9279_s1 + $0x10] sm:$0xff]  ;;  %v377_v56 = vld [vmem:[%s9279_s1 + $0x8] sm:$0xff]  ;;  %v177_v58 = vrot.slane %v86_v54, 7 }
  0x47   :  { %v167_v40 = vrot.slane %v161_v34, 2  ;;  %v376_v60 = vld [vmem:[%s9279_s1] sm:$0xff]  ;;  %v5870_v34 = vld [vmem:[%s9279_s1 + $0x30] sm:$0xff] }
  0x48   :  { %v5850_v32 = vld [vmem:[%s9274_s9 + $0x20] sm:$0xff] }
  0x49   :  { %v169_v47 = vadd.f32 %v167_v40, %v85_v35 }
  0xa5   :  { %v93_v31 = vpop.permute.xlu0 %92 }
  0xa6   :  { %v95_v33 = vmul.f32 %v93_v31, %v89_v30  ;;  %v5851_v31 = vld [vmem:[%s9274_s9 + $0x28] sm:$0xff] }
  0xa8   :  { %v119_v36 = vrot.slane %v95_v33, 7  ;;  %v5871_v33 = vld [vmem:[%s9279_s1 + $0x38] sm:$0xff] }
  0xa9   :  { %v139_v37 = vpop.permute.xlu0 %138 }
  0xaa   :  { %v121_v38 = vadd.f32 %v119_v36, %v85_v35  ;;  %v141_v41 = vmul.f32 %v139_v37, %v89_v30  ;;  %v5868_v36 = vld [vmem:[%s9279_s1 + $0x20] sm:$0xff] }
  0xab   :  { %v7890_v37 = vld [vmem:[%s9280_s8] sm:$0xff] }
  0xac   :  { %v127_v42 = vsel %vm126_vm1, %v85_v35, %v121_v38  ;;  %v163_v43 = vrot.slane %v141_v41, 7  ;;  %v7896_v41 = vld [vmem:[%s9280_s8 + $0x8] sm:$0xff] }
  0xad   :  { %v129_v44 = vsel %vm128_vm2, %v127_v42, %v85_v35 }
  0xae   :  { %v131_v45 = vsel %vm130_vm3, %v129_v44, %v125_v39  ;;  %v165_v46 = vadd.f32 %v163_v43, %v85_v35 }
  0xaf   :  { %v7736_v48 = vsel %vm132_vm4, %v131_v45, %v85_v35 }
  0xb0   :  { %v170_v50 = vsel %vm126_vm1, %v85_v35, %v165_v46  ;;  %6539 = vmatmul.mubr.msk.f32.vlgmr.msra.gmra.mxu0 %vm196_vm5, %v7736_v48  ;;  %6556 = vmatmul.mubr.msk.f32.vlgmr.msra.gmra.mxu1 %vm196_vm5, %v7736_v48  ;;  %v7903_v46 = vld [vmem:[%s9280_s8 + $0x10] sm:$0x3] }
  0xb1   :  { %v171_v51 = vsel %vm128_vm2, %v170_v50, %v85_v35  ;;  %6541 = vmatprep.mubr.msk.f32.mxu0 %vm7538_vm0, %v7537_v5  ;;  %6558 = vmatprep.mubr.msk.f32.mxu1 %vm7538_vm0, %v7537_v5 }
  0xb2   :  { %v172_v53 = vsel %vm130_vm3, %v171_v51, %v169_v47  ;;  %6565 = vmatpush3.msra.mxu0 %v379_v49 }
  0xb3   :  { %v173_v55 = vsel %vm132_vm4, %v172_v53, %v85_v35  ;;  %6566 = vmatprep.subr.mxu0 %v7537_v5  ;;  %v5869_v35 = vld [vmem:[%s9279_s1 + $0x28] sm:$0xff] }
  0xb4   :  { %v176_v57 = vrot.slane %v173_v55, 7  ;;  %6567 = vmatpush3.msra.mxu0 %v378_v52 }
  0xb5   :  { %6568 = vmatprep.subr.mxu0 %v7537_v5 }
  0xb6   :  { %v7765_v59 = vsel %vm126_vm1, %v86_v54, %v176_v57  ;;  %6569 = vmatpush3.msra.mxu0 %v377_v56  ;;  %v7780_v61 = vsel %vm126_vm1, %v176_v57, %v177_v58 }
  0xb7   :  { %6542 = vmatmul.mubr.msk.f32.gmra.mxu0 %vm196_vm5, %v7765_v59  ;;  %6559 = vmatmul.mubr.msk.f32.gmra.mxu1 %vm196_vm5, %v7765_v59 }
  0xb8   :  { %6544 = vmatprep.mubr.msk.f32.mxu0 %vm7538_vm0, %v7537_v5  ;;  %6561 = vmatprep.mubr.msk.f32.mxu1 %vm7538_vm0, %v7537_v5 }
  0xb9   :  { %6570 = vmatprep.subr.mxu0 %v7537_v5 }
  0xba   :  { %6571 = vmatpush3.msra.mxu0 %v376_v60 }
  0xbb   :  { %6545 = vmatmul.mubr.msk.f32.gmra.mxu0 %vm196_vm5, %v7780_v61  ;;  %6562 = vmatmul.mubr.msk.f32.gmra.mxu1 %vm196_vm5, %v7780_v61 }
  0xbc   :  { %6572 = vmatprep.mubr.msk.f32.mxu0 %vm7538_vm0, %v7537_v5  ;;  %6587 = vmatprep.mubr.msk.f32.mxu1 %vm7538_vm0, %v7537_v5 }
  0xbd   :  { %6596 = vmatprep.subr.mxu0 %v7537_v5 }
  0xbf   :  { %6573 = vmatmul.mubr.msk.f32.vlgmr.msra.gmra.mxu0 %vm196_vm5, %v7736_v48 }
  0xc0   :  { %6575 = vmatprep.mubr.msk.f32.mxu0 %vm7538_vm0, %v7537_v5 }
  0xc3   :  { %6576 = vmatmul.mubr.msk.f32.gmra.mxu0 %vm196_vm5, %v7765_v59 }
  0xc4   :  { %6578 = vmatprep.mubr.msk.f32.mxu0 %vm7538_vm0, %v7537_v5 }
  0xc7   :  { %6579 = vmatmul.mubr.msk.f32.gmra.mxu0 %vm196_vm5, %v7780_v61 }
  0xc8   :  { %6602 = vmatprep.mubr.msk.f32.mxu0 %vm7538_vm0, %v7537_v5 }
 0x170   :  { %v271_v62 = vpop.f32.mrf.mxu0  ;;  %v362_v63 = vpop.f32.mrf.mxu1 }
 0x171   :  { %v363_v18 = vadd.f32 %v5832_v7, %v362_v63  ;;  %v272_v20 = vadd.f32 %v5828_v17, %v271_v62 }
 0x172   :  { %v6540_v0 = vpop.f32.mrf.mxu0  ;;  %v6557_v1 = vpop.f32.mrf.mxu1 }
 0x173   :  { %v5873_v1 = vld [vmem:[%s9235_s12 + $0x1] ss:$0 sm:$0xff] }
 0x177   :  { %v276_v2 = vpop.f32.mrf.mxu0  ;;  %v367_v3 = vpop.f32.mrf.mxu1 }
 0x178   :  { %v368_v14 = vadd.f32 %v5832_v7, %v367_v3  ;;  %v277_v27 = vadd.f32 %v5828_v17, %v276_v2 }
 0x179   :  { %v6543_v4 = vpop.f32.mrf.mxu0  ;;  %v6560_v6 = vpop.f32.mrf.mxu1 }
 0x17b   :  { %v281_v8 = vpop.f32.mrf.mxu0  ;;  %v372_v9 = vpop.f32.mrf.mxu1 }
 0x17c   :  { %v373_v10 = vadd.f32 %v5832_v7, %v372_v9  ;;  %v282_v30 = vadd.f32 %v5828_v17, %v281_v8 }
 0x17d   :  { %v6546_v11 = vpop.f32.mrf.mxu0  ;;  %v6563_v12 = vpop.f32.mrf.mxu1 }
 0x17e   :  { %6582 = vmatpush3.xpose.msk.msra.mxu1 %vm467_vm6, %v373_v10 }
 0x17f   :  { %v453_v13 = vpop.f32.mrf.mxu0  ;;  %6583 = vmatprep.subr.mxu1 %v7537_v5 }
 0x180   :  { %v454_v28 = vadd.f32 %v5836_v21, %v453_v13 }
 0x181   :  { %v6574_v15 = vpop.f32.mrf.mxu0 }
 0x182   :  { %6584 = vmatpush3.xpose.msk.msra.mxu1 %vm467_vm6, %v368_v14 }
 0x183   :  { %v458_v16 = vpop.f32.mrf.mxu0  ;;  %6585 = vmatprep.subr.mxu1 %v7537_v5 }
 0x184   :  { %v459_v26 = vadd.f32 %v5836_v21, %v458_v16 }
 0x185   :  { %v6577_v19 = vpop.f32.mrf.mxu0 }
 0x186   :  { %6586 = vmatpush3.xpose.msk.msra.mxu1 %vm467_vm6, %v363_v18 }
 0x187   :  { %v463_v22 = vpop.f32.mrf.mxu0  ;;  %6611 = vmatprep.subr.mxu1 %v7537_v5 }
 0x188   :  { %v464_v23 = vadd.f32 %v5836_v21, %v463_v22 }
 0x189   :  { %v6580_v25 = vpop.f32.mrf.mxu0  ;;  %6588 = vmatmul.mubr.msk.f32.vlgmr.msra.gmra.mxu1 %vm467_vm6, %v272_v20 }
 0x18a   :  { %6597 = vmatpush3.msk.msra.mxu0 %vm610_vm7, %v464_v23  ;;  %6590 = vmatprep.mubr.msk.f32.mxu1 %vm7538_vm0, %v7537_v5 }
 0x18b   :  { %6598 = vmatprep.subr.mxu0 %v7537_v5  ;;  %6612 = vmatpush3.msra.mxu1 %v5853_v24 }
 0x18c   :  { %6599 = vmatpush3.msra.mxu0 %v459_v26  ;;  %6613 = vmatprep.subr.mxu1 %v7537_v5 }
 0x18d   :  { %6591 = vmatmul.mubr.msk.f32.gmra.mxu1 %vm467_vm6, %v277_v27  ;;  %6600 = vmatprep.subr.mxu0 %v7537_v5 }
 0x18e   :  { %6601 = vmatpush3.msra.mxu0 %v454_v28  ;;  %6593 = vmatprep.mubr.msk.f32.mxu1 %vm7538_vm0, %v7537_v5  ;;  %v5862_v28 = vld [vmem:[%s9275_s0 + $0x38] sm:$0xff] }
 0x18f   :  { %6614 = vmatpush3.msra.mxu1 %v5852_v29  ;;  %6628 = vmatprep.subr.mxu0 %v7537_v5  ;;  %v5861_v29 = vld [vmem:[%s9275_s0 + $0x30] sm:$0xff] }
 0x190   :  { %6615 = vmatprep.subr.mxu1 %v7537_v5 }
 0x191   :  { %6594 = vmatmul.mubr.msk.f32.gmra.mxu1 %vm467_vm6, %v282_v30 }
 0x192   :  { %6616 = vmatpush3.msra.mxu1 %v5851_v31  ;;  %6619 = vmatprep.mubr.msk.f32.mxu1 %vm7538_vm0, %v7537_v5 }
 0x193   :  { %6617 = vmatprep.subr.mxu1 %v7537_v5 }
 0x194   :  { %6618 = vmatpush3.msra.mxu1 %v5850_v32  ;;  %v5860_v32 = vld [vmem:[%s9275_s0 + $0x28] sm:$0xff] }
 0x195   :  { %6620 = vmatmul.mubr.msk.f32.vlgmr.msra.gmra.mxu1 %vm196_vm5, %v7736_v48  ;;  %6645 = vmatprep.subr.mxu1 %v7537_v5 }
 0x196   :  { %6622 = vmatprep.mubr.msk.f32.mxu1 %vm7538_vm0, %v7537_v5  ;;  %6646 = vmatpush3.msra.mxu1 %v5871_v33  ;;  %v5859_v33 = vld [vmem:[%s9275_s0 + $0x20] sm:$0xff] }
 0x197   :  { %6647 = vmatprep.subr.mxu1 %v7537_v5 }
 0x198   :  { %6648 = vmatpush3.msra.mxu1 %v5870_v34 }
 0x199   :  { %6623 = vmatmul.mubr.msk.f32.gmra.mxu1 %vm196_vm5, %v7765_v59  ;;  %6649 = vmatprep.subr.mxu1 %v7537_v5 }
 0x19a   :  { %6625 = vmatprep.mubr.msk.f32.mxu1 %vm7538_vm0, %v7537_v5  ;;  %6650 = vmatpush3.msra.mxu1 %v5869_v35 }
 0x19b   :  { %6651 = vmatprep.subr.mxu1 %v7537_v5 }
 0x19c   :  { %6652 = vmatpush3.msra.mxu1 %v5868_v36 }
 0x19d   :  { %6626 = vmatmul.mubr.msk.f32.gmra.mxu1 %vm196_vm5, %v7780_v61  ;;  %6677 = vmatprep.subr.mxu1 %v7537_v5 }
 0x19e   :  { %6653 = vmatprep.mubr.msk.f32.mxu1 %vm7538_vm0, %v7537_v5 }
 0x1a1   :  { %6654 = vmatmul.mubr.msk.f32.vlgmr.msra.gmra.mxu1 %vm196_vm5, %v7736_v48 }
 0x1a2   :  { %6656 = vmatprep.mubr.msk.f32.mxu1 %vm7538_vm0, %v7537_v5 }
 0x1a5   :  { %6657 = vmatmul.mubr.msk.f32.gmra.mxu1 %vm196_vm5, %v7765_v59 }
 0x1a6   :  { %6659 = vmatprep.mubr.msk.f32.mxu1 %vm7538_vm0, %v7537_v5 }
 0x1a9   :  { %6660 = vmatmul.mubr.msk.f32.gmra.mxu1 %vm196_vm5, %v7780_v61 }
 0x1aa   :  { %6683 = vmatprep.mubr.msk.f32.mxu1 %vm7538_vm0, %v7537_v5 }
 0x249   :  { %v552_v38 = vpop.f32.mrf.mxu1 }
 0x24a   :  { %v553_v39 = vadd.f32 %v552_v38, %v7890_v37 }
 0x24b   :  { %v6589_v40 = vpop.f32.mrf.mxu1 }
 0x24c   :  { %v567_v42 = vsel %vm566_vm8, %v553_v39, -inf }
 0x24d   :  { %568 = vmax.xlane.f32.xlu1 %v567_v42  ;;  %v557_v43 = vpop.f32.mrf.mxu1 }
 0x24e   :  { %v558_v44 = vadd.f32 %v557_v43, %v7896_v41 }
 0x24f   :  { %v6592_v45 = vpop.f32.mrf.mxu1 }
 0x250   :  { %v570_v47 = vsel %vm566_vm8, %v558_v44, -inf }
 0x251   :  { %571 = vmax.xlane.f32.xlu1 %v570_v47  ;;  %v562_v49 = vpop.f32.mrf.mxu1 }
 0x252   :  { %v563_v50 = vadd.f32 %v562_v49, %v7903_v46 }
 0x253   :  { %v6595_v51 = vpop.f32.mrf.mxu1 }
 0x254   :  { %v574_v52 = vsel %vm573_vm9, %v563_v50, -inf }
 0x255   :  { %575 = vmax.xlane.f32.xlu0 %v574_v52  ;;  %v7908_v53 = vpop.f32.mrf.mxu1 }
 0x257   :  { %v6621_v54 = vpop.f32.mrf.mxu1 }
 0x259   :  { %v7910_v55 = vpop.f32.mrf.mxu1 }
 0x25b   :  { %v6624_v56 = vpop.f32.mrf.mxu1 }
 0x25d   :  { %v7912_v57 = vpop.f32.mrf.mxu1 }
 0x25f   :  { %v6627_v58 = vpop.f32.mrf.mxu1 }
 0x260   :  { %v5855_v58 = vld [vmem:[%s9233_s10 + $0x1] ss:$0 sm:$0xff] }
 0x261   :  { %v960_v60 = vpop.f32.mrf.mxu1 }
 0x262   :  { %v961_v7 = vadd.f32 %v5873_v1, %v960_v60 }
 0x263   :  { %v6655_v62 = vpop.f32.mrf.mxu1 }
 0x264   :  { %v775_v62 = vadd.f32 %v5855_v58, %v7908_v53 }
 0x265   :  { %v965_v63 = vpop.f32.mrf.mxu1 }
 0x266   :  { %v966_v6 = vadd.f32 %v5873_v1, %v965_v63  ;;  %v780_v63 = vadd.f32 %v5855_v58, %v7910_v55 }
 0x267   :  { %v6658_v0 = vpop.f32.mrf.mxu1 }
 0x268   :  { %v785_v0 = vadd.f32 %v5855_v58, %v7912_v57  ;;  %v5915_v58 = vld [vmem:[%s9279_s1 + $0x58] sm:$0xff] }
 0x269   :  { %v970_v2 = vpop.f32.mrf.mxu1 }
 0x26a   :  { %v971_v3 = vadd.f32 %v5873_v1, %v970_v2 }
 0x26b   :  { %v6661_v4 = vpop.f32.mrf.mxu1 }
 0x26c   :  { %6678 = vmatpush3.msk.msra.mxu1 %vm610_vm7, %v971_v3 }
 0x26d   :  { %6679 = vmatprep.subr.mxu1 %v7537_v5 }
 0x26e   :  { %6680 = vmatpush3.msra.mxu1 %v966_v6 }
 0x26f   :  { %6681 = vmatprep.subr.mxu1 %v7537_v5 }
 0x270   :  { %6682 = vmatpush3.msra.mxu1 %v961_v7 }
 0x271   :  { %6703 = vmatprep.subr.mxu1 %v7537_v5 }
 0x2d6   :  { %v569_v8 = vpop.xlane.xlu1 %568 }
 0x2d7   :  { %v577_v9 = vsub.f32 %v553_v39, %v569_v8 }
 0x2d9   :  { %v580_v10 = vmul.f32 1.442695, %v577_v9 }
 0x2da   :  { %v572_v11 = vpop.xlane.xlu1 %571 }
 0x2db   :  { %7376 = vpow2.f32 %v580_v10  ;;  %v578_v12 = vsub.f32 %v558_v44, %v572_v11 }
 0x2dd   :  { %v582_v13 = vmul.f32 1.442695, %v578_v12 }
 0x2de   :  { %v576_v14 = vpop.xlane.xlu0 %575 }
 0x2df   :  { %7378 = vpow2.f32 %v582_v13  ;;  %v579_v15 = vsub.f32 %v563_v50, %v576_v14  ;;  %v5864_v50 = vld [vmem:[%s9234_s11 + $0x1] ss:$0 sm:$0xff] }
 0x2e1   :  { %v584_v16 = vmul.f32 1.442695, %v579_v15 }
 0x2e3   :  { %7380 = vpow2.f32 %v584_v16 }
 0x2e8   :  { %v7377_v17 = vpop.eup %7376 }
 0x2e9   :  { %v586_v18 = vsel %vm566_vm8, %v7377_v17, 0.0 }
 0x2ea   :  { %587 = vadd.xlane.f32.xlu1 %v586_v18 }
 0x2ec   :  { %v7379_v19 = vpop.eup %7378 }
 0x2ed   :  { %v589_v20 = vsel %vm566_vm8, %v7379_v19, 0.0 }
 0x2ee   :  { %590 = vadd.xlane.f32.xlu1 %v589_v20 }
 0x2f0   :  { %v7381_v21 = vpop.eup %7380 }
 0x2f1   :  { %v592_v22 = vsel %vm573_vm9, %v7381_v21, 0.0 }
 0x2f2   :  { %593 = vadd.xlane.f32.xlu1 %v592_v22 }
 0x373   :  { %v588_v23 = vpop.xlane.xlu1 %587 }
 0x374   :  { %7382 = vrcp.f32 %v588_v23 }
 0x377   :  { %v591_v24 = vpop.xlane.xlu1 %590 }
 0x378   :  { %7384 = vrcp.f32 %v591_v24 }
 0x37b   :  { %v594_v25 = vpop.xlane.xlu1 %593 }
 0x37c   :  { %7386 = vrcp.f32 %v594_v25 }
 0x381   :  { %v7383_v26 = vpop.eup %7382 }
 0x382   :  { %v598_v27 = vmul.f32 %v7383_v26, %v7377_v17  ;;  %v5887_v26 = vld [vmem:[%s9236_s13 + $0x8] sm:$0xff] }
 0x384   :  { %6603 = vmatmul.mubr.msk.f32.vlgmr.msra.gmra.mxu0 %vm566_vm8, %v598_v27 }
 0x385   :  { %v7385_v30 = vpop.eup %7384  ;;  %6605 = vmatprep.mubr.msk.f32.mxu0 %vm7538_vm0, %v7537_v5  ;;  %6629 = vmatpush3.msra.mxu0 %v5862_v28 }
 0x386   :  { %v599_v31 = vmul.f32 %v7385_v30, %v7379_v19  ;;  %6630 = vmatprep.subr.mxu0 %v7537_v5 }
 0x387   :  { %6631 = vmatpush3.msra.mxu0 %v5861_v29 }
 0x388   :  { %6606 = vmatmul.mubr.msk.f32.gmra.mxu0 %vm566_vm8, %v599_v31  ;;  %6632 = vmatprep.subr.mxu0 %v7537_v5 }
 0x389   :  { %v7387_v34 = vpop.eup %7386  ;;  %6608 = vmatprep.mubr.msk.f32.mxu0 %vm7538_vm0, %v7537_v5  ;;  %6633 = vmatpush3.msra.mxu0 %v5860_v32  ;;  %v694_v32 = vld [vmem:[%s9236_s13] sm:$0xff] }
 0x38a   :  { %v600_v35 = vmul.f32 %v7387_v34, %v7381_v21  ;;  %6634 = vmatprep.subr.mxu0 %v7537_v5 }
 0x38b   :  { %6635 = vmatpush3.msra.mxu0 %v5859_v33 }
 0x38c   :  { %6609 = vmatmul.mubr.msk.f32.gmra.mxu0 %vm566_vm8, %v600_v35  ;;  %6662 = vmatprep.subr.mxu0 %v7537_v5 }
 0x38d   :  { %6636 = vmatprep.mubr.msk.f32.mxu0 %vm7538_vm0, %v7537_v5 }
 0x390   :  { %6637 = vmatmul.mubr.msk.f32.vlgmr.msra.gmra.mxu0 %vm196_vm5, %v7736_v48 }
 0x391   :  { %6639 = vmatprep.mubr.msk.f32.mxu0 %vm7538_vm0, %v7537_v5 }
 0x394   :  { %6640 = vmatmul.mubr.msk.f32.gmra.mxu0 %vm196_vm5, %v7765_v59 }
 0x395   :  { %6642 = vmatprep.mubr.msk.f32.mxu0 %vm7538_vm0, %v7537_v5 }
 0x398   :  { %6643 = vmatmul.mubr.msk.f32.gmra.mxu0 %vm196_vm5, %v7780_v61 }
 0x399   :  { %6668 = vmatprep.mubr.msk.f32.mxu0 %vm7538_vm0, %v7537_v5 }
 0x444   :  { %v7961_v36 = vpop.f32.mrf.mxu0 }
 0x446   :  { %v6604_v38 = vpop.f32.mrf.mxu0 }
 0x448   :  { %v7963_v39 = vpop.f32.mrf.mxu0 }
 0x44a   :  { %v6607_v40 = vpop.f32.mrf.mxu0 }
 0x44b   :  { %v5906_v40 = vld [vmem:[%s9275_s0 + $0x58] sm:$0xff] }
 0x44c   :  { %v7965_v42 = vpop.f32.mrf.mxu0 }
 0x44e   :  { %v6610_v43 = vpop.f32.mrf.mxu0 }
 0x44f   :  { %v5905_v43 = vld [vmem:[%s9275_s0 + $0x50] sm:$0xff] }
 0x450   :  { %v867_v44 = vpop.f32.mrf.mxu0 }
 0x451   :  { %v868_v60 = vadd.f32 %v5864_v50, %v867_v44  ;;  %v5904_v44 = vld [vmem:[%s9275_s0 + $0x48] sm:$0xff] }
 0x452   :  { %v6638_v45 = vpop.f32.mrf.mxu0 }
 0x453   :  { %v5896_v45 = vld [vmem:[%s9274_s9 + $0x50] sm:$0xff] }
 0x454   :  { %v872_v47 = vpop.f32.mrf.mxu0 }
 0x455   :  { %v873_v56 = vadd.f32 %v5864_v50, %v872_v47 }
 0x456   :  { %v6641_v49 = vpop.f32.mrf.mxu0 }
 0x457   :  { %v5895_v49 = vld [vmem:[%s9274_s9 + $0x48] sm:$0xff] }
 0x458   :  { %v877_v51 = vpop.f32.mrf.mxu0 }
 0x459   :  { %v878_v52 = vadd.f32 %v5864_v50, %v877_v51  ;;  %v5894_v51 = vld [vmem:[%s9274_s9 + $0x40] sm:$0xff] }
 0x45a   :  { %v6644_v54 = vpop.f32.mrf.mxu0 }
 0x45b   :  { %6663 = vmatpush3.xpose.msk.msra.mxu0 %vm467_vm6, %v878_v52 }
 0x45c   :  { %6664 = vmatprep.subr.mxu0 %v7537_v5 }
 0x45f   :  { %6665 = vmatpush3.xpose.msk.msra.mxu0 %vm467_vm6, %v873_v56 }
 0x460   :  { %6666 = vmatprep.subr.mxu0 %v7537_v5 }
 0x463   :  { %6667 = vmatpush3.xpose.msk.msra.mxu0 %vm467_vm6, %v868_v60 }
 0x464   :  { %6692 = vmatprep.subr.mxu0 %v7537_v5 }
 0x466   :  { %6669 = vmatmul.mubr.msk.f32.vlgmr.msra.gmra.mxu0 %vm467_vm6, %v775_v62  ;;  %v5914_v62 = vld [vmem:[%s9279_s1 + $0x50] sm:$0xff] }
 0x467   :  { %6671 = vmatprep.mubr.msk.f32.mxu0 %vm7538_vm0, %v7537_v5  ;;  %6693 = vmatpush3.msra.mxu0 %v5887_v26 }
 0x468   :  { %6714 = vmatprep.subr.mxu0 %v7537_v5 }
 0x46a   :  { %6672 = vmatmul.mubr.msk.f32.gmra.mxu0 %vm467_vm6, %v780_v63 }
 0x46b   :  { %6674 = vmatprep.mubr.msk.f32.mxu0 %vm7538_vm0, %v7537_v5 }
 0x46e   :  { %6675 = vmatmul.mubr.msk.f32.gmra.mxu0 %vm467_vm6, %v785_v0  ;;  %v5913_v0 = vld [vmem:[%s9279_s1 + $0x48] sm:$0xff] }
 0x46f   :  { %6694 = vmatprep.mubr.msk.f32.mxu0 %vm7538_vm0, %v7537_v5 }
 0x526   :  { %v1058_v53 = vpop.f32.mrf.mxu0 }
 0x527   :  { %v1059_v1 = vadd.f32 %v1058_v53, %v7890_v37 }
 0x528   :  { %v6670_v2 = vpop.f32.mrf.mxu0 }
 0x529   :  { %v1072_v3 = vsel %vm566_vm8, %v1059_v1, -inf }
 0x52a   :  { %1073 = vmax.xlane.f32.xlu1 %v1072_v3  ;;  %v1063_v55 = vpop.f32.mrf.mxu0 }
 0x52b   :  { %v1064_v4 = vadd.f32 %v1063_v55, %v7896_v41 }
 0x52c   :  { %v6673_v6 = vpop.f32.mrf.mxu0 }
 0x52d   :  { %v1075_v7 = vsel %vm566_vm8, %v1064_v4, -inf }
 0x52e   :  { %1076 = vmax.xlane.f32.xlu1 %v1075_v7  ;;  %v1068_v57 = vpop.f32.mrf.mxu0 }
 0x52f   :  { %v1069_v8 = vadd.f32 %v1068_v57, %v7903_v46 }
 0x530   :  { %v6676_v9 = vpop.f32.mrf.mxu0 }
 0x531   :  { %v1078_v10 = vsel %vm573_vm9, %v1069_v8, -inf }
 0x532   :  { %1079 = vmax.xlane.f32.xlu1 %v1078_v10 }
 0x5b3   :  { %v1074_v11 = vpop.xlane.xlu1 %1073 }
 0x5b4   :  { %v1081_v12 = vsub.f32 %v1059_v1, %v1074_v11  ;;  %v5912_v1 = vld [vmem:[%s9279_s1 + $0x40] sm:$0xff] }
 0x5b6   :  { %v1084_v13 = vmul.f32 1.442695, %v1081_v12 }
 0x5b7   :  { %v1077_v14 = vpop.xlane.xlu1 %1076 }
 0x5b8   :  { %7388 = vpow2.f32 %v1084_v13  ;;  %v1082_v15 = vsub.f32 %v1064_v4, %v1077_v14 }
 0x5ba   :  { %v1086_v16 = vmul.f32 1.442695, %v1082_v15 }
 0x5bb   :  { %v1080_v17 = vpop.xlane.xlu1 %1079 }
 0x5bc   :  { %7390 = vpow2.f32 %v1086_v16  ;;  %v1083_v18 = vsub.f32 %v1069_v8, %v1080_v17  ;;  %v5908_v8 = vld [vmem:[%s9234_s11 + $0x2] ss:$0 sm:$0xff] }
 0x5be   :  { %v1088_v19 = vmul.f32 1.442695, %v1083_v18 }
 0x5c0   :  { %7392 = vpow2.f32 %v1088_v19 }
 0x5c5   :  { %v7389_v20 = vpop.eup %7388 }
 0x5c6   :  { %v1090_v21 = vsel %vm566_vm8, %v7389_v20, 0.0 }
 0x5c7   :  { %1091 = vadd.xlane.f32.xlu1 %v1090_v21 }
 0x5c9   :  { %v7391_v22 = vpop.eup %7390 }
 0x5ca   :  { %v1093_v23 = vsel %vm566_vm8, %v7391_v22, 0.0 }
 0x5cb   :  { %1094 = vadd.xlane.f32.xlu1 %v1093_v23 }
 0x5cd   :  { %v7393_v24 = vpop.eup %7392 }
 0x5ce   :  { %v1096_v25 = vsel %vm573_vm9, %v7393_v24, 0.0 }
 0x5cf   :  { %1097 = vadd.xlane.f32.xlu0 %v1096_v25 }
 0x650   :  { %v1092_v27 = vpop.xlane.xlu1 %1091 }
 0x651   :  { %7394 = vrcp.f32 %v1092_v27 }
 0x654   :  { %v1095_v28 = vpop.xlane.xlu1 %1094 }
 0x655   :  { %7396 = vrcp.f32 %v1095_v28 }
 0x658   :  { %v1098_v29 = vpop.xlane.xlu0 %1097 }
 0x659   :  { %7398 = vrcp.f32 %v1098_v29 }
 0x65e   :  { %v7395_v30 = vpop.eup %7394 }
 0x65f   :  { %v1102_v31 = vmul.f32 %v7395_v30, %v7389_v20  ;;  %v5899_v20 = vld [vmem:[%s9233_s10 + $0x2] ss:$0 sm:$0xff] }
 0x661   :  { %6684 = vmatmul.mubr.msk.f32.vlgmr.msra.gmra.mxu1 %vm566_vm8, %v1102_v31 }
 0x662   :  { %v7397_v33 = vpop.eup %7396  ;;  %6686 = vmatprep.mubr.msk.f32.mxu1 %vm7538_vm0, %v7537_v5  ;;  %6704 = vmatpush3.msra.mxu1 %v694_v32 }
 0x663   :  { %v1103_v34 = vmul.f32 %v7397_v33, %v7391_v22  ;;  %6731 = vmatprep.subr.mxu1 %v7537_v5 }
 0x665   :  { %6687 = vmatmul.mubr.msk.f32.gmra.mxu1 %vm566_vm8, %v1103_v34  ;;  %v5917_v34 = vld [vmem:[%s9235_s12 + $0x2] ss:$0 sm:$0xff] }
 0x666   :  { %v7399_v35 = vpop.eup %7398  ;;  %6689 = vmatprep.mubr.msk.f32.mxu1 %vm7538_vm0, %v7537_v5 }
 0x667   :  { %v1104_v38 = vmul.f32 %v7399_v35, %v7393_v24 }
 0x669   :  { %6690 = vmatmul.mubr.msk.f32.gmra.mxu1 %vm566_vm8, %v1104_v38 }
 0x66a   :  { %6705 = vmatprep.mubr.msk.f32.mxu1 %vm7538_vm0, %v7537_v5 }
 0x66d   :  { %6706 = vmatmul.mubr.msk.f32.vlgmr.msra.gmra.mxu1 %vm467_vm6, %v7961_v36  ;;  %v5903_v36 = vld [vmem:[%s9275_s0 + $0x40] sm:$0xff] }
 0x66e   :  { %6708 = vmatprep.mubr.msk.f32.mxu1 %vm7538_vm0, %v7537_v5  ;;  %6732 = vmatpush3.msra.mxu1 %v5906_v40 }
 0x66f   :  { %6733 = vmatprep.subr.mxu1 %v7537_v5 }
 0x670   :  { %6734 = vmatpush3.msra.mxu1 %v5905_v43 }
 0x671   :  { %6709 = vmatmul.mubr.msk.f32.gmra.mxu1 %vm467_vm6, %v7963_v39  ;;  %6735 = vmatprep.subr.mxu1 %v7537_v5  ;;  %v5897_v39 = vld [vmem:[%s9274_s9 + $0x58] sm:$0xff] }
 0x672   :  { %6711 = vmatprep.mubr.msk.f32.mxu1 %vm7538_vm0, %v7537_v5  ;;  %6736 = vmatpush3.msra.mxu1 %v5904_v44 }
 0x673   :  { %6737 = vmatprep.subr.mxu1 %v7537_v5 }
 0x674   :  { %6738 = vmatpush3.msra.mxu1 %v5903_v36 }
 0x675   :  { %6712 = vmatmul.mubr.msk.f32.gmra.mxu1 %vm467_vm6, %v7965_v42  ;;  %6765 = vmatprep.subr.mxu1 %v7537_v5 }
 0x676   :  { %6739 = vmatprep.mubr.msk.f32.mxu1 %vm7538_vm0, %v7537_v5 }
 0x679   :  { %6740 = vmatmul.mubr.msk.f32.vlgmr.msra.gmra.mxu1 %vm196_vm5, %v7736_v48 }
 0x67a   :  { %6742 = vmatprep.mubr.msk.f32.mxu1 %vm7538_vm0, %v7537_v5 }
 0x67d   :  { %6743 = vmatmul.mubr.msk.f32.gmra.mxu1 %vm196_vm5, %v7765_v59 }
 0x67e   :  { %6745 = vmatprep.mubr.msk.f32.mxu1 %vm7538_vm0, %v7537_v5 }
 0x681   :  { %6746 = vmatmul.mubr.msk.f32.gmra.mxu1 %vm196_vm5, %v7780_v61 }
 0x682   :  { %6771 = vmatprep.mubr.msk.f32.mxu1 %vm7538_vm0, %v7537_v5 }
 0x721   :  { %v1183_v42 = vpop.f32.mrf.mxu1 }
 0x722   :  { %6695 = vmatmul.mubr.msk.f32.vlgmr.msra.gmra.mxu0 %vm467_vm6, %v1183_v42 }
 0x723   :  { %v6685_v47 = vpop.f32.mrf.mxu1  ;;  %6697 = vmatprep.mubr.msk.f32.mxu0 %vm7538_vm0, %v7537_v5  ;;  %6715 = vmatpush3.msra.mxu0 %v5897_v39 }
 0x724   :  { %6716 = vmatprep.subr.mxu0 %v7537_v5 }
 0x725   :  { %v1188_v50 = vpop.f32.mrf.mxu1  ;;  %6717 = vmatpush3.msra.mxu0 %v5896_v45 }
 0x726   :  { %6698 = vmatmul.mubr.msk.f32.gmra.mxu0 %vm467_vm6, %v1188_v50  ;;  %6718 = vmatprep.subr.mxu0 %v7537_v5 }
 0x727   :  { %v6688_v52 = vpop.f32.mrf.mxu1  ;;  %6700 = vmatprep.mubr.msk.f32.mxu0 %vm7538_vm0, %v7537_v5  ;;  %6719 = vmatpush3.msra.mxu0 %v5895_v49 }
 0x728   :  { %6720 = vmatprep.subr.mxu0 %v7537_v5 }
 0x729   :  { %v1193_v54 = vpop.f32.mrf.mxu1  ;;  %6721 = vmatpush3.msra.mxu0 %v5894_v51 }
 0x72a   :  { %6701 = vmatmul.mubr.msk.f32.gmra.mxu0 %vm467_vm6, %v1193_v54  ;;  %6748 = vmatprep.subr.mxu0 %v7537_v5 }
 0x72b   :  { %v6691_v56 = vpop.f32.mrf.mxu1  ;;  %6722 = vmatprep.mubr.msk.f32.mxu0 %vm7538_vm0, %v7537_v5 }
 0x72d   :  { %v8085_v60 = vpop.f32.mrf.mxu1 }
 0x72e   :  { %6723 = vmatmul.mubr.msk.f32.vlgmr.msra.gmra.mxu0 %vm196_vm5, %v7736_v48 }
 0x72f   :  { %v6707_v63 = vpop.f32.mrf.mxu1  ;;  %6725 = vmatprep.mubr.msk.f32.mxu0 %vm7538_vm0, %v7537_v5  ;;  %6749 = vmatpush3.msra.mxu0 %v5915_v58 }
 0x730   :  { %6750 = vmatprep.subr.mxu0 %v7537_v5 }
 0x731   :  { %v8098_v53 = vpop.f32.mrf.mxu1  ;;  %6751 = vmatpush3.msra.mxu0 %v5914_v62 }
 0x732   :  { %6726 = vmatmul.mubr.msk.f32.gmra.mxu0 %vm196_vm5, %v7765_v59  ;;  %6752 = vmatprep.subr.mxu0 %v7537_v5 }
 0x733   :  { %v6710_v2 = vpop.f32.mrf.mxu1  ;;  %6728 = vmatprep.mubr.msk.f32.mxu0 %vm7538_vm0, %v7537_v5  ;;  %6753 = vmatpush3.msra.mxu0 %v5913_v0 }
 0x734   :  { %6754 = vmatprep.subr.mxu0 %v7537_v5 }
 0x735   :  { %v8109_v3 = vpop.f32.mrf.mxu1  ;;  %6755 = vmatpush3.msra.mxu0 %v5912_v1 }
 0x736   :  { %6729 = vmatmul.mubr.msk.f32.gmra.mxu0 %vm196_vm5, %v7780_v61  ;;  %6780 = vmatprep.subr.mxu0 %v7537_v5 }
 0x737   :  { %v6713_v55 = vpop.f32.mrf.mxu1  ;;  %6756 = vmatprep.mubr.msk.f32.mxu0 %vm7538_vm0, %v7537_v5 }
 0x739   :  { %v1549_v4 = vpop.f32.mrf.mxu1 }
 0x73a   :  { %6757 = vmatmul.mubr.msk.f32.vlgmr.msra.gmra.mxu0 %vm196_vm5, %v7736_v48  ;;  %v1550_v13 = vadd.f32 %v5908_v8, %v1549_v4 }
 0x73b   :  { %v6741_v6 = vpop.f32.mrf.mxu1  ;;  %6759 = vmatprep.mubr.msk.f32.mxu0 %vm7538_vm0, %v7537_v5 }
 0x73d   :  { %v1554_v7 = vpop.f32.mrf.mxu1 }
 0x73e   :  { %6760 = vmatmul.mubr.msk.f32.gmra.mxu0 %vm196_vm5, %v7765_v59  ;;  %v1555_v12 = vadd.f32 %v5908_v8, %v1554_v7 }
 0x73f   :  { %v6744_v57 = vpop.f32.mrf.mxu1  ;;  %6762 = vmatprep.mubr.msk.f32.mxu0 %vm7538_vm0, %v7537_v5 }
 0x741   :  { %v1559_v9 = vpop.f32.mrf.mxu1 }
 0x742   :  { %v1560_v10 = vadd.f32 %v5908_v8, %v1559_v9  ;;  %6763 = vmatmul.mubr.msk.f32.gmra.mxu0 %vm196_vm5, %v7780_v61 }
 0x743   :  { %v6747_v11 = vpop.f32.mrf.mxu1  ;;  %6786 = vmatprep.mubr.msk.f32.mxu0 %vm7538_vm0, %v7537_v5 }
 0x744   :  { %6766 = vmatpush3.xpose.msk.msra.mxu1 %vm467_vm6, %v1560_v10 }
 0x745   :  { %6767 = vmatprep.subr.mxu1 %v7537_v5 }
 0x748   :  { %6768 = vmatpush3.xpose.msk.msra.mxu1 %vm467_vm6, %v1555_v12 }
 0x749   :  { %6769 = vmatprep.subr.mxu1 %v7537_v5 }
 0x74c   :  { %6770 = vmatpush3.xpose.msk.msra.mxu1 %vm467_vm6, %v1550_v13  ;;  %v5931_v13 = vld [vmem:[%s9236_s13 + $0x10] sm:$0xff] }
 0x74d   :  { %6795 = vmatprep.subr.mxu1 %v7537_v5 }
 0x7e2   :  { %v8137_v14 = vpop.f32.mrf.mxu0 }
 0x7e4   :  { %v6696_v15 = vpop.f32.mrf.mxu0 }
 0x7e6   :  { %v8139_v16 = vpop.f32.mrf.mxu0 }
 0x7e8   :  { %v6699_v17 = vpop.f32.mrf.mxu0 }
 0x7ea   :  { %v8141_v18 = vpop.f32.mrf.mxu0 }
 0x7ec   :  { %v6702_v19 = vpop.f32.mrf.mxu0 }
 0x7ee   :  { %v1456_v21 = vpop.f32.mrf.mxu0 }
 0x7ef   :  { %v1457_v22 = vadd.f32 %v5899_v20, %v1456_v21 }
 0x7f0   :  { %v6724_v23 = vpop.f32.mrf.mxu0 }
 0x7f1   :  { %6772 = vmatmul.mubr.msk.f32.vlgmr.msra.gmra.mxu1 %vm467_vm6, %v1457_v22  ;;  %v5938_v22 = vld [vmem:[%s9274_s9 + $0x78] sm:$0xff]  ;;  %v5937_v23 = vld [vmem:[%s9274_s9 + $0x70] sm:$0xff] }
 0x7f2   :  { %v1461_v24 = vpop.f32.mrf.mxu0  ;;  %6774 = vmatprep.mubr.msk.f32.mxu1 %vm7538_vm0, %v7537_v5  ;;  %6796 = vmatpush3.msra.mxu1 %v5931_v13 }
 0x7f3   :  { %v1462_v25 = vadd.f32 %v5899_v20, %v1461_v24  ;;  %6823 = vmatprep.subr.mxu1 %v7537_v5 }
 0x7f4   :  { %v6727_v26 = vpop.f32.mrf.mxu0 }
 0x7f5   :  { %6775 = vmatmul.mubr.msk.f32.gmra.mxu1 %vm467_vm6, %v1462_v25  ;;  %v5936_v26 = vld [vmem:[%s9274_s9 + $0x68] sm:$0xff] }
 0x7f6   :  { %v1466_v27 = vpop.f32.mrf.mxu0  ;;  %6777 = vmatprep.mubr.msk.f32.mxu1 %vm7538_vm0, %v7537_v5 }
 0x7f7   :  { %v1467_v28 = vadd.f32 %v5899_v20, %v1466_v27  ;;  %v5935_v27 = vld [vmem:[%s9274_s9 + $0x60] sm:$0xff] }
 0x7f8   :  { %v6730_v29 = vpop.f32.mrf.mxu0 }
 0x7f9   :  { %6778 = vmatmul.mubr.msk.f32.gmra.mxu1 %vm467_vm6, %v1467_v28 }
 0x7fa   :  { %v1642_v30 = vpop.f32.mrf.mxu0  ;;  %6797 = vmatprep.mubr.msk.f32.mxu1 %vm7538_vm0, %v7537_v5 }
 0x7fb   :  { %v1643_v44 = vadd.f32 %v5917_v34, %v1642_v30  ;;  %v5956_v30 = vld [vmem:[%s9279_s1 + $0x78] sm:$0xff] }
 0x7fc   :  { %v6758_v31 = vpop.f32.mrf.mxu0 }
 0x7fd   :  { %v5955_v31 = vld [vmem:[%s9279_s1 + $0x70] sm:$0xff] }
 0x7fe   :  { %v1647_v32 = vpop.f32.mrf.mxu0 }
 0x7ff   :  { %v1648_v43 = vadd.f32 %v5917_v34, %v1647_v32  ;;  %v5954_v32 = vld [vmem:[%s9279_s1 + $0x68] sm:$0xff] }
 0x800   :  { %v6761_v33 = vpop.f32.mrf.mxu0 }
 0x801   :  { %v5953_v33 = vld [vmem:[%s9279_s1 + $0x60] sm:$0xff] }
 0x802   :  { %v1652_v35 = vpop.f32.mrf.mxu0 }
 0x803   :  { %v1653_v38 = vadd.f32 %v5917_v34, %v1652_v35  ;;  %v5947_v34 = vld [vmem:[%s9275_s0 + $0x78] sm:$0xff] }
 0x804   :  { %v6764_v40 = vpop.f32.mrf.mxu0 }
 0x805   :  { %6781 = vmatpush3.msk.msra.mxu0 %vm610_vm7, %v1653_v38  ;;  %v5946_v38 = vld [vmem:[%s9275_s0 + $0x70] sm:$0xff] }
 0x806   :  { %6782 = vmatprep.subr.mxu0 %v7537_v5 }
 0x807   :  { %6783 = vmatpush3.msra.mxu0 %v1648_v43  ;;  %v5945_v43 = vld [vmem:[%s9275_s0 + $0x68] sm:$0xff] }
 0x808   :  { %6784 = vmatprep.subr.mxu0 %v7537_v5 }
 0x809   :  { %6785 = vmatpush3.msra.mxu0 %v1643_v44 }
 0x80a   :  { %6806 = vmatprep.subr.mxu0 %v7537_v5 }
 0x8b1   :  { %v1740_v36 = vpop.f32.mrf.mxu1 }
 0x8b2   :  { %v1741_v39 = vadd.f32 %v1740_v36, %v7890_v37  ;;  %v5944_v36 = vld [vmem:[%s9275_s0 + $0x60] sm:$0xff] }
 0x8b3   :  { %v6773_v42 = vpop.f32.mrf.mxu1 }
 0x8b4   :  { %v1754_v45 = vsel %vm566_vm8, %v1741_v39, -inf }
 0x8b5   :  { %1755 = vmax.xlane.f32.xlu1 %v1754_v45  ;;  %v1745_v47 = vpop.f32.mrf.mxu1 }
 0x8b6   :  { %v1746_v49 = vadd.f32 %v1745_v47, %v7896_v41 }
 0x8b7   :  { %v6776_v50 = vpop.f32.mrf.mxu1 }
 0x8b8   :  { %v1757_v51 = vsel %vm566_vm8, %v1746_v49, -inf }
 0x8b9   :  { %1758 = vmax.xlane.f32.xlu0 %v1757_v51  ;;  %v1750_v52 = vpop.f32.mrf.mxu1 }
 0x8ba   :  { %v1751_v54 = vadd.f32 %v1750_v52, %v7903_v46 }
 0x8bb   :  { %v6779_v56 = vpop.f32.mrf.mxu1 }
 0x8bc   :  { %v1760_v58 = vsel %vm573_vm9, %v1751_v54, -inf }
 0x8bd   :  { %1761 = vmax.xlane.f32.xlu1 %v1760_v58 }
 0x93e   :  { %v1756_v62 = vpop.xlane.xlu1 %1755 }
 0x93f   :  { %v1763_v63 = vsub.f32 %v1741_v39, %v1756_v62 }
 0x941   :  { %v1766_v0 = vmul.f32 1.442695, %v1763_v63 }
 0x942   :  { %v1759_v1 = vpop.xlane.xlu0 %1758 }
 0x943   :  { %7400 = vpow2.f32 %v1766_v0  ;;  %v1764_v2 = vsub.f32 %v1746_v49, %v1759_v1  ;;  %v5958_v0 = vld [vmem:[%s9235_s12 + $0x3] ss:$0 sm:$0xff] }
 0x945   :  { %v1768_v55 = vmul.f32 1.442695, %v1764_v2 }
 0x946   :  { %v1762_v4 = vpop.xlane.xlu1 %1761 }
 0x947   :  { %7402 = vpow2.f32 %v1768_v55  ;;  %v1765_v6 = vsub.f32 %v1751_v54, %v1762_v4 }
 0x949   :  { %v1770_v7 = vmul.f32 1.442695, %v1765_v6 }
 0x94b   :  { %7404 = vpow2.f32 %v1770_v7  ;;  %v1364_v7 = vadd.f32 %v8085_v60, %v8137_v14 }
 0x950   :  { %v7401_v57 = vpop.eup %7400 }
 0x951   :  { %v1772_v8 = vsel %vm566_vm8, %v7401_v57, 0.0 }
 0x952   :  { %1773 = vadd.xlane.f32.xlu0 %v1772_v8 }
 0x954   :  { %v7403_v9 = vpop.eup %7402 }
 0x955   :  { %v1775_v10 = vsel %vm566_vm8, %v7403_v9, 0.0 }
 0x956   :  { %1776 = vadd.xlane.f32.xlu1 %v1775_v10  ;;  %v1369_v10 = vadd.f32 %v8098_v53, %v8139_v16 }
 0x958   :  { %v7405_v11 = vpop.eup %7404 }
 0x959   :  { %v1778_v12 = vsel %vm573_vm9, %v7405_v11, 0.0 }
 0x95a   :  { %1779 = vadd.xlane.f32.xlu0 %v1778_v12 }
 0x9db   :  { %v1774_v15 = vpop.xlane.xlu0 %1773 }
 0x9dc   :  { %7406 = vrcp.f32 %v1774_v15  ;;  %v1374_v15 = vadd.f32 %v8109_v3, %v8141_v18  ;;  %v5940_v18 = vld [vmem:[%s9233_s10 + $0x3] ss:$0 sm:$0xff] }
 0x9df   :  { %v1777_v17 = vpop.xlane.xlu1 %1776 }
 0x9e0   :  { %7408 = vrcp.f32 %v1777_v17 }
 0x9e3   :  { %v1780_v19 = vpop.xlane.xlu0 %1779 }
 0x9e4   :  { %7410 = vrcp.f32 %v1780_v19 }
 0x9e9   :  { %v7407_v20 = vpop.eup %7406 }
 0x9ea   :  { %v1784_v21 = vmul.f32 %v7407_v20, %v7401_v57 }
 0x9ec   :  { %6787 = vmatmul.mubr.msk.f32.vlgmr.msra.gmra.mxu0 %vm566_vm8, %v1784_v21 }
 0x9ed   :  { %v7409_v24 = vpop.eup %7408  ;;  %6789 = vmatprep.mubr.msk.f32.mxu0 %vm7538_vm0, %v7537_v5  ;;  %6807 = vmatpush3.msra.mxu0 %v5938_v22 }
 0x9ee   :  { %v1785_v25 = vmul.f32 %v7409_v24, %v7403_v9  ;;  %6808 = vmatprep.subr.mxu0 %v7537_v5 }
 0x9ef   :  { %6809 = vmatpush3.msra.mxu0 %v5937_v23  ;;  %v5949_v23 = vld [vmem:[%s9234_s11 + $0x3] ss:$0 sm:$0xff] }
 0x9f0   :  { %6790 = vmatmul.mubr.msk.f32.gmra.mxu0 %vm566_vm8, %v1785_v25  ;;  %6810 = vmatprep.subr.mxu0 %v7537_v5 }
 0x9f1   :  { %v7411_v28 = vpop.eup %7410  ;;  %6792 = vmatprep.mubr.msk.f32.mxu0 %vm7538_vm0, %v7537_v5  ;;  %6811 = vmatpush3.msra.mxu0 %v5936_v26 }
 0x9f2   :  { %v1786_v29 = vmul.f32 %v7411_v28, %v7405_v11  ;;  %6812 = vmatprep.subr.mxu0 %v7537_v5 }
 0x9f3   :  { %6813 = vmatpush3.msra.mxu0 %v5935_v27 }
 0x9f4   :  { %6793 = vmatmul.mubr.msk.f32.gmra.mxu0 %vm566_vm8, %v1786_v29  ;;  %6840 = vmatprep.subr.mxu0 %v7537_v5 }
 0x9f5   :  { %6814 = vmatprep.mubr.msk.f32.mxu0 %vm7538_vm0, %v7537_v5 }
 0x9f8   :  { %6815 = vmatmul.mubr.msk.f32.vlgmr.msra.gmra.mxu0 %vm196_vm5, %v7736_v48 }
 0x9f9   :  { %6817 = vmatprep.mubr.msk.f32.mxu0 %vm7538_vm0, %v7537_v5  ;;  %6841 = vmatpush3.msra.mxu0 %v5956_v30 }
 0x9fa   :  { %6842 = vmatprep.subr.mxu0 %v7537_v5 }
 0x9fb   :  { %6843 = vmatpush3.msra.mxu0 %v5955_v31 }
 0x9fc   :  { %6818 = vmatmul.mubr.msk.f32.gmra.mxu0 %vm196_vm5, %v7765_v59  ;;  %6844 = vmatprep.subr.mxu0 %v7537_v5 }
 0x9fd   :  { %6820 = vmatprep.mubr.msk.f32.mxu0 %vm7538_vm0, %v7537_v5  ;;  %6845 = vmatpush3.msra.mxu0 %v5954_v32 }
 0x9fe   :  { %6846 = vmatprep.subr.mxu0 %v7537_v5 }
 0x9ff   :  { %6847 = vmatpush3.msra.mxu0 %v5953_v33 }
 0xa00   :  { %6821 = vmatmul.mubr.msk.f32.gmra.mxu0 %vm196_vm5, %v7780_v61  ;;  %6872 = vmatprep.subr.mxu0 %v7537_v5 }
 0xa01   :  { %6848 = vmatprep.mubr.msk.f32.mxu0 %vm7538_vm0, %v7537_v5 }
 0xa04   :  { %6849 = vmatmul.mubr.msk.f32.vlgmr.msra.gmra.mxu0 %vm196_vm5, %v7736_v48 }
 0xa05   :  { %6851 = vmatprep.mubr.msk.f32.mxu0 %vm7538_vm0, %v7537_v5 }
 0xa08   :  { %6852 = vmatmul.mubr.msk.f32.gmra.mxu0 %vm196_vm5, %v7765_v59 }
 0xa09   :  { %6854 = vmatprep.mubr.msk.f32.mxu0 %vm7538_vm0, %v7537_v5 }
 0xa0c   :  { %6855 = vmatmul.mubr.msk.f32.gmra.mxu0 %vm196_vm5, %v7780_v61 }
 0xa0d   :  { %6878 = vmatprep.mubr.msk.f32.mxu0 %vm7538_vm0, %v7537_v5 }
 0xaac   :  { %v1865_v35 = vpop.f32.mrf.mxu0 }
 0xaad   :  { %6798 = vmatmul.mubr.msk.f32.vlgmr.msra.gmra.mxu1 %vm467_vm6, %v1865_v35 }
 0xaae   :  { %v6788_v40 = vpop.f32.mrf.mxu0  ;;  %6800 = vmatprep.mubr.msk.f32.mxu1 %vm7538_vm0, %v7537_v5  ;;  %6824 = vmatpush3.msra.mxu1 %v5947_v34 }
 0xaaf   :  { %6825 = vmatprep.subr.mxu1 %v7537_v5 }
 0xab0   :  { %v1870_v44 = vpop.f32.mrf.mxu0  ;;  %6826 = vmatpush3.msra.mxu1 %v5946_v38 }
 0xab1   :  { %6801 = vmatmul.mubr.msk.f32.gmra.mxu1 %vm467_vm6, %v1870_v44  ;;  %6827 = vmatprep.subr.mxu1 %v7537_v5 }
 0xab2   :  { %v6791_v39 = vpop.f32.mrf.mxu0  ;;  %6803 = vmatprep.mubr.msk.f32.mxu1 %vm7538_vm0, %v7537_v5  ;;  %6828 = vmatpush3.msra.mxu1 %v5945_v43 }
 0xab3   :  { %6829 = vmatprep.subr.mxu1 %v7537_v5 }
 0xab4   :  { %v1875_v42 = vpop.f32.mrf.mxu0  ;;  %6830 = vmatpush3.msra.mxu1 %v5944_v36 }
 0xab5   :  { %6804 = vmatmul.mubr.msk.f32.gmra.mxu1 %vm467_vm6, %v1875_v42  ;;  %6857 = vmatprep.subr.mxu1 %v7537_v5 }
 0xab6   :  { %v6794_v45 = vpop.f32.mrf.mxu0  ;;  %6831 = vmatprep.mubr.msk.f32.mxu1 %vm7538_vm0, %v7537_v5 }
 0xab8   :  { %v2052_v47 = vpop.f32.mrf.mxu0 }
 0xab9   :  { %6832 = vmatmul.mubr.msk.f32.vlgmr.msra.gmra.mxu1 %vm196_vm5, %v7736_v48  ;;  %v2053_v26 = vadd.f32 %v5940_v18, %v2052_v47 }
 0xaba   :  { %v6816_v49 = vpop.f32.mrf.mxu0  ;;  %6834 = vmatprep.mubr.msk.f32.mxu1 %vm7538_vm0, %v7537_v5 }
 0xabc   :  { %v2057_v50 = vpop.f32.mrf.mxu0 }
 0xabd   :  { %6835 = vmatmul.mubr.msk.f32.gmra.mxu1 %vm196_vm5, %v7765_v59  ;;  %v2058_v27 = vadd.f32 %v5940_v18, %v2057_v50 }
 0xabe   :  { %v6819_v51 = vpop.f32.mrf.mxu0  ;;  %6837 = vmatprep.mubr.msk.f32.mxu1 %vm7538_vm0, %v7537_v5 }
 0xac0   :  { %v2062_v52 = vpop.f32.mrf.mxu0 }
 0xac1   :  { %6838 = vmatmul.mubr.msk.f32.gmra.mxu1 %vm196_vm5, %v7780_v61  ;;  %v2063_v28 = vadd.f32 %v5940_v18, %v2062_v52 }
 0xac2   :  { %v6822_v54 = vpop.f32.mrf.mxu0  ;;  %6863 = vmatprep.mubr.msk.f32.mxu1 %vm7538_vm0, %v7537_v5 }
 0xac4   :  { %v2238_v56 = vpop.f32.mrf.mxu0 }
 0xac5   :  { %v2239_v6 = vadd.f32 %v5958_v0, %v2238_v56 }
 0xac6   :  { %v6850_v58 = vpop.f32.mrf.mxu0 }
 0xac8   :  { %v2243_v62 = vpop.f32.mrf.mxu0 }
 0xac9   :  { %v2244_v4 = vadd.f32 %v5958_v0, %v2243_v62 }
 0xaca   :  { %v6853_v63 = vpop.f32.mrf.mxu0 }
 0xacb   :  { %v5972_v63 = vld [vmem:[%s9236_s13 + $0x18] sm:$0xff] }
 0xacc   :  { %v2248_v1 = vpop.f32.mrf.mxu0 }
 0xacd   :  { %v2249_v2 = vadd.f32 %v5958_v0, %v2248_v1 }
 0xace   :  { %v6856_v55 = vpop.f32.mrf.mxu0 }
 0xacf   :  { %6873 = vmatpush3.msk.msra.mxu0 %vm610_vm7, %v2249_v2 }
 0xad0   :  { %6874 = vmatprep.subr.mxu0 %v7537_v5 }
 0xad1   :  { %6875 = vmatpush3.msra.mxu0 %v2244_v4 }
 0xad2   :  { %6876 = vmatprep.subr.mxu0 %v7537_v5 }
 0xad3   :  { %6877 = vmatpush3.msra.mxu0 %v2239_v6 }
 0xad4   :  { %6898 = vmatprep.subr.mxu0 %v7537_v5 }
 0xb6d   :  { %v1956_v57 = vpop.f32.mrf.mxu1 }
 0xb6e   :  { %v8286_v8 = vadd.f32 %v1956_v57, %v1364_v7 }
 0xb6f   :  { %v6799_v9 = vpop.f32.mrf.mxu1 }
 0xb71   :  { %v1961_v11 = vpop.f32.mrf.mxu1 }
 0xb72   :  { %v8290_v12 = vadd.f32 %v1961_v11, %v1369_v10 }
 0xb73   :  { %v6802_v13 = vpop.f32.mrf.mxu1 }
 0xb75   :  { %v1966_v17 = vpop.f32.mrf.mxu1 }
 0xb76   :  { %v8294_v19 = vadd.f32 %v1966_v17, %v1374_v15 }
 0xb77   :  { %v6805_v20 = vpop.f32.mrf.mxu1 }
 0xb79   :  { %v2145_v21 = vpop.f32.mrf.mxu1 }
 0xb7a   :  { %v2146_v25 = vadd.f32 %v5949_v23, %v2145_v21 }
 0xb7b   :  { %v6833_v60 = vpop.f32.mrf.mxu1 }
 0xb7c   :  { %v5976_v60 = vld [vmem:[%s9237_s14] ss:$0 sm:$0xff] }
 0xb7d   :  { %v2150_v14 = vpop.f32.mrf.mxu1 }
 0xb7e   :  { %v2151_v3 = vadd.f32 %v5949_v23, %v2150_v14 }
 0xb7f   :  { %v6836_v22 = vpop.f32.mrf.mxu1 }
 0xb81   :  { %v2155_v53 = vpop.f32.mrf.mxu1 }
 0xb82   :  { %v2156_v16 = vadd.f32 %v5949_v23, %v2155_v53 }
 0xb83   :  { %v6839_v24 = vpop.f32.mrf.mxu1 }
 0xb84   :  { %6858 = vmatpush3.xpose.msk.msra.mxu1 %vm467_vm6, %v2156_v16 }
 0xb85   :  { %6859 = vmatprep.subr.mxu1 %v7537_v5 }
 0xb88   :  { %6860 = vmatpush3.xpose.msk.msra.mxu1 %vm467_vm6, %v2151_v3 }
 0xb89   :  { %6861 = vmatprep.subr.mxu1 %v7537_v5 }
 0xb8c   :  { %6862 = vmatpush3.xpose.msk.msra.mxu1 %vm467_vm6, %v2146_v25 }
 0xb8d   :  { %6887 = vmatprep.subr.mxu1 %v7537_v5 }
 0xb8f   :  { %6864 = vmatmul.mubr.msk.f32.vlgmr.msra.gmra.mxu1 %vm467_vm6, %v2053_v26 }
 0xb90   :  { %6866 = vmatprep.mubr.msk.f32.mxu1 %vm7538_vm0, %v7537_v5  ;;  %6888 = vmatpush3.msra.mxu1 %v5972_v63 }
 0xb91   :  { %6915 = vmatprep.subr.mxu1 %v7537_v5 }
 0xb93   :  { %6867 = vmatmul.mubr.msk.f32.gmra.mxu1 %vm467_vm6, %v2058_v27 }
 0xb94   :  { %6869 = vmatprep.mubr.msk.f32.mxu1 %vm7538_vm0, %v7537_v5 }
 0xb97   :  { %6870 = vmatmul.mubr.msk.f32.gmra.mxu1 %vm467_vm6, %v2063_v28 }
 0xb98   :  { %6889 = vmatprep.mubr.msk.f32.mxu1 %vm7538_vm0, %v7537_v5 }
 0xc4f   :  { %v2336_v29 = vpop.f32.mrf.mxu1 }
 0xc50   :  { %v2337_v30 = vadd.f32 %v2336_v29, %v7890_v37 }
 0xc51   :  { %v6865_v31 = vpop.f32.mrf.mxu1 }
 0xc52   :  { %v2350_v32 = vsel %vm566_vm8, %v2337_v30, -inf }
 0xc53   :  { %2351 = vmax.xlane.f32.xlu1 %v2350_v32  ;;  %v2341_v33 = vpop.f32.mrf.mxu1 }
 0xc54   :  { %v2342_v34 = vadd.f32 %v2341_v33, %v7896_v41 }
 0xc55   :  { %v6868_v35 = vpop.f32.mrf.mxu1 }
 0xc56   :  { %v2353_v38 = vsel %vm566_vm8, %v2342_v34, -inf }
 0xc57   :  { %2354 = vmax.xlane.f32.xlu0 %v2353_v38  ;;  %v2346_v40 = vpop.f32.mrf.mxu1 }
 0xc58   :  { %v2347_v43 = vadd.f32 %v2346_v40, %v7903_v46 }
 0xc59   :  { %v6871_v44 = vpop.f32.mrf.mxu1 }
 0xc5a   :  { %v2356_v36 = vsel %vm573_vm9, %v2347_v43, -inf }
 0xc5b   :  { %2357 = vmax.xlane.f32.xlu1 %v2356_v36 }
 0xcdc   :  { %v2352_v39 = vpop.xlane.xlu1 %2351 }
 0xcdd   :  { %v2359_v37 = vsub.f32 %v2337_v30, %v2352_v39 }
 0xcdf   :  { %v2362_v42 = vmul.f32 1.442695, %v2359_v37 }
 0xce0   :  { %v2355_v45 = vpop.xlane.xlu0 %2354 }
 0xce1   :  { %7412 = vpow2.f32 %v2362_v42  ;;  %v2360_v47 = vsub.f32 %v2342_v34, %v2355_v45  ;;  %v2646_v42 = vld [vmem:[%s9242_s19 + $0x18] sm:$0xff]  ;;  %v2645_v45 = vld [vmem:[%s9242_s19 + $0x10] sm:$0xff] }
 0xce3   :  { %v2364_v49 = vmul.f32 1.442695, %v2360_v47  ;;  %v2644_v47 = vld [vmem:[%s9242_s19 + $0x8] sm:$0xff] }
 0xce4   :  { %v2358_v50 = vpop.xlane.xlu1 %2357 }
 0xce5   :  { %7414 = vpow2.f32 %v2364_v49  ;;  %v2361_v41 = vsub.f32 %v2347_v43, %v2358_v50  ;;  %v2643_v49 = vld [vmem:[%s9242_s19] sm:$0xff]  ;;  %v2753_v50 = vld [vmem:[%s9244_s21 + $0x38] sm:$0xff] }
 0xce7   :  { %v2366_v51 = vmul.f32 1.442695, %v2361_v41  ;;  %v2752_v41 = vld [vmem:[%s9244_s21 + $0x30] sm:$0xff] }
 0xce9   :  { %7416 = vpow2.f32 %v2366_v51  ;;  %v2751_v51 = vld [vmem:[%s9244_s21 + $0x28] sm:$0xff] }
 0xcee   :  { %v7413_v52 = vpop.eup %7412 }
 0xcef   :  { %v2368_v54 = vsel %vm566_vm8, %v7413_v52, 0.0 }
 0xcf0   :  { %2369 = vadd.xlane.f32.xlu0 %v2368_v54  ;;  %v2749_v54 = vld [vmem:[%s9244_s21 + $0x18] sm:$0xff] }
 0xcf2   :  { %v7415_v46 = vpop.eup %7414 }
 0xcf3   :  { %v2371_v56 = vsel %vm566_vm8, %v7415_v46, 0.0 }
 0xcf4   :  { %2372 = vadd.xlane.f32.xlu1 %v2371_v56 }
 0xcf6   :  { %v7417_v58 = vpop.eup %7416 }
 0xcf7   :  { %v2374_v62 = vsel %vm573_vm9, %v7417_v58, 0.0 }
 0xcf8   :  { %2375 = vadd.xlane.f32.xlu0 %v2374_v62 }
 0xd79   :  { %v2370_v0 = vpop.xlane.xlu0 %2369 }
 0xd7a   :  { %7418 = vrcp.f32 %v2370_v0 }
 0xd7d   :  { %v2373_v1 = vpop.xlane.xlu1 %2372 }
 0xd7e   :  { %7420 = vrcp.f32 %v2373_v1 }
 0xd81   :  { %v2376_v2 = vpop.xlane.xlu0 %2375 }
 0xd82   :  { %7422 = vrcp.f32 %v2376_v2 }
 0xd87   :  { %v7419_v55 = vpop.eup %7418 }
 0xd88   :  { %v2380_v4 = vmul.f32 %v7419_v55, %v7413_v52  ;;  %v2750_v52 = vld [vmem:[%s9244_s21 + $0x20] sm:$0xff] }
 0xd8a   :  { %6879 = vmatmul.mubr.msk.f32.vlgmr.msra.gmra.mxu0 %vm566_vm8, %v2380_v4 }
 0xd8b   :  { %v7421_v6 = vpop.eup %7420  ;;  %6881 = vmatprep.mubr.msk.f32.mxu0 %vm7538_vm0, %v7537_v5  ;;  %6899 = vmatpush3.msra.mxu0 %v2646_v42 }
 0xd8c   :  { %v2381_v7 = vmul.f32 %v7421_v6, %v7415_v46  ;;  %6900 = vmatprep.subr.mxu0 %v7537_v5  ;;  %v5977_v6 = vld [vmem:[%s9238_s15] ss:$0 sm:$0xff] }
 0xd8d   :  { %6901 = vmatpush3.msra.mxu0 %v2645_v45 }
 0xd8e   :  { %6882 = vmatmul.mubr.msk.f32.gmra.mxu0 %vm566_vm8, %v2381_v7  ;;  %6902 = vmatprep.subr.mxu0 %v7537_v5 }
 0xd8f   :  { %v7423_v57 = vpop.eup %7422  ;;  %6884 = vmatprep.mubr.msk.f32.mxu0 %vm7538_vm0, %v7537_v5  ;;  %6903 = vmatpush3.msra.mxu0 %v2644_v47 }
 0xd90   :  { %v2382_v9 = vmul.f32 %v7423_v57, %v7417_v58  ;;  %6904 = vmatprep.subr.mxu0 %v7537_v5  ;;  %v5978_v57 = vld [vmem:[%s9239_s16] ss:$0 sm:$0xff] }
 0xd91   :  { %6905 = vmatpush3.msra.mxu0 %v2643_v49 }
 0xd92   :  { %6885 = vmatmul.mubr.msk.f32.gmra.mxu0 %vm566_vm8, %v2382_v9  ;;  %6940 = vmatprep.subr.mxu0 %v7537_v5 }
 0xd93   :  { %6906 = vmatprep.mubr.msk.f32.mxu0 %vm7538_vm0, %v7537_v5 }
 0xe4a   :  { %v2461_v10 = vpop.f32.mrf.mxu0 }
 0xe4b   :  { %6890 = vmatmul.mubr.msk.f32.vlgmr.msra.gmra.mxu1 %vm467_vm6, %v2461_v10 }
 0xe4c   :  { %v6880_v11 = vpop.f32.mrf.mxu0  ;;  %6892 = vmatprep.mubr.msk.f32.mxu1 %vm7538_vm0, %v7537_v5  ;;  %6916 = vmatpush3.msra.mxu1 %v2753_v50 }
 0xe4d   :  { %6917 = vmatprep.subr.mxu1 %v7537_v5 }
 0xe4e   :  { %v2466_v13 = vpop.f32.mrf.mxu0  ;;  %6918 = vmatpush3.msra.mxu1 %v2752_v41 }
 0xe4f   :  { %6893 = vmatmul.mubr.msk.f32.gmra.mxu1 %vm467_vm6, %v2466_v13  ;;  %6919 = vmatprep.subr.mxu1 %v7537_v5 }
 0xe50   :  { %v6883_v15 = vpop.f32.mrf.mxu0  ;;  %6895 = vmatprep.mubr.msk.f32.mxu1 %vm7538_vm0, %v7537_v5  ;;  %6920 = vmatpush3.msra.mxu1 %v2751_v51 }
 0xe51   :  { %6921 = vmatprep.subr.mxu1 %v7537_v5 }
 0xe52   :  { %v2471_v17 = vpop.f32.mrf.mxu0  ;;  %6922 = vmatpush3.msra.mxu1 %v2750_v52 }
 0xe53   :  { %6896 = vmatmul.mubr.msk.f32.gmra.mxu1 %vm467_vm6, %v2471_v17  ;;  %6923 = vmatprep.subr.mxu1 %v7537_v5 }
 0xe54   :  { %v6886_v20 = vpop.f32.mrf.mxu0  ;;  %6931 = vmatprep.mubr.msk.f32.mxu1 %vm7538_vm0, %v7537_v5  ;;  %6924 = vmatpush3.msra.mxu1 %v2749_v54 }
 0xe55   :  { %6925 = vmatprep.subr.mxu1 %v7537_v5 }
 0xf0b   :  { %v2552_v21 = vpop.f32.mrf.mxu1 }
 0xf0c   :  { %v2566_v14 = vadd.f32 %v2552_v21, %v8286_v8 }
 0xf0d   :  { %v6891_v22 = vpop.f32.mrf.mxu1 }
 0xf0e   :  { %v2576_v23 = vadd.f32 %v5976_v60, %v2566_v14  ;;  %v2748_v22 = vld [vmem:[%s9244_s21 + $0x10] sm:$0xff] }
 0xf0f   :  { %v2557_v53 = vpop.f32.mrf.mxu1  ;;  %6926 = vmatpush3.msra.mxu1 %v2748_v22 }
 0xf10   :  { %v2567_v16 = vadd.f32 %v2557_v53, %v8290_v12  ;;  %v2579_v24 = vadd.f32 %v2576_v23, %v7736_v48  ;;  %6927 = vmatprep.subr.mxu1 %v7537_v5  ;;  %v2747_v23 = vld [vmem:[%s9244_s21 + $0x8] sm:$0xff]  ;;  %v2746_v53 = vld [vmem:[%s9244_s21] sm:$0xff] }
 0xf11   :  { %v6894_v3 = vpop.f32.mrf.mxu1  ;;  %6928 = vmatpush3.msra.mxu1 %v2747_v23 }
 0xf12   :  { %v2577_v18 = vadd.f32 %v5976_v60, %v2567_v16  ;;  %v2584_v25 = vsel %vm196_vm5, %v2579_v24, 0.0  ;;  %6929 = vmatprep.subr.mxu1 %v7537_v5  ;;  %v5979_v16 = vld [vmem:[%s9243_s20] ss:$0 sm:$0xff] }
 0xf13   :  { %2585 = vadd.xlane.f32.xlu1 %v2584_v25  ;;  %v2562_v26 = vpop.f32.mrf.mxu1  ;;  %6930 = vmatpush3.msra.mxu1 %v2746_v53  ;;  %v5987_v53 = vld [vmem:[%s9240_s17] ss:$0 sm:$0xff] }
 0xf14   :  { %v2568_v27 = vadd.f32 %v2562_v26, %v8294_v19  ;;  %v2580_v28 = vadd.f32 %v2577_v18, %v7765_v59  ;;  %6957 = vmatprep.subr.mxu1 %v7537_v5 }
 0xf15   :  { %v6897_v29 = vpop.f32.mrf.mxu1 }
 0xf16   :  { %v2578_v30 = vadd.f32 %v5976_v60, %v2568_v27  ;;  %v2587_v8 = vsel %vm196_vm5, %v2580_v28, 0.0 }
 0xf17   :  { %2588 = vadd.xlane.f32.xlu0 %v2587_v8 }
 0xf18   :  { %v2581_v12 = vadd.f32 %v2578_v30, %v7780_v61 }
 0xf1a   :  { %v2591_v48 = vsel %vm2590_vm10, %v2581_v12, 0.0 }
 0xf1b   :  { %2592 = vadd.xlane.f32.xlu1 %v2591_v48 }
 0xf9c   :  { %v2586_v31 = vpop.xlane.xlu1 %2585 }
 0xf9d   :  { %v2595_v32 = vmul.f32 0.03125, %v2586_v31  ;;  %v5983_v31 = vld [vmem:[%s9245_s22] ss:$0 sm:$0xff] }
 0xf9f   :  { %v2598_v33 = vsub.f32 %v2579_v24, %v2595_v32 }
 0xfa0   :  { %v2589_v34 = vpop.xlane.xlu0 %2588 }
 0xfa1   :  { %v2596_v35 = vmul.f32 0.03125, %v2589_v34  ;;  %v2601_v38 = vmul.f32 %v2598_v33, %v2598_v33 }
 0xfa3   :  { %v2599_v19 = vsub.f32 %v2580_v28, %v2596_v35  ;;  %v2604_v59 = vsel %vm196_vm5, %v2601_v38, 0.0 }
 0xfa4   :  { %2605 = vadd.xlane.f32.xlu0 %v2604_v59  ;;  %v2593_v40 = vpop.xlane.xlu1 %2592 }
 0xfa5   :  { %v2597_v43 = vmul.f32 0.03125, %v2593_v40  ;;  %v2602_v44 = vmul.f32 %v2599_v19, %v2599_v19 }
 0xfa7   :  { %v2600_v36 = vsub.f32 %v2581_v12, %v2597_v43  ;;  %v2607_v39 = vsel %vm196_vm5, %v2602_v44, 0.0 }
 0xfa8   :  { %2608 = vadd.xlane.f32.xlu1 %v2607_v39 }
 0xfa9   :  { %v2603_v61 = vmul.f32 %v2600_v36, %v2600_v36 }
 0xfab   :  { %v2610_v37 = vsel %vm2590_vm10, %v2603_v61, 0.0 }
 0xfac   :  { %2611 = vadd.xlane.f32.xlu0 %v2610_v37 }
0x102d   :  { %v2606_v46 = vpop.xlane.xlu0 %2605 }
0x102e   :  { %v2613_v56 = vmul.f32 0.03125, %v2606_v46 }
0x1030   :  { %v2616_v58 = vadd.f32 1e-05, %v2613_v56 }
0x1031   :  { %v2609_v62 = vpop.xlane.xlu1 %2608 }
0x1032   :  { %7424 = vrsqrt.f32 %v2616_v58  ;;  %v2614_v63 = vmul.f32 0.03125, %v2609_v62 }
0x1034   :  { %v2617_v0 = vadd.f32 1e-05, %v2614_v63 }
0x1035   :  { %v2612_v1 = vpop.xlane.xlu0 %2611 }
0x1036   :  { %7426 = vrsqrt.f32 %v2617_v0  ;;  %v2615_v2 = vmul.f32 0.03125, %v2612_v1 }
0x1038   :  { %v2618_v55 = vadd.f32 1e-05, %v2615_v2  ;;  %v5992_v2 = vld [vmem:[%s9274_s9 + $0x98] sm:$0xff] }
0x103a   :  { %7428 = vrsqrt.f32 %v2618_v55  ;;  %v6001_v55 = vld [vmem:[%s9275_s0 + $0x98] sm:$0xff] }
0x103f   :  { %v7425_v4 = vpop.eup %7424 }
0x1040   :  { %v2622_v7 = vmul.f32 %v7425_v4, %v2598_v33  ;;  %v5991_v4 = vld [vmem:[%s9274_s9 + $0x90] sm:$0xff] }
0x1042   :  { %v2631_v9 = vmul.f32 %v5977_v6, %v2622_v7  ;;  %v5990_v7 = vld [vmem:[%s9274_s9 + $0x88] sm:$0xff] }
0x1043   :  { %v7427_v10 = vpop.eup %7426 }
0x1044   :  { %v2640_v11 = vadd.f32 %v5978_v57, %v2631_v9  ;;  %v2623_v13 = vmul.f32 %v7427_v10, %v2599_v19  ;;  %v5989_v9 = vld [vmem:[%s9274_s9 + $0x80] sm:$0xff] }
0x1045   :  { %v5998_v10 = vld [vmem:[%s9275_s0 + $0x80] sm:$0xff] }
0x1046   :  { %6907 = vmatmul.mubr.msk.f32.vlgmr.msra.gmra.mxu0 %vm196_vm5, %v2640_v11  ;;  %v2632_v15 = vmul.f32 %v5977_v6, %v2623_v13 }
0x1047   :  { %v7429_v17 = vpop.eup %7428  ;;  %6909 = vmatprep.mubr.msk.f32.mxu0 %vm7538_vm0, %v7537_v5  ;;  %6941 = vmatpush3.msra.mxu0 %v5992_v2 }
0x1048   :  { %v2641_v20 = vadd.f32 %v5978_v57, %v2632_v15  ;;  %v2624_v21 = vmul.f32 %v7429_v17, %v2600_v36  ;;  %6942 = vmatprep.subr.mxu0 %v7537_v5 }
0x1049   :  { %6943 = vmatpush3.msra.mxu0 %v5991_v4  ;;  %v6029_v4 = vld [vmem:[%s9274_s9 + $0xb0] sm:$0xff] }
0x104a   :  { %6910 = vmatmul.mubr.msk.f32.gmra.mxu0 %vm196_vm5, %v2641_v20  ;;  %v2633_v60 = vmul.f32 %v5977_v6, %v2624_v21  ;;  %v6000_v6 = vld [vmem:[%s9275_s0 + $0x90] sm:$0xff]  ;;  %6944 = vmatprep.subr.mxu0 %v7537_v5 }
0x104b   :  { %6912 = vmatprep.mubr.msk.f32.mxu0 %vm7538_vm0, %v7537_v5  ;;  %6945 = vmatpush3.msra.mxu0 %v5990_v7  ;;  %v6028_v7 = vld [vmem:[%s9274_s9 + $0xa8] sm:$0xff] }
0x104c   :  { %v2642_v14 = vadd.f32 %v5978_v57, %v2633_v60  ;;  %v5999_v57 = vld [vmem:[%s9275_s0 + $0x88] sm:$0xff]  ;;  %6946 = vmatprep.subr.mxu0 %v7537_v5 }
0x104d   :  { %6947 = vmatpush3.msra.mxu0 %v5989_v9  ;;  %v6048_v9 = vld [vmem:[%s9279_s1 + $0xb8] sm:$0xff] }
0x104e   :  { %6913 = vmatmul.mubr.msk.f32.gmra.mxu0 %vm196_vm5, %v2642_v14  ;;  %6974 = vmatprep.subr.mxu0 %v7537_v5 }
0x104f   :  { %6948 = vmatprep.mubr.msk.f32.mxu0 %vm7538_vm0, %v7537_v5 }
0x1106   :  { %v2729_v24 = vpop.f32.mrf.mxu0 }
0x1107   :  { %v2730_v3 = vadd.f32 %v5979_v16, %v2729_v24  ;;  %v5988_v24 = vld [vmem:[%s9281_s2] ss:$0 sm:$0xff] }
0x1108   :  { %v6908_v18 = vpop.f32.mrf.mxu0 }
0x1109   :  { %v2743_v25 = vmax.f32 %v2730_v3, 0.0 }
0x110a   :  { %v2734_v26 = vpop.f32.mrf.mxu0 }
0x110b   :  { %v2735_v27 = vadd.f32 %v5979_v16, %v2734_v26  ;;  %6932 = vmatmul.mubr.msk.f32.vlgmr.msra.gmra.mxu1 %vm2761_vm11, %v2743_v25 }
0x110c   :  { %v6911_v28 = vpop.f32.mrf.mxu0  ;;  %6934 = vmatprep.mubr.msk.f32.mxu1 %vm7538_vm0, %v7537_v5  ;;  %6958 = vmatpush3.msra.mxu1 %v6001_v55 }
0x110d   :  { %v2744_v29 = vmax.f32 %v2735_v27, 0.0  ;;  %6959 = vmatprep.subr.mxu1 %v7537_v5  ;;  %v6010_v27 = vld [vmem:[%s9279_s1 + $0x98] sm:$0xff] }
0x110e   :  { %v2739_v30 = vpop.f32.mrf.mxu0  ;;  %6960 = vmatpush3.msra.mxu1 %v6000_v6 }
0x110f   :  { %v2740_v8 = vadd.f32 %v5979_v16, %v2739_v30  ;;  %6935 = vmatmul.mubr.msk.f32.gmra.mxu1 %vm2761_vm11, %v2744_v29  ;;  %6961 = vmatprep.subr.mxu1 %v7537_v5 }
0x1110   :  { %v6914_v12 = vpop.f32.mrf.mxu0  ;;  %6937 = vmatprep.mubr.msk.f32.mxu1 %vm7538_vm0, %v7537_v5  ;;  %6962 = vmatpush3.msra.mxu1 %v5999_v57  ;;  %v6027_v57 = vld [vmem:[%s9274_s9 + $0xa0] sm:$0xff] }
0x1111   :  { %v2745_v48 = vmax.f32 %v2740_v8, 0.0  ;;  %6963 = vmatprep.subr.mxu1 %v7537_v5  ;;  %v6009_v12 = vld [vmem:[%s9279_s1 + $0x90] sm:$0xff] }
0x1112   :  { %6964 = vmatpush3.msra.mxu1 %v5998_v10  ;;  %v6047_v10 = vld [vmem:[%s9279_s1 + $0xb0] sm:$0xff] }
0x1113   :  { %6938 = vmatmul.mubr.msk.f32.gmra.mxu1 %vm2761_vm11, %v2745_v48  ;;  %6991 = vmatprep.subr.mxu1 %v7537_v5 }
0x1114   :  { %6965 = vmatprep.mubr.msk.f32.mxu1 %vm7538_vm0, %v7537_v5 }
0x11cb   :  { %v2837_v32 = vpop.f32.mrf.mxu1 }
0x11cc   :  { %v2838_v33 = vadd.f32 %v5983_v31, %v2837_v32  ;;  %v6008_v32 = vld [vmem:[%s9279_s1 + $0x88] sm:$0xff] }
0x11cd   :  { %v6933_v34 = vpop.f32.mrf.mxu1 }
0x11ce   :  { %v2851_v35 = vadd.f32 %v2838_v33, %v2640_v11  ;;  %v6007_v33 = vld [vmem:[%s9279_s1 + $0x80] sm:$0xff] }
0x11cf   :  { %v2842_v38 = vpop.f32.mrf.mxu1 }
0x11d0   :  { %v2843_v19 = vadd.f32 %v5983_v31, %v2842_v38  ;;  %v2856_v59 = vsel %vm196_vm5, %v2851_v35, 0.0 }
0x11d1   :  { %2857 = vadd.xlane.f32.xlu1 %v2856_v59  ;;  %v6936_v40 = vpop.f32.mrf.mxu1 }
0x11d2   :  { %v2852_v43 = vadd.f32 %v2843_v19, %v2641_v20 }
0x11d3   :  { %v2847_v44 = vpop.f32.mrf.mxu1 }
0x11d4   :  { %v2848_v36 = vadd.f32 %v5983_v31, %v2847_v44  ;;  %v2859_v39 = vsel %vm196_vm5, %v2852_v43, 0.0 }
0x11d5   :  { %2860 = vadd.xlane.f32.xlu0 %v2859_v39  ;;  %v6939_v61 = vpop.f32.mrf.mxu1 }
0x11d6   :  { %v2853_v37 = vadd.f32 %v2848_v36, %v2642_v14  ;;  %v6003_v36 = vld [vmem:[%s9234_s11 + $0x4] ss:$0 sm:$0xff] }
0x11d8   :  { %v2862_v42 = vsel %vm2590_vm10, %v2853_v37, 0.0 }
0x11d9   :  { %2863 = vadd.xlane.f32.xlu1 %v2862_v42 }
0x125a   :  { %v2858_v45 = vpop.xlane.xlu1 %2857 }
0x125b   :  { %v2865_v47 = vmul.f32 0.03125, %v2858_v45 }
0x125d   :  { %v2868_v49 = vsub.f32 %v2851_v35, %v2865_v47 }
0x125e   :  { %v2861_v50 = vpop.xlane.xlu0 %2860 }
0x125f   :  { %v2866_v41 = vmul.f32 0.03125, %v2861_v50  ;;  %v2871_v51 = vmul.f32 %v2868_v49, %v2868_v49 }
0x1261   :  { %v2869_v52 = vsub.f32 %v2852_v43, %v2866_v41  ;;  %v2874_v54 = vsel %vm196_vm5, %v2871_v51, 0.0  ;;  %v5994_v51 = vld [vmem:[%s9233_s10 + $0x4] ss:$0 sm:$0xff] }
0x1262   :  { %2875 = vadd.xlane.f32.xlu0 %v2874_v54  ;;  %v2864_v46 = vpop.xlane.xlu1 %2863 }
0x1263   :  { %v2867_v56 = vmul.f32 0.03125, %v2864_v46  ;;  %v2872_v58 = vmul.f32 %v2869_v52, %v2869_v52 }
0x1265   :  { %v2870_v62 = vsub.f32 %v2853_v37, %v2867_v56  ;;  %v2877_v63 = vsel %vm196_vm5, %v2872_v58, 0.0  ;;  %v6012_v56 = vld [vmem:[%s9235_s12 + $0x4] ss:$0 sm:$0xff] }
0x1266   :  { %2878 = vadd.xlane.f32.xlu1 %v2877_v63  ;;  %v6030_v63 = vld [vmem:[%s9274_s9 + $0xb8] sm:$0xff] }
0x1267   :  { %v2873_v0 = vmul.f32 %v2870_v62, %v2870_v62 }
0x1269   :  { %v2880_v1 = vsel %vm2590_vm10, %v2873_v0, 0.0 }
0x126a   :  { %2881 = vadd.xlane.f32.xlu0 %v2880_v1 }
0x12eb   :  { %v2876_v11 = vpop.xlane.xlu0 %2875 }
0x12ec   :  { %v2883_v13 = vmul.f32 0.03125, %v2876_v11  ;;  %v6046_v11 = vld [vmem:[%s9279_s1 + $0xa8] sm:$0xff] }
0x12ee   :  { %v2886_v15 = vadd.f32 1e-05, %v2883_v13  ;;  %v6045_v13 = vld [vmem:[%s9279_s1 + $0xa0] sm:$0xff] }
0x12ef   :  { %v2879_v17 = vpop.xlane.xlu1 %2878 }
0x12f0   :  { %7430 = vrsqrt.f32 %v2886_v15  ;;  %v2884_v20 = vmul.f32 0.03125, %v2879_v17  ;;  %v8630_v17 = vld [vmem:[%s9280_s8] sm:$0xff] }
0x12f2   :  { %v2887_v21 = vadd.f32 1e-05, %v2884_v20 }
0x12f3   :  { %v2882_v60 = vpop.xlane.xlu0 %2881 }
0x12f4   :  { %7432 = vrsqrt.f32 %v2887_v21  ;;  %v2885_v14 = vmul.f32 0.03125, %v2882_v60 }
0x12f6   :  { %v2888_v22 = vadd.f32 1e-05, %v2885_v14 }
0x12f8   :  { %7434 = vrsqrt.f32 %v2888_v22  ;;  %v8637_v22 = vld [vmem:[%s9280_s8 + $0x8] sm:$0xff] }
0x12fd   :  { %v7431_v23 = vpop.eup %7430 }
0x12fe   :  { %v2892_v16 = vmul.f32 %v7431_v23, %v2868_v49 }
0x1300   :  { %v2901_v3 = vmul.f32 %v5987_v53, %v2892_v16 }
0x1301   :  { %v7433_v18 = vpop.eup %7432 }
0x1302   :  { %v8485_v25 = vadd.f32 %v5988_v24, %v2901_v3  ;;  %v2893_v26 = vmul.f32 %v7433_v18, %v2869_v52  ;;  %v8644_v3 = vld [vmem:[%s9280_s8 + $0x10] sm:$0x3] }
0x1304   :  { %v2902_v28 = vmul.f32 %v5987_v53, %v2893_v26  ;;  %6949 = vmatmul.mubr.msk.f32.vlgmr.msra.gmra.mxu0 %vm196_vm5, %v8485_v25  ;;  %6966 = vmatmul.mubr.msk.f32.vlgmr.msra.gmra.mxu1 %vm196_vm5, %v8485_v25 }
0x1305   :  { %v7435_v29 = vpop.eup %7434  ;;  %6951 = vmatprep.mubr.msk.f32.mxu0 %vm7538_vm0, %v7537_v5  ;;  %6968 = vmatprep.mubr.msk.f32.mxu1 %vm7538_vm0, %v7537_v5 }
0x1306   :  { %v8498_v30 = vadd.f32 %v5988_v24, %v2902_v28  ;;  %v2894_v8 = vmul.f32 %v7435_v29, %v2870_v62  ;;  %6975 = vmatpush3.msra.mxu0 %v6010_v27 }
0x1307   :  { %6976 = vmatprep.subr.mxu0 %v7537_v5 }
0x1308   :  { %v2903_v48 = vmul.f32 %v5987_v53, %v2894_v8  ;;  %6952 = vmatmul.mubr.msk.f32.gmra.mxu0 %vm196_vm5, %v8498_v30  ;;  %6969 = vmatmul.mubr.msk.f32.gmra.mxu1 %vm196_vm5, %v8498_v30 }
0x1309   :  { %6954 = vmatprep.mubr.msk.f32.mxu0 %vm7538_vm0, %v7537_v5  ;;  %6971 = vmatprep.mubr.msk.f32.mxu1 %vm7538_vm0, %v7537_v5 }
0x130a   :  { %v8512_v31 = vadd.f32 %v5988_v24, %v2903_v48  ;;  %6977 = vmatpush3.msra.mxu0 %v6009_v12 }
0x130b   :  { %6978 = vmatprep.subr.mxu0 %v7537_v5 }
0x130c   :  { %6955 = vmatmul.mubr.msk.f32.gmra.mxu0 %vm196_vm5, %v8512_v31  ;;  %6972 = vmatmul.mubr.msk.f32.gmra.mxu1 %vm196_vm5, %v8512_v31 }
0x130d   :  { %6979 = vmatpush3.msra.mxu0 %v6008_v32  ;;  %6982 = vmatprep.mubr.msk.f32.mxu0 %vm7538_vm0, %v7537_v5 }
0x130e   :  { %6980 = vmatprep.subr.mxu0 %v7537_v5  ;;  %6997 = vmatprep.mubr.msk.f32.mxu1 %vm7538_vm0, %v7537_v5 }
0x130f   :  { %6981 = vmatpush3.msra.mxu0 %v6007_v33 }
0x1310   :  { %6983 = vmatmul.mubr.msk.f32.vlgmr.msra.gmra.mxu0 %vm196_vm5, %v8485_v25  ;;  %7006 = vmatprep.subr.mxu0 %v7537_v5 }
0x1311   :  { %6985 = vmatprep.mubr.msk.f32.mxu0 %vm7538_vm0, %v7537_v5 }
0x1314   :  { %6986 = vmatmul.mubr.msk.f32.gmra.mxu0 %vm196_vm5, %v8498_v30 }
0x1315   :  { %6988 = vmatprep.mubr.msk.f32.mxu0 %vm7538_vm0, %v7537_v5 }
0x1318   :  { %6989 = vmatmul.mubr.msk.f32.gmra.mxu0 %vm196_vm5, %v8512_v31 }
0x1319   :  { %7012 = vmatprep.mubr.msk.f32.mxu0 %vm7538_vm0, %v7537_v5 }
0x13c4   :  { %v3001_v34 = vpop.f32.mrf.mxu0  ;;  %v3094_v35 = vpop.f32.mrf.mxu1 }
0x13c5   :  { %v3095_v52 = vadd.f32 %v6003_v36, %v3094_v35  ;;  %v3002_v46 = vadd.f32 %v5994_v51, %v3001_v34 }
0x13c6   :  { %v6950_v38 = vpop.f32.mrf.mxu0  ;;  %v6967_v19 = vpop.f32.mrf.mxu1 }
0x13c7   :  { %v6050_v19 = vld [vmem:[%s9235_s12 + $0x5] ss:$0 sm:$0xff] }
0x13c8   :  { %v3006_v59 = vpop.f32.mrf.mxu0  ;;  %v3099_v40 = vpop.f32.mrf.mxu1 }
0x13c9   :  { %v3100_v49 = vadd.f32 %v6003_v36, %v3099_v40  ;;  %v3007_v2 = vadd.f32 %v5994_v51, %v3006_v59 }
0x13ca   :  { %v6953_v43 = vpop.f32.mrf.mxu0  ;;  %v6970_v44 = vpop.f32.mrf.mxu1 }
0x13cc   :  { %v3011_v39 = vpop.f32.mrf.mxu0  ;;  %v3104_v61 = vpop.f32.mrf.mxu1 }
0x13cd   :  { %v3105_v37 = vadd.f32 %v6003_v36, %v3104_v61  ;;  %v3012_v6 = vadd.f32 %v5994_v51, %v3011_v39 }
0x13ce   :  { %v6956_v42 = vpop.f32.mrf.mxu0  ;;  %v6973_v45 = vpop.f32.mrf.mxu1 }
0x13cf   :  { %6992 = vmatpush3.xpose.msk.msra.mxu1 %vm467_vm6, %v3105_v37 }
0x13d0   :  { %v3187_v47 = vpop.f32.mrf.mxu0  ;;  %6993 = vmatprep.subr.mxu1 %v7537_v5 }
0x13d1   :  { %v3188_v55 = vadd.f32 %v6012_v56, %v3187_v47 }
0x13d2   :  { %v6984_v50 = vpop.f32.mrf.mxu0 }
0x13d3   :  { %6994 = vmatpush3.xpose.msk.msra.mxu1 %vm467_vm6, %v3100_v49 }
0x13d4   :  { %v3192_v41 = vpop.f32.mrf.mxu0  ;;  %6995 = vmatprep.subr.mxu1 %v7537_v5 }
0x13d5   :  { %v3193_v1 = vadd.f32 %v6012_v56, %v3192_v41 }
0x13d6   :  { %v6987_v54 = vpop.f32.mrf.mxu0 }
0x13d7   :  { %6996 = vmatpush3.xpose.msk.msra.mxu1 %vm467_vm6, %v3095_v52 }
0x13d8   :  { %v3197_v58 = vpop.f32.mrf.mxu0  ;;  %7021 = vmatprep.subr.mxu1 %v7537_v5 }
0x13d9   :  { %v3198_v62 = vadd.f32 %v6012_v56, %v3197_v58 }
0x13da   :  { %v6990_v0 = vpop.f32.mrf.mxu0  ;;  %6998 = vmatmul.mubr.msk.f32.vlgmr.msra.gmra.mxu1 %vm467_vm6, %v3002_v46 }
0x13db   :  { %7007 = vmatpush3.msk.msra.mxu0 %vm610_vm7, %v3198_v62  ;;  %7000 = vmatprep.mubr.msk.f32.mxu1 %vm7538_vm0, %v7537_v5 }
0x13dc   :  { %7008 = vmatprep.subr.mxu0 %v7537_v5  ;;  %7022 = vmatpush3.msra.mxu1 %v6030_v63 }
0x13dd   :  { %7009 = vmatpush3.msra.mxu0 %v3193_v1  ;;  %7023 = vmatprep.subr.mxu1 %v7537_v5 }
0x13de   :  { %7001 = vmatmul.mubr.msk.f32.gmra.mxu1 %vm467_vm6, %v3007_v2  ;;  %7010 = vmatprep.subr.mxu0 %v7537_v5 }
0x13df   :  { %7011 = vmatpush3.msra.mxu0 %v3188_v55  ;;  %7003 = vmatprep.mubr.msk.f32.mxu1 %vm7538_vm0, %v7537_v5  ;;  %v6039_v55 = vld [vmem:[%s9275_s0 + $0xb8] sm:$0xff] }
0x13e0   :  { %7024 = vmatpush3.msra.mxu1 %v6029_v4  ;;  %7038 = vmatprep.subr.mxu0 %v7537_v5  ;;  %v6038_v4 = vld [vmem:[%s9275_s0 + $0xb0] sm:$0xff] }
0x13e1   :  { %7025 = vmatprep.subr.mxu1 %v7537_v5 }
0x13e2   :  { %7004 = vmatmul.mubr.msk.f32.gmra.mxu1 %vm467_vm6, %v3012_v6 }
0x13e3   :  { %7026 = vmatpush3.msra.mxu1 %v6028_v7  ;;  %7029 = vmatprep.mubr.msk.f32.mxu1 %vm7538_vm0, %v7537_v5 }
0x13e4   :  { %7027 = vmatprep.subr.mxu1 %v7537_v5 }
0x13e5   :  { %7028 = vmatpush3.msra.mxu1 %v6027_v57  ;;  %v6037_v57 = vld [vmem:[%s9275_s0 + $0xa8] sm:$0xff] }
0x13e6   :  { %7030 = vmatmul.mubr.msk.f32.vlgmr.msra.gmra.mxu1 %vm196_vm5, %v8485_v25  ;;  %7055 = vmatprep.subr.mxu1 %v7537_v5 }
0x13e7   :  { %7032 = vmatprep.mubr.msk.f32.mxu1 %vm7538_vm0, %v7537_v5  ;;  %7056 = vmatpush3.msra.mxu1 %v6048_v9  ;;  %v6036_v9 = vld [vmem:[%s9275_s0 + $0xa0] sm:$0xff] }
0x13e8   :  { %7057 = vmatprep.subr.mxu1 %v7537_v5 }
0x13e9   :  { %7058 = vmatpush3.msra.mxu1 %v6047_v10 }
0x13ea   :  { %7033 = vmatmul.mubr.msk.f32.gmra.mxu1 %vm196_vm5, %v8498_v30  ;;  %7059 = vmatprep.subr.mxu1 %v7537_v5 }
0x13eb   :  { %7035 = vmatprep.mubr.msk.f32.mxu1 %vm7538_vm0, %v7537_v5  ;;  %7060 = vmatpush3.msra.mxu1 %v6046_v11 }
0x13ec   :  { %7061 = vmatprep.subr.mxu1 %v7537_v5 }
0x13ed   :  { %7062 = vmatpush3.msra.mxu1 %v6045_v13 }
0x13ee   :  { %7036 = vmatmul.mubr.msk.f32.gmra.mxu1 %vm196_vm5, %v8512_v31  ;;  %7087 = vmatprep.subr.mxu1 %v7537_v5 }
0x13ef   :  { %7063 = vmatprep.mubr.msk.f32.mxu1 %vm7538_vm0, %v7537_v5 }
0x13f2   :  { %7064 = vmatmul.mubr.msk.f32.vlgmr.msra.gmra.mxu1 %vm196_vm5, %v8485_v25 }
0x13f3   :  { %7066 = vmatprep.mubr.msk.f32.mxu1 %vm7538_vm0, %v7537_v5 }
0x13f6   :  { %7067 = vmatmul.mubr.msk.f32.gmra.mxu1 %vm196_vm5, %v8498_v30 }
0x13f7   :  { %7069 = vmatprep.mubr.msk.f32.mxu1 %vm7538_vm0, %v7537_v5 }
0x13fa   :  { %7070 = vmatmul.mubr.msk.f32.gmra.mxu1 %vm196_vm5, %v8512_v31 }
0x13fb   :  { %7093 = vmatprep.mubr.msk.f32.mxu1 %vm7538_vm0, %v7537_v5 }
0x149a   :  { %v3285_v15 = vpop.f32.mrf.mxu1 }
0x149b   :  { %v3286_v20 = vadd.f32 %v8630_v17, %v3285_v15 }
0x149c   :  { %v6999_v21 = vpop.f32.mrf.mxu1 }
0x149d   :  { %v3299_v60 = vsel %vm566_vm8, %v3286_v20, -inf }
0x149e   :  { %3300 = vmax.xlane.f32.xlu1 %v3299_v60  ;;  %v3290_v14 = vpop.f32.mrf.mxu1 }
0x149f   :  { %v3291_v23 = vadd.f32 %v8637_v22, %v3290_v14 }
0x14a0   :  { %v7002_v53 = vpop.f32.mrf.mxu1 }
0x14a1   :  { %v3302_v16 = vsel %vm566_vm8, %v3291_v23, -inf }
0x14a2   :  { %3303 = vmax.xlane.f32.xlu0 %v3302_v16  ;;  %v3295_v24 = vpop.f32.mrf.mxu1 }
0x14a3   :  { %v3296_v18 = vadd.f32 %v8644_v3, %v3295_v24 }
0x14a4   :  { %v7005_v26 = vpop.f32.mrf.mxu1 }
0x14a5   :  { %v3305_v27 = vsel %vm573_vm9, %v3296_v18, -inf }
0x14a6   :  { %3306 = vmax.xlane.f32.xlu1 %v3305_v27  ;;  %v8648_v28 = vpop.f32.mrf.mxu1 }
0x14a8   :  { %v7031_v29 = vpop.f32.mrf.mxu1 }
0x14aa   :  { %v8650_v8 = vpop.f32.mrf.mxu1 }
0x14ac   :  { %v7034_v12 = vpop.f32.mrf.mxu1 }
0x14ae   :  { %v8652_v48 = vpop.f32.mrf.mxu1 }
0x14b0   :  { %v7037_v32 = vpop.f32.mrf.mxu1 }
0x14b1   :  { %v6032_v32 = vld [vmem:[%s9233_s10 + $0x5] ss:$0 sm:$0xff] }
0x14b2   :  { %v3691_v33 = vpop.f32.mrf.mxu1 }
0x14b3   :  { %v3692_v36 = vadd.f32 %v6050_v19, %v3691_v33 }
0x14b4   :  { %v7065_v34 = vpop.f32.mrf.mxu1 }
0x14b5   :  { %v3506_v34 = vadd.f32 %v6032_v32, %v8648_v28 }
0x14b6   :  { %v3696_v35 = vpop.f32.mrf.mxu1 }
0x14b7   :  { %v3697_v44 = vadd.f32 %v6050_v19, %v3696_v35  ;;  %v3511_v35 = vadd.f32 %v6032_v32, %v8650_v8 }
0x14b8   :  { %v7068_v38 = vpop.f32.mrf.mxu1 }
0x14b9   :  { %v3516_v38 = vadd.f32 %v6032_v32, %v8652_v48  ;;  %v6092_v32 = vld [vmem:[%s9279_s1 + $0xd8] sm:$0xff] }
0x14ba   :  { %v3701_v59 = vpop.f32.mrf.mxu1 }
0x14bb   :  { %v3702_v40 = vadd.f32 %v6050_v19, %v3701_v59 }
0x14bc   :  { %v7071_v43 = vpop.f32.mrf.mxu1 }
0x14bd   :  { %7088 = vmatpush3.msk.msra.mxu1 %vm610_vm7, %v3702_v40 }
0x14be   :  { %7089 = vmatprep.subr.mxu1 %v7537_v5 }
0x14bf   :  { %7090 = vmatpush3.msra.mxu1 %v3697_v44 }
0x14c0   :  { %7091 = vmatprep.subr.mxu1 %v7537_v5 }
0x14c1   :  { %7092 = vmatpush3.msra.mxu1 %v3692_v36 }
0x14c2   :  { %7113 = vmatprep.subr.mxu1 %v7537_v5 }
0x1527   :  { %v3301_v39 = vpop.xlane.xlu1 %3300 }
0x1528   :  { %v3308_v61 = vsub.f32 %v3286_v20, %v3301_v39 }
0x152a   :  { %v3311_v37 = vmul.f32 1.442695, %v3308_v61 }
0x152b   :  { %v3304_v42 = vpop.xlane.xlu0 %3303 }
0x152c   :  { %7436 = vpow2.f32 %v3311_v37  ;;  %v3309_v45 = vsub.f32 %v3291_v23, %v3304_v42 }
0x152e   :  { %v3313_v47 = vmul.f32 1.442695, %v3309_v45 }
0x152f   :  { %v3307_v49 = vpop.xlane.xlu1 %3306 }
0x1530   :  { %7438 = vpow2.f32 %v3313_v47  ;;  %v3310_v50 = vsub.f32 %v3296_v18, %v3307_v49  ;;  %v6041_v18 = vld [vmem:[%s9234_s11 + $0x5] ss:$0 sm:$0xff] }
0x1532   :  { %v3315_v41 = vmul.f32 1.442695, %v3310_v50 }
0x1534   :  { %7440 = vpow2.f32 %v3315_v41 }
0x1539   :  { %v7437_v51 = vpop.eup %7436 }
0x153a   :  { %v3317_v52 = vsel %vm566_vm8, %v7437_v51, 0.0 }
0x153b   :  { %3318 = vadd.xlane.f32.xlu0 %v3317_v52 }
0x153d   :  { %v7439_v54 = vpop.eup %7438 }
0x153e   :  { %v3320_v46 = vsel %vm566_vm8, %v7439_v54, 0.0 }
0x153f   :  { %3321 = vadd.xlane.f32.xlu1 %v3320_v46 }
0x1541   :  { %v7441_v56 = vpop.eup %7440 }
0x1542   :  { %v3323_v58 = vsel %vm573_vm9, %v7441_v56, 0.0 }
0x1543   :  { %3324 = vadd.xlane.f32.xlu0 %v3323_v58 }
0x15c4   :  { %v3319_v62 = vpop.xlane.xlu0 %3318 }
0x15c5   :  { %7442 = vrcp.f32 %v3319_v62 }
0x15c8   :  { %v3322_v63 = vpop.xlane.xlu1 %3321 }
0x15c9   :  { %7444 = vrcp.f32 %v3322_v63 }
0x15cc   :  { %v3325_v0 = vpop.xlane.xlu0 %3324 }
0x15cd   :  { %7446 = vrcp.f32 %v3325_v0 }
0x15d2   :  { %v7443_v1 = vpop.eup %7442 }
0x15d3   :  { %v3329_v2 = vmul.f32 %v7443_v1, %v7437_v51  ;;  %v6064_v1 = vld [vmem:[%s9236_s13 + $0x28] sm:$0xff] }
0x15d5   :  { %7013 = vmatmul.mubr.msk.f32.vlgmr.msra.gmra.mxu0 %vm566_vm8, %v3329_v2 }
0x15d6   :  { %v7445_v6 = vpop.eup %7444  ;;  %7015 = vmatprep.mubr.msk.f32.mxu0 %vm7538_vm0, %v7537_v5  ;;  %7039 = vmatpush3.msra.mxu0 %v6039_v55 }
0x15d7   :  { %v3330_v7 = vmul.f32 %v7445_v6, %v7439_v54  ;;  %7040 = vmatprep.subr.mxu0 %v7537_v5 }
0x15d8   :  { %7041 = vmatpush3.msra.mxu0 %v6038_v4 }
0x15d9   :  { %7016 = vmatmul.mubr.msk.f32.gmra.mxu0 %vm566_vm8, %v3330_v7  ;;  %7042 = vmatprep.subr.mxu0 %v7537_v5 }
0x15da   :  { %v7447_v10 = vpop.eup %7446  ;;  %7018 = vmatprep.mubr.msk.f32.mxu0 %vm7538_vm0, %v7537_v5  ;;  %7043 = vmatpush3.msra.mxu0 %v6037_v57  ;;  %v6026_v57 = vld [vmem:[%s9236_s13 + $0x20] sm:$0xff] }
0x15db   :  { %v3331_v11 = vmul.f32 %v7447_v10, %v7441_v56  ;;  %7044 = vmatprep.subr.mxu0 %v7537_v5 }
0x15dc   :  { %7045 = vmatpush3.msra.mxu0 %v6036_v9 }
0x15dd   :  { %7019 = vmatmul.mubr.msk.f32.gmra.mxu0 %vm566_vm8, %v3331_v11  ;;  %7072 = vmatprep.subr.mxu0 %v7537_v5 }
0x15de   :  { %7046 = vmatprep.mubr.msk.f32.mxu0 %vm7538_vm0, %v7537_v5 }
0x15e1   :  { %7047 = vmatmul.mubr.msk.f32.vlgmr.msra.gmra.mxu0 %vm196_vm5, %v8485_v25 }
0x15e2   :  { %7049 = vmatprep.mubr.msk.f32.mxu0 %vm7538_vm0, %v7537_v5 }
0x15e5   :  { %7050 = vmatmul.mubr.msk.f32.gmra.mxu0 %vm196_vm5, %v8498_v30 }
0x15e6   :  { %7052 = vmatprep.mubr.msk.f32.mxu0 %vm7538_vm0, %v7537_v5 }
0x15e9   :  { %7053 = vmatmul.mubr.msk.f32.gmra.mxu0 %vm196_vm5, %v8512_v31 }
0x15ea   :  { %7078 = vmatprep.mubr.msk.f32.mxu0 %vm7538_vm0, %v7537_v5 }
0x1695   :  { %v8701_v13 = vpop.f32.mrf.mxu0 }
0x1697   :  { %v7014_v15 = vpop.f32.mrf.mxu0 }
0x1699   :  { %v8703_v20 = vpop.f32.mrf.mxu0 }
0x169b   :  { %v7017_v21 = vpop.f32.mrf.mxu0 }
0x169c   :  { %v6083_v21 = vld [vmem:[%s9275_s0 + $0xd8] sm:$0xff] }
0x169d   :  { %v8705_v60 = vpop.f32.mrf.mxu0 }
0x169f   :  { %v7020_v14 = vpop.f32.mrf.mxu0 }
0x16a0   :  { %v6082_v14 = vld [vmem:[%s9275_s0 + $0xd0] sm:$0xff] }
0x16a1   :  { %v3598_v23 = vpop.f32.mrf.mxu0 }
0x16a2   :  { %v3599_v33 = vadd.f32 %v6041_v18, %v3598_v23  ;;  %v6081_v23 = vld [vmem:[%s9275_s0 + $0xc8] sm:$0xff] }
0x16a3   :  { %v7048_v53 = vpop.f32.mrf.mxu0 }
0x16a4   :  { %v6073_v53 = vld [vmem:[%s9274_s9 + $0xd0] sm:$0xff] }
0x16a5   :  { %v3603_v16 = vpop.f32.mrf.mxu0 }
0x16a6   :  { %v3604_v12 = vadd.f32 %v6041_v18, %v3603_v16 }
0x16a7   :  { %v7051_v24 = vpop.f32.mrf.mxu0 }
0x16a8   :  { %v6072_v24 = vld [vmem:[%s9274_s9 + $0xc8] sm:$0xff] }
0x16a9   :  { %v3608_v26 = vpop.f32.mrf.mxu0 }
0x16aa   :  { %v3609_v27 = vadd.f32 %v6041_v18, %v3608_v26  ;;  %v6071_v26 = vld [vmem:[%s9274_s9 + $0xc0] sm:$0xff] }
0x16ab   :  { %v7054_v29 = vpop.f32.mrf.mxu0 }
0x16ac   :  { %7073 = vmatpush3.xpose.msk.msra.mxu0 %vm467_vm6, %v3609_v27 }
0x16ad   :  { %7074 = vmatprep.subr.mxu0 %v7537_v5 }
0x16b0   :  { %7075 = vmatpush3.xpose.msk.msra.mxu0 %vm467_vm6, %v3604_v12 }
0x16b1   :  { %7076 = vmatprep.subr.mxu0 %v7537_v5 }
0x16b4   :  { %7077 = vmatpush3.xpose.msk.msra.mxu0 %vm467_vm6, %v3599_v33 }
0x16b5   :  { %7102 = vmatprep.subr.mxu0 %v7537_v5 }
0x16b7   :  { %7079 = vmatmul.mubr.msk.f32.vlgmr.msra.gmra.mxu0 %vm467_vm6, %v3506_v34  ;;  %v6091_v34 = vld [vmem:[%s9279_s1 + $0xd0] sm:$0xff] }
0x16b8   :  { %7081 = vmatprep.mubr.msk.f32.mxu0 %vm7538_vm0, %v7537_v5  ;;  %7103 = vmatpush3.msra.mxu0 %v6064_v1 }
0x16b9   :  { %7124 = vmatprep.subr.mxu0 %v7537_v5 }
0x16bb   :  { %7082 = vmatmul.mubr.msk.f32.gmra.mxu0 %vm467_vm6, %v3511_v35 }
0x16bc   :  { %7084 = vmatprep.mubr.msk.f32.mxu0 %vm7538_vm0, %v7537_v5 }
0x16bf   :  { %7085 = vmatmul.mubr.msk.f32.gmra.mxu0 %vm467_vm6, %v3516_v38  ;;  %v6090_v38 = vld [vmem:[%s9279_s1 + $0xc8] sm:$0xff] }
0x16c0   :  { %7104 = vmatprep.mubr.msk.f32.mxu0 %vm7538_vm0, %v7537_v5 }
0x1777   :  { %v3789_v28 = vpop.f32.mrf.mxu0 }
0x1778   :  { %v3790_v19 = vadd.f32 %v8630_v17, %v3789_v28 }
0x1779   :  { %v7080_v59 = vpop.f32.mrf.mxu0 }
0x177a   :  { %v3803_v40 = vsel %vm566_vm8, %v3790_v19, -inf }
0x177b   :  { %3804 = vmax.xlane.f32.xlu1 %v3803_v40  ;;  %v3794_v8 = vpop.f32.mrf.mxu0 }
0x177c   :  { %v3795_v43 = vadd.f32 %v8637_v22, %v3794_v8 }
0x177d   :  { %v7083_v44 = vpop.f32.mrf.mxu0 }
0x177e   :  { %v3806_v36 = vsel %vm566_vm8, %v3795_v43, -inf }
0x177f   :  { %3807 = vmax.xlane.f32.xlu0 %v3806_v36  ;;  %v3799_v48 = vpop.f32.mrf.mxu0 }
0x1780   :  { %v3800_v39 = vadd.f32 %v8644_v3, %v3799_v48 }
0x1781   :  { %v7086_v61 = vpop.f32.mrf.mxu0 }
0x1782   :  { %v3809_v37 = vsel %vm573_vm9, %v3800_v39, -inf }
0x1783   :  { %3810 = vmax.xlane.f32.xlu1 %v3809_v37 }
0x1804   :  { %v3805_v42 = vpop.xlane.xlu1 %3804 }
0x1805   :  { %v3812_v45 = vsub.f32 %v3790_v19, %v3805_v42  ;;  %v6089_v19 = vld [vmem:[%s9279_s1 + $0xc0] sm:$0xff] }
0x1807   :  { %v3815_v47 = vmul.f32 1.442695, %v3812_v45 }
0x1808   :  { %v3808_v49 = vpop.xlane.xlu0 %3807 }
0x1809   :  { %7448 = vpow2.f32 %v3815_v47  ;;  %v3813_v50 = vsub.f32 %v3795_v43, %v3808_v49 }
0x180b   :  { %v3817_v41 = vmul.f32 1.442695, %v3813_v50 }
0x180c   :  { %v3811_v51 = vpop.xlane.xlu1 %3810 }
0x180d   :  { %7450 = vpow2.f32 %v3817_v41  ;;  %v3814_v52 = vsub.f32 %v3800_v39, %v3811_v51  ;;  %v6085_v39 = vld [vmem:[%s9234_s11 + $0x6] ss:$0 sm:$0xff] }
0x180f   :  { %v3819_v54 = vmul.f32 1.442695, %v3814_v52 }
0x1811   :  { %7452 = vpow2.f32 %v3819_v54 }
0x1816   :  { %v7449_v46 = vpop.eup %7448 }
0x1817   :  { %v3821_v56 = vsel %vm566_vm8, %v7449_v46, 0.0 }
0x1818   :  { %3822 = vadd.xlane.f32.xlu0 %v3821_v56 }
0x181a   :  { %v7451_v58 = vpop.eup %7450 }
0x181b   :  { %v3824_v62 = vsel %vm566_vm8, %v7451_v58, 0.0 }
0x181c   :  { %3825 = vadd.xlane.f32.xlu1 %v3824_v62 }
0x181e   :  { %v7453_v63 = vpop.eup %7452 }
0x181f   :  { %v3827_v0 = vsel %vm573_vm9, %v7453_v63, 0.0 }
0x1820   :  { %3828 = vadd.xlane.f32.xlu0 %v3827_v0 }
0x18a1   :  { %v3823_v2 = vpop.xlane.xlu0 %3822 }
0x18a2   :  { %7454 = vrcp.f32 %v3823_v2 }
0x18a5   :  { %v3826_v55 = vpop.xlane.xlu1 %3825 }
0x18a6   :  { %7456 = vrcp.f32 %v3826_v55 }
0x18a9   :  { %v3829_v4 = vpop.xlane.xlu0 %3828 }
0x18aa   :  { %7458 = vrcp.f32 %v3829_v4 }
0x18af   :  { %v7455_v6 = vpop.eup %7454 }
0x18b0   :  { %v3833_v7 = vmul.f32 %v7455_v6, %v7449_v46  ;;  %v6076_v46 = vld [vmem:[%s9233_s10 + $0x6] ss:$0 sm:$0xff] }
0x18b2   :  { %7094 = vmatmul.mubr.msk.f32.vlgmr.msra.gmra.mxu1 %vm566_vm8, %v3833_v7 }
0x18b3   :  { %v7457_v9 = vpop.eup %7456  ;;  %7096 = vmatprep.mubr.msk.f32.mxu1 %vm7538_vm0, %v7537_v5  ;;  %7114 = vmatpush3.msra.mxu1 %v6026_v57 }
0x18b4   :  { %v3834_v10 = vmul.f32 %v7457_v9, %v7451_v58  ;;  %7141 = vmatprep.subr.mxu1 %v7537_v5 }
0x18b6   :  { %7097 = vmatmul.mubr.msk.f32.gmra.mxu1 %vm566_vm8, %v3834_v10  ;;  %v6094_v10 = vld [vmem:[%s9235_s12 + $0x6] ss:$0 sm:$0xff] }
0x18b7   :  { %v7459_v11 = vpop.eup %7458  ;;  %7099 = vmatprep.mubr.msk.f32.mxu1 %vm7538_vm0, %v7537_v5 }
0x18b8   :  { %v3835_v15 = vmul.f32 %v7459_v11, %v7453_v63 }
0x18ba   :  { %7100 = vmatmul.mubr.msk.f32.gmra.mxu1 %vm566_vm8, %v3835_v15 }
0x18bb   :  { %7115 = vmatprep.mubr.msk.f32.mxu1 %vm7538_vm0, %v7537_v5 }
0x18be   :  { %7116 = vmatmul.mubr.msk.f32.vlgmr.msra.gmra.mxu1 %vm467_vm6, %v8701_v13  ;;  %v6080_v13 = vld [vmem:[%s9275_s0 + $0xc0] sm:$0xff] }
0x18bf   :  { %7118 = vmatprep.mubr.msk.f32.mxu1 %vm7538_vm0, %v7537_v5  ;;  %7142 = vmatpush3.msra.mxu1 %v6083_v21 }
0x18c0   :  { %7143 = vmatprep.subr.mxu1 %v7537_v5 }
0x18c1   :  { %7144 = vmatpush3.msra.mxu1 %v6082_v14 }
0x18c2   :  { %7119 = vmatmul.mubr.msk.f32.gmra.mxu1 %vm467_vm6, %v8703_v20  ;;  %7145 = vmatprep.subr.mxu1 %v7537_v5  ;;  %v6074_v20 = vld [vmem:[%s9274_s9 + $0xd8] sm:$0xff] }
0x18c3   :  { %7121 = vmatprep.mubr.msk.f32.mxu1 %vm7538_vm0, %v7537_v5  ;;  %7146 = vmatpush3.msra.mxu1 %v6081_v23 }
0x18c4   :  { %7147 = vmatprep.subr.mxu1 %v7537_v5 }
0x18c5   :  { %7148 = vmatpush3.msra.mxu1 %v6080_v13 }
0x18c6   :  { %7122 = vmatmul.mubr.msk.f32.gmra.mxu1 %vm467_vm6, %v8705_v60  ;;  %7175 = vmatprep.subr.mxu1 %v7537_v5 }
0x18c7   :  { %7149 = vmatprep.mubr.msk.f32.mxu1 %vm7538_vm0, %v7537_v5 }
0x18ca   :  { %7150 = vmatmul.mubr.msk.f32.vlgmr.msra.gmra.mxu1 %vm196_vm5, %v8485_v25 }
0x18cb   :  { %7152 = vmatprep.mubr.msk.f32.mxu1 %vm7538_vm0, %v7537_v5 }
0x18ce   :  { %7153 = vmatmul.mubr.msk.f32.gmra.mxu1 %vm196_vm5, %v8498_v30 }
0x18cf   :  { %7155 = vmatprep.mubr.msk.f32.mxu1 %vm7538_vm0, %v7537_v5 }
0x18d2   :  { %7156 = vmatmul.mubr.msk.f32.gmra.mxu1 %vm196_vm5, %v8512_v31 }
0x18d3   :  { %7181 = vmatprep.mubr.msk.f32.mxu1 %vm7538_vm0, %v7537_v5 }
0x1972   :  { %v3914_v60 = vpop.f32.mrf.mxu1 }
0x1973   :  { %7105 = vmatmul.mubr.msk.f32.vlgmr.msra.gmra.mxu0 %vm467_vm6, %v3914_v60 }
0x1974   :  { %v7095_v16 = vpop.f32.mrf.mxu1  ;;  %7107 = vmatprep.mubr.msk.f32.mxu0 %vm7538_vm0, %v7537_v5  ;;  %7125 = vmatpush3.msra.mxu0 %v6074_v20 }
0x1975   :  { %7126 = vmatprep.subr.mxu0 %v7537_v5 }
0x1976   :  { %v3919_v18 = vpop.f32.mrf.mxu1  ;;  %7127 = vmatpush3.msra.mxu0 %v6073_v53 }
0x1977   :  { %7108 = vmatmul.mubr.msk.f32.gmra.mxu0 %vm467_vm6, %v3919_v18  ;;  %7128 = vmatprep.subr.mxu0 %v7537_v5 }
0x1978   :  { %v7098_v27 = vpop.f32.mrf.mxu1  ;;  %7110 = vmatprep.mubr.msk.f32.mxu0 %vm7538_vm0, %v7537_v5  ;;  %7129 = vmatpush3.msra.mxu0 %v6072_v24 }
0x1979   :  { %7130 = vmatprep.subr.mxu0 %v7537_v5 }
0x197a   :  { %v3924_v29 = vpop.f32.mrf.mxu1  ;;  %7131 = vmatpush3.msra.mxu0 %v6071_v26 }
0x197b   :  { %7111 = vmatmul.mubr.msk.f32.gmra.mxu0 %vm467_vm6, %v3924_v29  ;;  %7158 = vmatprep.subr.mxu0 %v7537_v5 }
0x197c   :  { %v7101_v12 = vpop.f32.mrf.mxu1  ;;  %7132 = vmatprep.mubr.msk.f32.mxu0 %vm7538_vm0, %v7537_v5 }
0x197e   :  { %v8825_v33 = vpop.f32.mrf.mxu1 }
0x197f   :  { %7133 = vmatmul.mubr.msk.f32.vlgmr.msra.gmra.mxu0 %vm196_vm5, %v8485_v25 }
0x1980   :  { %v7117_v35 = vpop.f32.mrf.mxu1  ;;  %7135 = vmatprep.mubr.msk.f32.mxu0 %vm7538_vm0, %v7537_v5  ;;  %7159 = vmatpush3.msra.mxu0 %v6092_v32 }
0x1981   :  { %7160 = vmatprep.subr.mxu0 %v7537_v5 }
0x1982   :  { %v8838_v28 = vpop.f32.mrf.mxu1  ;;  %7161 = vmatpush3.msra.mxu0 %v6091_v34 }
0x1983   :  { %7136 = vmatmul.mubr.msk.f32.gmra.mxu0 %vm196_vm5, %v8498_v30  ;;  %7162 = vmatprep.subr.mxu0 %v7537_v5 }
0x1984   :  { %v7120_v59 = vpop.f32.mrf.mxu1  ;;  %7138 = vmatprep.mubr.msk.f32.mxu0 %vm7538_vm0, %v7537_v5  ;;  %7163 = vmatpush3.msra.mxu0 %v6090_v38 }
0x1985   :  { %7164 = vmatprep.subr.mxu0 %v7537_v5 }
0x1986   :  { %v8849_v40 = vpop.f32.mrf.mxu1  ;;  %7165 = vmatpush3.msra.mxu0 %v6089_v19 }
0x1987   :  { %7139 = vmatmul.mubr.msk.f32.gmra.mxu0 %vm196_vm5, %v8512_v31  ;;  %7190 = vmatprep.subr.mxu0 %v7537_v5 }
0x1988   :  { %v7123_v8 = vpop.f32.mrf.mxu1  ;;  %7166 = vmatprep.mubr.msk.f32.mxu0 %vm7538_vm0, %v7537_v5 }
0x198a   :  { %v4280_v43 = vpop.f32.mrf.mxu1 }
0x198b   :  { %7167 = vmatmul.mubr.msk.f32.vlgmr.msra.gmra.mxu0 %vm196_vm5, %v8485_v25  ;;  %v4281_v47 = vadd.f32 %v6085_v39, %v4280_v43 }
0x198c   :  { %v7151_v44 = vpop.f32.mrf.mxu1  ;;  %7169 = vmatprep.mubr.msk.f32.mxu0 %vm7538_vm0, %v7537_v5 }
0x198e   :  { %v4285_v36 = vpop.f32.mrf.mxu1 }
0x198f   :  { %7170 = vmatmul.mubr.msk.f32.gmra.mxu0 %vm196_vm5, %v8498_v30  ;;  %v4286_v45 = vadd.f32 %v6085_v39, %v4285_v36 }
0x1990   :  { %v7154_v48 = vpop.f32.mrf.mxu1  ;;  %7172 = vmatprep.mubr.msk.f32.mxu0 %vm7538_vm0, %v7537_v5 }
0x1992   :  { %v4290_v61 = vpop.f32.mrf.mxu1 }
0x1993   :  { %v4291_v37 = vadd.f32 %v6085_v39, %v4290_v61  ;;  %7173 = vmatmul.mubr.msk.f32.gmra.mxu0 %vm196_vm5, %v8512_v31 }
0x1994   :  { %v7157_v42 = vpop.f32.mrf.mxu1  ;;  %7196 = vmatprep.mubr.msk.f32.mxu0 %vm7538_vm0, %v7537_v5 }
0x1995   :  { %7176 = vmatpush3.xpose.msk.msra.mxu1 %vm467_vm6, %v4291_v37 }
0x1996   :  { %7177 = vmatprep.subr.mxu1 %v7537_v5 }
0x1999   :  { %7178 = vmatpush3.xpose.msk.msra.mxu1 %vm467_vm6, %v4286_v45 }
0x199a   :  { %7179 = vmatprep.subr.mxu1 %v7537_v5 }
0x199d   :  { %7180 = vmatpush3.xpose.msk.msra.mxu1 %vm467_vm6, %v4281_v47  ;;  %v6108_v47 = vld [vmem:[%s9236_s13 + $0x30] sm:$0xff] }
0x199e   :  { %7205 = vmatprep.subr.mxu1 %v7537_v5 }
0x1a33   :  { %v8877_v49 = vpop.f32.mrf.mxu0 }
0x1a35   :  { %v7106_v50 = vpop.f32.mrf.mxu0 }
0x1a37   :  { %v8879_v41 = vpop.f32.mrf.mxu0 }
0x1a39   :  { %v7109_v51 = vpop.f32.mrf.mxu0 }
0x1a3b   :  { %v8881_v52 = vpop.f32.mrf.mxu0 }
0x1a3d   :  { %v7112_v54 = vpop.f32.mrf.mxu0 }
0x1a3f   :  { %v4187_v56 = vpop.f32.mrf.mxu0 }
0x1a40   :  { %v4188_v58 = vadd.f32 %v6076_v46, %v4187_v56 }
0x1a41   :  { %v7134_v62 = vpop.f32.mrf.mxu0 }
0x1a42   :  { %7182 = vmatmul.mubr.msk.f32.vlgmr.msra.gmra.mxu1 %vm467_vm6, %v4188_v58  ;;  %v6115_v58 = vld [vmem:[%s9274_s9 + $0xf8] sm:$0xff]  ;;  %v6114_v62 = vld [vmem:[%s9274_s9 + $0xf0] sm:$0xff] }
0x1a43   :  { %v4192_v63 = vpop.f32.mrf.mxu0  ;;  %7184 = vmatprep.mubr.msk.f32.mxu1 %vm7538_vm0, %v7537_v5  ;;  %7206 = vmatpush3.msra.mxu1 %v6108_v47 }
0x1a44   :  { %v4193_v0 = vadd.f32 %v6076_v46, %v4192_v63  ;;  %7233 = vmatprep.subr.mxu1 %v7537_v5 }
0x1a45   :  { %v7137_v1 = vpop.f32.mrf.mxu0 }
0x1a46   :  { %7185 = vmatmul.mubr.msk.f32.gmra.mxu1 %vm467_vm6, %v4193_v0  ;;  %v6113_v1 = vld [vmem:[%s9274_s9 + $0xe8] sm:$0xff] }
0x1a47   :  { %v4197_v2 = vpop.f32.mrf.mxu0  ;;  %7187 = vmatprep.mubr.msk.f32.mxu1 %vm7538_vm0, %v7537_v5 }
0x1a48   :  { %v4198_v55 = vadd.f32 %v6076_v46, %v4197_v2  ;;  %v6112_v2 = vld [vmem:[%s9274_s9 + $0xe0] sm:$0xff]  ;;  %s9284_s9 = sld [smem:[#allocation20_spill]] }
0x1a49   :  { %v7140_v4 = vpop.f32.mrf.mxu0 }
0x1a4a   :  { %7188 = vmatmul.mubr.msk.f32.gmra.mxu1 %vm467_vm6, %v4198_v55 }
0x1a4b   :  { %v4373_v6 = vpop.f32.mrf.mxu0  ;;  %7207 = vmatprep.mubr.msk.f32.mxu1 %vm7538_vm0, %v7537_v5 }
0x1a4c   :  { %v4374_v23 = vadd.f32 %v6094_v10, %v4373_v6  ;;  %v6133_v6 = vld [vmem:[%s9279_s1 + $0xf8] sm:$0xff] }
0x1a4d   :  { %v7168_v7 = vpop.f32.mrf.mxu0 }
0x1a4e   :  { %v6132_v7 = vld [vmem:[%s9279_s1 + $0xf0] sm:$0xff] }
0x1a4f   :  { %v4378_v57 = vpop.f32.mrf.mxu0 }
0x1a50   :  { %v4379_v14 = vadd.f32 %v6094_v10, %v4378_v57  ;;  %v6131_v57 = vld [vmem:[%s9279_s1 + $0xe8] sm:$0xff] }
0x1a51   :  { %v7171_v9 = vpop.f32.mrf.mxu0 }
0x1a52   :  { %v6130_v9 = vld [vmem:[%s9279_s1 + $0xe0] sm:$0xff] }
0x1a53   :  { %v4383_v11 = vpop.f32.mrf.mxu0 }
0x1a54   :  { %v4384_v15 = vadd.f32 %v6094_v10, %v4383_v11  ;;  %v6124_v10 = vld [vmem:[%s9275_s0 + $0xf8] sm:$0xff] }
0x1a55   :  { %v7174_v21 = vpop.f32.mrf.mxu0 }
0x1a56   :  { %7191 = vmatpush3.msk.msra.mxu0 %vm610_vm7, %v4384_v15  ;;  %v6123_v15 = vld [vmem:[%s9275_s0 + $0xf0] sm:$0xff] }
0x1a57   :  { %7192 = vmatprep.subr.mxu0 %v7537_v5 }
0x1a58   :  { %7193 = vmatpush3.msra.mxu0 %v4379_v14  ;;  %v6122_v14 = vld [vmem:[%s9275_s0 + $0xe8] sm:$0xff] }
0x1a59   :  { %7194 = vmatprep.subr.mxu0 %v7537_v5 }
0x1a5a   :  { %7195 = vmatpush3.msra.mxu0 %v4374_v23 }
0x1a5b   :  { %7216 = vmatprep.subr.mxu0 %v7537_v5 }
0x1b02   :  { %v4471_v13 = vpop.f32.mrf.mxu1 }
0x1b03   :  { %v4472_v20 = vadd.f32 %v8630_v17, %v4471_v13  ;;  %v6121_v13 = vld [vmem:[%s9275_s0 + $0xe0] sm:$0xff] }
0x1b04   :  { %v7183_v60 = vpop.f32.mrf.mxu1 }
0x1b05   :  { %v4485_v53 = vsel %vm566_vm8, %v4472_v20, -inf }
0x1b06   :  { %4486 = vmax.xlane.f32.xlu1 %v4485_v53  ;;  %v4476_v16 = vpop.f32.mrf.mxu1 }
0x1b07   :  { %v4477_v24 = vadd.f32 %v8637_v22, %v4476_v16 }
0x1b08   :  { %v7186_v18 = vpop.f32.mrf.mxu1 }
0x1b09   :  { %v4488_v26 = vsel %vm566_vm8, %v4477_v24, -inf }
0x1b0a   :  { %4489 = vmax.xlane.f32.xlu0 %v4488_v26  ;;  %v4481_v27 = vpop.f32.mrf.mxu1 }
0x1b0b   :  { %v4482_v29 = vadd.f32 %v8644_v3, %v4481_v27 }
0x1b0c   :  { %v7189_v12 = vpop.f32.mrf.mxu1 }
0x1b0d   :  { %v4491_v32 = vsel %vm573_vm9, %v4482_v29, -inf }
0x1b0e   :  { %4492 = vmax.xlane.f32.xlu1 %v4491_v32 }
0x1b8f   :  { %v4487_v34 = vpop.xlane.xlu1 %4486 }
0x1b90   :  { %v4494_v35 = vsub.f32 %v4472_v20, %v4487_v34 }
0x1b92   :  { %v4497_v38 = vmul.f32 1.442695, %v4494_v35 }
0x1b93   :  { %v4490_v19 = vpop.xlane.xlu0 %4489 }
0x1b94   :  { %7460 = vpow2.f32 %v4497_v38  ;;  %v4495_v59 = vsub.f32 %v4477_v24, %v4490_v19  ;;  %v6135_v38 = vld [vmem:[%s9235_s12 + $0x7] ss:$0 sm:$0xff] }
0x1b96   :  { %v4499_v8 = vmul.f32 1.442695, %v4495_v59 }
0x1b97   :  { %v4493_v43 = vpop.xlane.xlu1 %4492 }
0x1b98   :  { %7462 = vpow2.f32 %v4499_v8  ;;  %v4496_v44 = vsub.f32 %v4482_v29, %v4493_v43 }
0x1b9a   :  { %v4501_v36 = vmul.f32 1.442695, %v4496_v44 }
0x1b9c   :  { %7464 = vpow2.f32 %v4501_v36  ;;  %v4095_v36 = vadd.f32 %v8825_v33, %v8877_v49 }
0x1ba1   :  { %v7461_v48 = vpop.eup %7460 }
0x1ba2   :  { %v4503_v39 = vsel %vm566_vm8, %v7461_v48, 0.0 }
0x1ba3   :  { %4504 = vadd.xlane.f32.xlu0 %v4503_v39 }
0x1ba5   :  { %v7463_v61 = vpop.eup %7462 }
0x1ba6   :  { %v4506_v37 = vsel %vm566_vm8, %v7463_v61, 0.0 }
0x1ba7   :  { %4507 = vadd.xlane.f32.xlu1 %v4506_v37  ;;  %v4100_v37 = vadd.f32 %v8838_v28, %v8879_v41 }
0x1ba9   :  { %v7465_v42 = vpop.eup %7464 }
0x1baa   :  { %v4509_v45 = vsel %vm573_vm9, %v7465_v42, 0.0 }
0x1bab   :  { %4510 = vadd.xlane.f32.xlu0 %v4509_v45 }
0x1c2c   :  { %v4505_v50 = vpop.xlane.xlu0 %4504 }
0x1c2d   :  { %7466 = vrcp.f32 %v4505_v50  ;;  %v4105_v50 = vadd.f32 %v8849_v40, %v8881_v52  ;;  %v6117_v52 = vld [vmem:[%s9233_s10 + $0x7] ss:$0 sm:$0xff]  ;;  %s7539_s10 = smov [#allocation4]  }
0x1c30   :  { %v4508_v51 = vpop.xlane.xlu1 %4507 }
0x1c31   :  { %7468 = vrcp.f32 %v4508_v51 }
0x1c34   :  { %v4511_v54 = vpop.xlane.xlu0 %4510 }
0x1c35   :  { %7470 = vrcp.f32 %v4511_v54 }
0x1c3a   :  { %v7467_v46 = vpop.eup %7466 }
0x1c3b   :  { %v4515_v56 = vmul.f32 %v7467_v46, %v7461_v48 }
0x1c3d   :  { %7197 = vmatmul.mubr.msk.f32.vlgmr.msra.gmra.mxu0 %vm566_vm8, %v4515_v56 }
0x1c3e   :  { %v7469_v63 = vpop.eup %7468  ;;  %7199 = vmatprep.mubr.msk.f32.mxu0 %vm7538_vm0, %v7537_v5  ;;  %7217 = vmatpush3.msra.mxu0 %v6115_v58 }
0x1c3f   :  { %v4516_v0 = vmul.f32 %v7469_v63, %v7463_v61  ;;  %7218 = vmatprep.subr.mxu0 %v7537_v5 }
0x1c40   :  { %7219 = vmatpush3.msra.mxu0 %v6114_v62  ;;  %v6126_v62 = vld [vmem:[%s9234_s11 + $0x7] ss:$0 sm:$0xff]  ;;  %s5818_s11 = sshll.u32 %s7539_s10, 4  ;;  %s5819_s11 = int_to_ptr.vmem [resolvable:$true] %s5818_s11 }
0x1c41   :  { %7200 = vmatmul.mubr.msk.f32.gmra.mxu0 %vm566_vm8, %v4516_v0  ;;  %7220 = vmatprep.subr.mxu0 %v7537_v5  ;;  %p7516_p12 = scmp.lt.s32.totalorder %s5819_s11, %s5819_s11 }
0x1c42   :  { %v7471_v55 = vpop.eup %7470  ;;  %7202 = vmatprep.mubr.msk.f32.mxu0 %vm7538_vm0, %v7537_v5  ;;  %7221 = vmatpush3.msra.mxu0 %v6113_v1 }
0x1c43   :  { %v4517_v4 = vmul.f32 %v7471_v55, %v7465_v42  ;;  %7222 = vmatprep.subr.mxu0 %v7537_v5 }
0x1c44   :  { %7223 = vmatpush3.msra.mxu0 %v6112_v2 }
0x1c45   :  { %7203 = vmatmul.mubr.msk.f32.gmra.mxu0 %vm566_vm8, %v4517_v4  ;;  %7250 = vmatprep.subr.mxu0 %v7537_v5 }
0x1c46   :  { %7224 = vmatprep.mubr.msk.f32.mxu0 %vm7538_vm0, %v7537_v5 }
0x1c49   :  { %7225 = vmatmul.mubr.msk.f32.vlgmr.msra.gmra.mxu0 %vm196_vm5, %v8485_v25 }
0x1c4a   :  { %7227 = vmatprep.mubr.msk.f32.mxu0 %vm7538_vm0, %v7537_v5  ;;  %7251 = vmatpush3.msra.mxu0 %v6133_v6 }
0x1c4b   :  { %7252 = vmatprep.subr.mxu0 %v7537_v5 }
0x1c4c   :  { %7253 = vmatpush3.msra.mxu0 %v6132_v7 }
0x1c4d   :  { %7228 = vmatmul.mubr.msk.f32.gmra.mxu0 %vm196_vm5, %v8498_v30  ;;  %7254 = vmatprep.subr.mxu0 %v7537_v5 }
0x1c4e   :  { %7230 = vmatprep.mubr.msk.f32.mxu0 %vm7538_vm0, %v7537_v5  ;;  %7255 = vmatpush3.msra.mxu0 %v6131_v57 }
0x1c4f   :  { %7256 = vmatprep.subr.mxu0 %v7537_v5 }
0x1c50   :  { %7257 = vmatpush3.msra.mxu0 %v6130_v9 }
0x1c51   :  { %7231 = vmatmul.mubr.msk.f32.gmra.mxu0 %vm196_vm5, %v8512_v31  ;;  %7282 = vmatprep.subr.mxu0 %v7537_v5 }
0x1c52   :  { %7258 = vmatprep.mubr.msk.f32.mxu0 %vm7538_vm0, %v7537_v5 }
0x1c55   :  { %7259 = vmatmul.mubr.msk.f32.vlgmr.msra.gmra.mxu0 %vm196_vm5, %v8485_v25 }
0x1c56   :  { %7261 = vmatprep.mubr.msk.f32.mxu0 %vm7538_vm0, %v7537_v5 }
0x1c59   :  { %7262 = vmatmul.mubr.msk.f32.gmra.mxu0 %vm196_vm5, %v8498_v30 }
0x1c5a   :  { %7264 = vmatprep.mubr.msk.f32.mxu0 %vm7538_vm0, %v7537_v5 }
0x1c5d   :  { %7265 = vmatmul.mubr.msk.f32.gmra.mxu0 %vm196_vm5, %v8512_v31 }
0x1c5e   :  { %7288 = vmatprep.mubr.msk.f32.mxu0 %vm7538_vm0, %v7537_v5 }
0x1cfd   :  { %v4596_v11 = vpop.f32.mrf.mxu0 }
0x1cfe   :  { %7208 = vmatmul.mubr.msk.f32.vlgmr.msra.gmra.mxu1 %vm467_vm6, %v4596_v11 }
0x1cff   :  { %v7198_v21 = vpop.f32.mrf.mxu0  ;;  %7210 = vmatprep.mubr.msk.f32.mxu1 %vm7538_vm0, %v7537_v5  ;;  %7234 = vmatpush3.msra.mxu1 %v6124_v10 }
0x1d00   :  { %7235 = vmatprep.subr.mxu1 %v7537_v5 }
0x1d01   :  { %v4601_v23 = vpop.f32.mrf.mxu0  ;;  %7236 = vmatpush3.msra.mxu1 %v6123_v15 }
0x1d02   :  { %7211 = vmatmul.mubr.msk.f32.gmra.mxu1 %vm467_vm6, %v4601_v23  ;;  %7237 = vmatprep.subr.mxu1 %v7537_v5 }
0x1d03   :  { %v7201_v20 = vpop.f32.mrf.mxu0  ;;  %7213 = vmatprep.mubr.msk.f32.mxu1 %vm7538_vm0, %v7537_v5  ;;  %7238 = vmatpush3.msra.mxu1 %v6122_v14 }
0x1d04   :  { %7239 = vmatprep.subr.mxu1 %v7537_v5 }
0x1d05   :  { %v4606_v60 = vpop.f32.mrf.mxu0  ;;  %7240 = vmatpush3.msra.mxu1 %v6121_v13 }
0x1d06   :  { %7214 = vmatmul.mubr.msk.f32.gmra.mxu1 %vm467_vm6, %v4606_v60  ;;  %7267 = vmatprep.subr.mxu1 %v7537_v5 }
0x1d07   :  { %v7204_v53 = vpop.f32.mrf.mxu0  ;;  %7241 = vmatprep.mubr.msk.f32.mxu1 %vm7538_vm0, %v7537_v5 }
0x1d09   :  { %v4783_v16 = vpop.f32.mrf.mxu0 }
0x1d0a   :  { %7242 = vmatmul.mubr.msk.f32.vlgmr.msra.gmra.mxu1 %vm196_vm5, %v8485_v25  ;;  %v4784_v1 = vadd.f32 %v6117_v52, %v4783_v16 }
0x1d0b   :  { %v7226_v24 = vpop.f32.mrf.mxu0  ;;  %7244 = vmatprep.mubr.msk.f32.mxu1 %vm7538_vm0, %v7537_v5 }
0x1d0d   :  { %v4788_v18 = vpop.f32.mrf.mxu0 }
0x1d0e   :  { %7245 = vmatmul.mubr.msk.f32.gmra.mxu1 %vm196_vm5, %v8498_v30  ;;  %v4789_v2 = vadd.f32 %v6117_v52, %v4788_v18 }
0x1d0f   :  { %v7229_v26 = vpop.f32.mrf.mxu0  ;;  %7247 = vmatprep.mubr.msk.f32.mxu1 %vm7538_vm0, %v7537_v5 }
0x1d11   :  { %v4793_v27 = vpop.f32.mrf.mxu0 }
0x1d12   :  { %7248 = vmatmul.mubr.msk.f32.gmra.mxu1 %vm196_vm5, %v8512_v31  ;;  %v4794_v55 = vadd.f32 %v6117_v52, %v4793_v27 }
0x1d13   :  { %v7232_v29 = vpop.f32.mrf.mxu0  ;;  %7273 = vmatprep.mubr.msk.f32.mxu1 %vm7538_vm0, %v7537_v5 }
0x1d15   :  { %v4969_v12 = vpop.f32.mrf.mxu0 }
0x1d16   :  { %v4970_v44 = vadd.f32 %v6135_v38, %v4969_v12 }
0x1d17   :  { %v7260_v32 = vpop.f32.mrf.mxu0 }
0x1d19   :  { %v4974_v34 = vpop.f32.mrf.mxu0 }
0x1d1a   :  { %v4975_v43 = vadd.f32 %v6135_v38, %v4974_v34 }
0x1d1b   :  { %v7263_v35 = vpop.f32.mrf.mxu0 }
0x1d1c   :  { %v6149_v35 = vld [vmem:[%s9236_s13 + $0x38] sm:$0xff] }
0x1d1d   :  { %v4979_v19 = vpop.f32.mrf.mxu0 }
0x1d1e   :  { %v4980_v59 = vadd.f32 %v6135_v38, %v4979_v19 }
0x1d1f   :  { %v7266_v8 = vpop.f32.mrf.mxu0 }
0x1d20   :  { %7283 = vmatpush3.msk.msra.mxu0 %vm610_vm7, %v4980_v59 }
0x1d21   :  { %7284 = vmatprep.subr.mxu0 %v7537_v5 }
0x1d22   :  { %7285 = vmatpush3.msra.mxu0 %v4975_v43 }
0x1d23   :  { %7286 = vmatprep.subr.mxu0 %v7537_v5 }
0x1d24   :  { %7287 = vmatpush3.msra.mxu0 %v4970_v44 }
0x1d25   :  { %7308 = vmatprep.subr.mxu0 %v7537_v5 }
0x1dbe   :  { %v4687_v48 = vpop.f32.mrf.mxu1 }
0x1dbf   :  { %v9026_v39 = vadd.f32 %v4687_v48, %v4095_v36 }
0x1dc0   :  { %v7209_v61 = vpop.f32.mrf.mxu1 }
0x1dc2   :  { %v4692_v42 = vpop.f32.mrf.mxu1 }
0x1dc3   :  { %v9030_v45 = vadd.f32 %v4692_v42, %v4100_v37 }
0x1dc4   :  { %v7212_v47 = vpop.f32.mrf.mxu1 }
0x1dc6   :  { %v4697_v51 = vpop.f32.mrf.mxu1 }
0x1dc7   :  { %v9034_v54 = vadd.f32 %v4697_v51, %v4105_v50 }
0x1dc8   :  { %v7215_v46 = vpop.f32.mrf.mxu1 }
0x1dca   :  { %v4876_v56 = vpop.f32.mrf.mxu1 }
0x1dcb   :  { %v4877_v0 = vadd.f32 %v6126_v62, %v4876_v56 }
0x1dcc   :  { %v7243_v33 = vpop.f32.mrf.mxu1 }
0x1dcd   :  { %v6154_v33 = vld [vmem:[%s9237_s14 + $0x1] ss:$0 sm:$0xff] }
0x1dce   :  { %v4881_v49 = vpop.f32.mrf.mxu1 }
0x1dcf   :  { %v4882_v40 = vadd.f32 %v6126_v62, %v4881_v49 }
0x1dd0   :  { %v7246_v58 = vpop.f32.mrf.mxu1 }
0x1dd2   :  { %v4886_v28 = vpop.f32.mrf.mxu1 }
0x1dd3   :  { %v4887_v41 = vadd.f32 %v6126_v62, %v4886_v28 }
0x1dd4   :  { %v7249_v63 = vpop.f32.mrf.mxu1 }
0x1dd5   :  { %7268 = vmatpush3.xpose.msk.msra.mxu1 %vm467_vm6, %v4887_v41 }
0x1dd6   :  { %7269 = vmatprep.subr.mxu1 %v7537_v5 }
0x1dd9   :  { %7270 = vmatpush3.xpose.msk.msra.mxu1 %vm467_vm6, %v4882_v40 }
0x1dda   :  { %7271 = vmatprep.subr.mxu1 %v7537_v5 }
0x1ddd   :  { %7272 = vmatpush3.xpose.msk.msra.mxu1 %vm467_vm6, %v4877_v0 }
0x1dde   :  { %7297 = vmatprep.subr.mxu1 %v7537_v5 }
0x1de0   :  { %7274 = vmatmul.mubr.msk.f32.vlgmr.msra.gmra.mxu1 %vm467_vm6, %v4784_v1 }
0x1de1   :  { %7276 = vmatprep.mubr.msk.f32.mxu1 %vm7538_vm0, %v7537_v5  ;;  %7298 = vmatpush3.msra.mxu1 %v6149_v35 }
0x1de2   :  { %7325 = vmatprep.subr.mxu1 %v7537_v5 }
0x1de4   :  { %7277 = vmatmul.mubr.msk.f32.gmra.mxu1 %vm467_vm6, %v4789_v2 }
0x1de5   :  { %7279 = vmatprep.mubr.msk.f32.mxu1 %vm7538_vm0, %v7537_v5 }
0x1de8   :  { %7280 = vmatmul.mubr.msk.f32.gmra.mxu1 %vm467_vm6, %v4794_v55 }
0x1de9   :  { %7299 = vmatprep.mubr.msk.f32.mxu1 %vm7538_vm0, %v7537_v5 }
0x1ea0   :  { %v5067_v4 = vpop.f32.mrf.mxu1 }
0x1ea1   :  { %v5068_v6 = vadd.f32 %v8630_v17, %v5067_v4 }
0x1ea2   :  { %v7275_v7 = vpop.f32.mrf.mxu1 }
0x1ea3   :  { %v5081_v57 = vsel %vm566_vm8, %v5068_v6, -inf }
0x1ea4   :  { %5082 = vmax.xlane.f32.xlu1 %v5081_v57  ;;  %v5072_v9 = vpop.f32.mrf.mxu1 }
0x1ea5   :  { %v5073_v10 = vadd.f32 %v8637_v22, %v5072_v9 }
0x1ea6   :  { %v7278_v11 = vpop.f32.mrf.mxu1 }
0x1ea7   :  { %v5084_v15 = vsel %vm566_vm8, %v5073_v10, -inf }
0x1ea8   :  { %5085 = vmax.xlane.f32.xlu0 %v5084_v15  ;;  %v5077_v21 = vpop.f32.mrf.mxu1 }
0x1ea9   :  { %v5078_v14 = vadd.f32 %v8644_v3, %v5077_v21 }
0x1eaa   :  { %v7281_v23 = vpop.f32.mrf.mxu1 }
0x1eab   :  { %v5087_v13 = vsel %vm573_vm9, %v5078_v14, -inf }
0x1eac   :  { %5088 = vmax.xlane.f32.xlu1 %v5087_v13 }
0x1f2d   :  { %v5083_v20 = vpop.xlane.xlu1 %5082 }
0x1f2e   :  { %v5090_v17 = vsub.f32 %v5068_v6, %v5083_v20 }
0x1f30   :  { %v5093_v60 = vmul.f32 1.442695, %v5090_v17 }
0x1f31   :  { %v5086_v53 = vpop.xlane.xlu0 %5085 }
0x1f32   :  { %7472 = vpow2.f32 %v5093_v60  ;;  %v5091_v16 = vsub.f32 %v5073_v10, %v5086_v53  ;;  %v6162_v60 = vld [vmem:[%s9242_s19 + $0x38] sm:$0xff]  ;;  %v6161_v53 = vld [vmem:[%s9242_s19 + $0x30] sm:$0xff] }
0x1f34   :  { %v5095_v24 = vmul.f32 1.442695, %v5091_v16  ;;  %v6160_v16 = vld [vmem:[%s9242_s19 + $0x28] sm:$0xff] }
0x1f35   :  { %v5089_v18 = vpop.xlane.xlu1 %5088 }
0x1f36   :  { %7474 = vpow2.f32 %v5095_v24  ;;  %v5092_v22 = vsub.f32 %v5078_v14, %v5089_v18  ;;  %v6159_v24 = vld [vmem:[%s9242_s19 + $0x20] sm:$0xff]  ;;  %v6175_v18 = vld [vmem:[%s9244_s21 + $0x78] sm:$0xff] }
0x1f38   :  { %v5097_v26 = vmul.f32 1.442695, %v5092_v22  ;;  %v6174_v22 = vld [vmem:[%s9244_s21 + $0x70] sm:$0xff] }
0x1f3a   :  { %7476 = vpow2.f32 %v5097_v26  ;;  %v6173_v26 = vld [vmem:[%s9244_s21 + $0x68] sm:$0xff] }
0x1f3f   :  { %v7473_v27 = vpop.eup %7472 }
0x1f40   :  { %v5099_v29 = vsel %vm566_vm8, %v7473_v27, 0.0 }
0x1f41   :  { %5100 = vadd.xlane.f32.xlu0 %v5099_v29  ;;  %v6171_v29 = vld [vmem:[%s9244_s21 + $0x58] sm:$0xff] }
0x1f43   :  { %v7475_v3 = vpop.eup %7474 }
0x1f44   :  { %v5102_v12 = vsel %vm566_vm8, %v7475_v3, 0.0 }
0x1f45   :  { %5103 = vadd.xlane.f32.xlu1 %v5102_v12 }
0x1f47   :  { %v7477_v32 = vpop.eup %7476 }
0x1f48   :  { %v5105_v34 = vsel %vm573_vm9, %v7477_v32, 0.0 }
0x1f49   :  { %5106 = vadd.xlane.f32.xlu0 %v5105_v34 }
0x1fca   :  { %v5101_v38 = vpop.xlane.xlu0 %5100 }
0x1fcb   :  { %7478 = vrcp.f32 %v5101_v38 }
0x1fce   :  { %v5104_v19 = vpop.xlane.xlu1 %5103 }
0x1fcf   :  { %7480 = vrcp.f32 %v5104_v19 }
0x1fd2   :  { %v5107_v59 = vpop.xlane.xlu0 %5106 }
0x1fd3   :  { %7482 = vrcp.f32 %v5107_v59 }
0x1fd8   :  { %v7479_v8 = vpop.eup %7478 }
0x1fd9   :  { %v5111_v43 = vmul.f32 %v7479_v8, %v7473_v27  ;;  %v6172_v27 = vld [vmem:[%s9244_s21 + $0x60] sm:$0xff] }
0x1fdb   :  { %7289 = vmatmul.mubr.msk.f32.vlgmr.msra.gmra.mxu0 %vm566_vm8, %v5111_v43 }
0x1fdc   :  { %v7481_v44 = vpop.eup %7480  ;;  %7291 = vmatprep.mubr.msk.f32.mxu0 %vm7538_vm0, %v7537_v5  ;;  %7309 = vmatpush3.msra.mxu0 %v6162_v60 }
0x1fdd   :  { %v5112_v36 = vmul.f32 %v7481_v44, %v7475_v3  ;;  %7310 = vmatprep.subr.mxu0 %v7537_v5  ;;  %v6157_v44 = vld [vmem:[%s9238_s15 + $0x1] ss:$0 sm:$0xff]  ;;  %s7511_s15 = scalar_lea.vmem %s5819_s11, 32 }
0x1fde   :  { %7311 = vmatpush3.msra.mxu0 %v6161_v53  ;;  %p7512_p11 = scmp.ne.s32.totalorder %s5819_s11, %s7511_s15  ;;  %p7517_p13 = scmp.lt.s32.totalorder %s7511_s15, %s7511_s15 }
0x1fdf   :  { %7292 = vmatmul.mubr.msk.f32.gmra.mxu0 %vm566_vm8, %v5112_v36  ;;  %7312 = vmatprep.subr.mxu0 %v7537_v5 }
0x1fe0   :  { %v7483_v48 = vpop.eup %7482  ;;  %7294 = vmatprep.mubr.msk.f32.mxu0 %vm7538_vm0, %v7537_v5  ;;  %7313 = vmatpush3.msra.mxu0 %v6160_v16  ;;  %p7518_p0 = por %p7517_p13, %p7516_p12 }
0x1fe1   :  { %v5113_v61 = vmul.f32 %v7483_v48, %v7477_v32  ;;  %7314 = vmatprep.subr.mxu0 %v7537_v5  ;;  %v6158_v48 = vld [vmem:[%s9239_s16 + $0x1] ss:$0 sm:$0xff] }
0x1fe2   :  { %7315 = vmatpush3.msra.mxu0 %v6159_v24  ;;  %p7519_p1 = pnand %p7518_p0, %p7512_p11 }
0x1fe3   :  { %7295 = vmatmul.mubr.msk.f32.gmra.mxu0 %vm566_vm8, %v5113_v61  ;;  %7350 = vmatprep.subr.mxu0 %v7537_v5 }
0x1fe4   :  { %7316 = vmatprep.mubr.msk.f32.mxu0 %vm7538_vm0, %v7537_v5 }
0x209b   :  { %v5192_v37 = vpop.f32.mrf.mxu0 }
0x209c   :  { %7300 = vmatmul.mubr.msk.f32.vlgmr.msra.gmra.mxu1 %vm467_vm6, %v5192_v37 }
0x209d   :  { %v7290_v42 = vpop.f32.mrf.mxu0  ;;  %7302 = vmatprep.mubr.msk.f32.mxu1 %vm7538_vm0, %v7537_v5  ;;  %7326 = vmatpush3.msra.mxu1 %v6175_v18 }
0x209e   :  { %7327 = vmatprep.subr.mxu1 %v7537_v5 }
0x209f   :  { %v5197_v47 = vpop.f32.mrf.mxu0  ;;  %7328 = vmatpush3.msra.mxu1 %v6174_v22 }
0x20a0   :  { %7303 = vmatmul.mubr.msk.f32.gmra.mxu1 %vm467_vm6, %v5197_v47  ;;  %7329 = vmatprep.subr.mxu1 %v7537_v5 }
0x20a1   :  { %v7293_v50 = vpop.f32.mrf.mxu0  ;;  %7305 = vmatprep.mubr.msk.f32.mxu1 %vm7538_vm0, %v7537_v5  ;;  %7330 = vmatpush3.msra.mxu1 %v6173_v26 }
0x20a2   :  { %7331 = vmatprep.subr.mxu1 %v7537_v5 }
0x20a3   :  { %v5202_v51 = vpop.f32.mrf.mxu0  ;;  %7332 = vmatpush3.msra.mxu1 %v6172_v27 }
0x20a4   :  { %7306 = vmatmul.mubr.msk.f32.gmra.mxu1 %vm467_vm6, %v5202_v51  ;;  %7333 = vmatprep.subr.mxu1 %v7537_v5 }
0x20a5   :  { %v7296_v46 = vpop.f32.mrf.mxu0  ;;  %7341 = vmatprep.mubr.msk.f32.mxu1 %vm7538_vm0, %v7537_v5  ;;  %7334 = vmatpush3.msra.mxu1 %v6171_v29 }
0x20a6   :  { %7335 = vmatprep.subr.mxu1 %v7537_v5 }
0x215c   :  { %v5283_v56 = vpop.f32.mrf.mxu1 }
0x215d   :  { %v5297_v49 = vadd.f32 %v5283_v56, %v9026_v39 }
0x215e   :  { %v7301_v58 = vpop.f32.mrf.mxu1 }
0x215f   :  { %v5308_v62 = vadd.f32 %v6154_v33, %v5297_v49  ;;  %v6170_v58 = vld [vmem:[%s9244_s21 + $0x50] sm:$0xff] }
0x2160   :  { %v5288_v28 = vpop.f32.mrf.mxu1  ;;  %7336 = vmatpush3.msra.mxu1 %v6170_v58 }
0x2161   :  { %v5298_v41 = vadd.f32 %v5288_v28, %v9030_v45  ;;  %v5311_v63 = vadd.f32 %v5308_v62, %v8485_v25  ;;  %7337 = vmatprep.subr.mxu1 %v7537_v5  ;;  %v6169_v62 = vld [vmem:[%s9244_s21 + $0x48] sm:$0xff]  ;;  %v6168_v28 = vld [vmem:[%s9244_s21 + $0x40] sm:$0xff] }
0x2162   :  { %v7304_v40 = vpop.f32.mrf.mxu1  ;;  %7338 = vmatpush3.msra.mxu1 %v6169_v62  ;;  %v6184_v62 = vld [vmem:[%s9281_s2 + $0x1] ss:$0 sm:$0xff] }
0x2163   :  { %v5309_v52 = vadd.f32 %v6154_v33, %v5298_v41  ;;  %v5318_v0 = vsel %vm196_vm5, %v5311_v63, 0.0  ;;  %7339 = vmatprep.subr.mxu1 %v7537_v5  ;;  %v6164_v41 = vld [vmem:[%s9243_s20 + $0x1] ss:$0 sm:$0xff] }
0x2164   :  { %5319 = vadd.xlane.f32.xlu1 %v5318_v0  ;;  %v5293_v1 = vpop.f32.mrf.mxu1  ;;  %7340 = vmatpush3.msra.mxu1 %v6168_v28 }
0x2165   :  { %v5299_v2 = vadd.f32 %v5293_v1, %v9034_v54  ;;  %v5312_v55 = vadd.f32 %v5309_v52, %v8498_v30 }
0x2166   :  { %v7307_v4 = vpop.f32.mrf.mxu1 }
0x2167   :  { %v5310_v6 = vadd.f32 %v6154_v33, %v5299_v2  ;;  %v5321_v39 = vsel %vm196_vm5, %v5312_v55, 0.0 }
0x2168   :  { %5322 = vadd.xlane.f32.xlu0 %v5321_v39 }
0x2169   :  { %v5313_v7 = vadd.f32 %v5310_v6, %v8512_v31 }
0x216b   :  { %v5324_v45 = vsel %vm2590_vm10, %v5313_v7, 0.0 }
0x216c   :  { %5325 = vadd.xlane.f32.xlu1 %v5324_v45 }
0x21ed   :  { %v5320_v25 = vpop.xlane.xlu1 %5319 }
0x21ee   :  { %v5327_v57 = vmul.f32 0.03125, %v5320_v25 }
0x21f0   :  { %v5330_v9 = vsub.f32 %v5311_v63, %v5327_v57 }
0x21f1   :  { %v5323_v10 = vpop.xlane.xlu0 %5322 }
0x21f2   :  { %v5328_v11 = vmul.f32 0.03125, %v5323_v10  ;;  %v5333_v15 = vmul.f32 %v5330_v9, %v5330_v9 }
0x21f4   :  { %v5331_v21 = vsub.f32 %v5312_v55, %v5328_v11  ;;  %v5336_v54 = vsel %vm196_vm5, %v5333_v15, 0.0 }
0x21f5   :  { %5337 = vadd.xlane.f32.xlu0 %v5336_v54  ;;  %v5326_v30 = vpop.xlane.xlu1 %5325 }
0x21f6   :  { %v5329_v14 = vmul.f32 0.03125, %v5326_v30  ;;  %v5334_v23 = vmul.f32 %v5331_v21, %v5331_v21 }
0x21f8   :  { %v5332_v13 = vsub.f32 %v5313_v7, %v5329_v14  ;;  %v5339_v20 = vsel %vm196_vm5, %v5334_v23, 0.0 }
0x21f9   :  { %5340 = vadd.xlane.f32.xlu1 %v5339_v20 }
0x21fa   :  { %v5335_v31 = vmul.f32 %v5332_v13, %v5332_v13 }
0x21fc   :  { %v5342_v17 = vsel %vm2590_vm10, %v5335_v31, 0.0 }
0x21fd   :  { %5343 = vadd.xlane.f32.xlu0 %v5342_v17 }
0x227e   :  { %v5338_v3 = vpop.xlane.xlu0 %5337 }
0x227f   :  { %v5345_v12 = vmul.f32 0.03125, %v5338_v3 }
0x2281   :  { %v5348_v32 = vadd.f32 1e-05, %v5345_v12 }
0x2282   :  { %v5341_v34 = vpop.xlane.xlu1 %5340 }
0x2283   :  { %7484 = vrsqrt.f32 %v5348_v32  ;;  %v5346_v35 = vmul.f32 0.03125, %v5341_v34 }
0x2285   :  { %v5349_v38 = vadd.f32 1e-05, %v5346_v35 }
0x2286   :  { %v5344_v19 = vpop.xlane.xlu0 %5343 }
0x2287   :  { %7486 = vrsqrt.f32 %v5349_v38  ;;  %v5347_v59 = vmul.f32 0.03125, %v5344_v19 }
0x2289   :  { %v5350_v8 = vadd.f32 1e-05, %v5347_v59 }
0x228b   :  { %7488 = vrsqrt.f32 %v5350_v8 }
0x2290   :  { %v7485_v43 = vpop.eup %7484 }
0x2291   :  { %v5354_v36 = vmul.f32 %v7485_v43, %v5330_v9  ;;  %v6177_v9 = vld [vmem:[%s9245_s22 + $0x1] ss:$0 sm:$0xff] }
0x2293   :  { %v5363_v61 = vmul.f32 %v6157_v44, %v5354_v36 }
0x2294   :  { %v7487_v37 = vpop.eup %7486 }
0x2295   :  { %v5372_v42 = vadd.f32 %v6158_v48, %v5363_v61  ;;  %v5355_v47 = vmul.f32 %v7487_v37, %v5331_v21 }
0x2297   :  { %7317 = vmatmul.mubr.msk.f32.vlgmr.msra.gmra.mxu0 %vm196_vm5, %v5372_v42  ;;  %v5364_v50 = vmul.f32 %v6157_v44, %v5355_v47 }
0x2298   :  { %v7489_v51 = vpop.eup %7488  ;;  %7319 = vmatprep.mubr.msk.f32.mxu0 %vm7538_vm0, %v7537_v5 }
0x2299   :  { %v5356_v46 = vmul.f32 %v7489_v51, %v5332_v13  ;;  %v5373_v56 = vadd.f32 %v6158_v48, %v5364_v50 }
0x229b   :  { %7320 = vmatmul.mubr.msk.f32.gmra.mxu0 %vm196_vm5, %v5373_v56  ;;  %v5365_v33 = vmul.f32 %v6157_v44, %v5356_v46  ;;  %v6183_v46 = vld [vmem:[%s9240_s17 + $0x1] ss:$0 sm:$0xff] }
0x229c   :  { %7322 = vmatprep.mubr.msk.f32.mxu0 %vm7538_vm0, %v7537_v5 }
0x229d   :  { %v5374_v49 = vadd.f32 %v6158_v48, %v5365_v33 }
0x229f   :  { %7323 = vmatmul.mubr.msk.f32.gmra.mxu0 %vm196_vm5, %v5374_v49 }
0x22a0   :  { %7356 = vmatprep.mubr.msk.f32.mxu0 %vm7538_vm0, %v7537_v5 }
0x2357   :  { %v5463_v63 = vpop.f32.mrf.mxu0 }
0x2358   :  { %v5464_v40 = vadd.f32 %v6164_v41, %v5463_v63 }
0x2359   :  { %v7318_v52 = vpop.f32.mrf.mxu0 }
0x235a   :  { %v5477_v0 = vmax.f32 %v5464_v40, 0.0 }
0x235b   :  { %v5468_v1 = vpop.f32.mrf.mxu0 }
0x235c   :  { %v5469_v2 = vadd.f32 %v6164_v41, %v5468_v1  ;;  %7342 = vmatmul.mubr.msk.f32.vlgmr.msra.gmra.mxu1 %vm2761_vm11, %v5477_v0  ;;  %v5650_v0 = vld [vmem:[%s9282_s18] sm:$0x3]  ;;  %v5730_v1 = vld [vmem:[%s9283_s6 + $0x18] sm:$0xff] }
0x235d   :  { %v7321_v55 = vpop.f32.mrf.mxu0  ;;  %7344 = vmatprep.mubr.msk.f32.mxu1 %vm7538_vm0, %v7537_v5 }
0x235e   :  { %v5478_v4 = vmax.f32 %v5469_v2, 0.0  ;;  %v5729_v2 = vld [vmem:[%s9283_s6 + $0x10] sm:$0xff]  ;;  %v5728_v55 = vld [vmem:[%s9283_s6 + $0x8] sm:$0xff] }
0x235f   :  { %v5473_v6 = vpop.f32.mrf.mxu0 }
0x2360   :  { %v5474_v39 = vadd.f32 %v6164_v41, %v5473_v6  ;;  %7345 = vmatmul.mubr.msk.f32.gmra.mxu1 %vm2761_vm11, %v5478_v4  ;;  %v5727_v4 = vld [vmem:[%s9283_s6] sm:$0xff] }
0x2361   :  { %v7324_v7 = vpop.f32.mrf.mxu0  ;;  %7347 = vmatprep.mubr.msk.f32.mxu1 %vm7538_vm0, %v7537_v5 }
0x2362   :  { %v5479_v45 = vmax.f32 %v5474_v39, 0.0  ;;  %v6187_v7 = vld [vmem:[%s9284_s9] ss:$0 sm:$0xff] }
0x2364   :  { %7348 = vmatmul.mubr.msk.f32.gmra.mxu1 %vm2761_vm11, %v5479_v45 }
0x241c   :  { %v5572_v25 = vpop.f32.mrf.mxu1 }
0x241d   :  { %v5573_v30 = vadd.f32 %v6177_v9, %v5572_v25 }
0x241e   :  { %v7343_v57 = vpop.f32.mrf.mxu1 }
0x241f   :  { %v5586_v17 = vadd.f32 %v5573_v30, %v5372_v42 }
0x2420   :  { %v5577_v10 = vpop.f32.mrf.mxu1 }
0x2421   :  { %v5578_v11 = vadd.f32 %v6177_v9, %v5577_v10  ;;  %v5593_v60 = vsel %vm196_vm5, %v5586_v17, 0.0 }
0x2422   :  { %v7346_v15 = vpop.f32.mrf.mxu1 }
0x2423   :  { %v5587_v21 = vadd.f32 %v5578_v11, %v5373_v56 }
0x2424   :  { %v5582_v54 = vpop.f32.mrf.mxu1 }
0x2425   :  { %v5583_v14 = vadd.f32 %v6177_v9, %v5582_v54  ;;  %v5596_v23 = vsel %vm196_vm5, %v5587_v21, 0.0 }
0x2426   :  { %5597 = vadd.xlane.f32.xlu0 %v5596_v23  ;;  %v7349_v13 = vpop.f32.mrf.mxu1 }
0x2427   :  { %v5588_v20 = vadd.f32 %v5583_v14, %v5374_v49 }
0x2429   :  { %v5599_v31 = vsel %vm2590_vm10, %v5588_v20, 0.0 }
0x242a   :  { %5600 = vadd.xlane.f32.xlu1 %v5599_v31 }
0x242e   :  { %5594 = vadd.xlane.f32.xlu1 %v5593_v60 }
0x24af   :  { %v5598_v53 = vpop.xlane.xlu0 %5597 }
0x24b0   :  { %v5603_v16 = vmul.f32 0.03125, %v5598_v53 }
0x24b2   :  { %v5606_v24 = vsub.f32 %v5587_v21, %v5603_v16 }
0x24b3   :  { %v5601_v18 = vpop.xlane.xlu1 %5600 }
0x24b4   :  { %v5604_v22 = vmul.f32 0.03125, %v5601_v18  ;;  %v5609_v26 = vmul.f32 %v5606_v24, %v5606_v24 }
0x24b6   :  { %v5607_v27 = vsub.f32 %v5588_v20, %v5604_v22  ;;  %v5614_v29 = vsel %vm196_vm5, %v5609_v26, 0.0 }
0x24b7   :  { %5615 = vadd.xlane.f32.xlu1 %v5614_v29  ;;  %v5595_v3 = vpop.xlane.xlu1 %5594 }
0x24b8   :  { %v5602_v12 = vmul.f32 0.03125, %v5595_v3  ;;  %v5610_v32 = vmul.f32 %v5607_v27, %v5607_v27 }
0x24ba   :  { %v5605_v34 = vsub.f32 %v5586_v17, %v5602_v12  ;;  %v5617_v35 = vsel %vm2590_vm10, %v5610_v32, 0.0 }
0x24bb   :  { %5618 = vadd.xlane.f32.xlu0 %v5617_v35 }
0x24bc   :  { %v5608_v38 = vmul.f32 %v5605_v34, %v5605_v34 }
0x24be   :  { %v5611_v19 = vsel %vm196_vm5, %v5608_v38, 0.0 }
0x24bf   :  { %5612 = vadd.xlane.f32.xlu0 %v5611_v19 }
0x2540   :  { %v5616_v59 = vpop.xlane.xlu1 %5615 }
0x2541   :  { %v5621_v8 = vmul.f32 0.03125, %v5616_v59 }
0x2543   :  { %v5624_v43 = vadd.f32 1e-05, %v5621_v8 }
0x2544   :  { %v5619_v44 = vpop.xlane.xlu0 %5618 }
0x2545   :  { %7490 = vrsqrt.f32 %v5624_v43  ;;  %v5622_v36 = vmul.f32 0.03125, %v5619_v44 }
0x2547   :  { %v5625_v48 = vadd.f32 1e-05, %v5622_v36 }
0x2548   :  { %v5613_v61 = vpop.xlane.xlu0 %5612 }
0x2549   :  { %7492 = vrsqrt.f32 %v5625_v48  ;;  %v5620_v37 = vmul.f32 0.03125, %v5613_v61 }
0x254b   :  { %v5623_v42 = vadd.f32 1e-05, %v5620_v37 }
0x254d   :  { %7494 = vrsqrt.f32 %v5623_v42 }
0x2552   :  { %v7491_v47 = vpop.eup %7490 }
0x2553   :  { %v5630_v50 = vmul.f32 %v7491_v47, %v5606_v24 }
0x2555   :  { %v5639_v49 = vmul.f32 %v6183_v46, %v5630_v50 }
0x2556   :  { %v7493_v51 = vpop.eup %7492 }
0x2557   :  { %v5631_v56 = vmul.f32 %v7493_v51, %v5607_v27  ;;  %v5648_v63 = vadd.f32 %v6184_v62, %v5639_v49 }
0x2559   :  { %v5640_v33 = vmul.f32 %v6183_v46, %v5631_v56 }
0x255a   :  { %v7495_v58 = vpop.eup %7494 }
0x255b   :  { %v5649_v28 = vadd.f32 %v6184_v62, %v5640_v33  ;;  %v5629_v41 = vmul.f32 %v7495_v58, %v5605_v34 }
0x255d   :  { %7351 = vmatpush3.msk.msra.mxu0 %vm610_vm7, %v5649_v28  ;;  %v5638_v40 = vmul.f32 %v6183_v46, %v5629_v41 }
0x255e   :  { %7352 = vmatprep.subr.mxu0 %v7537_v5 }
0x255f   :  { %7353 = vmatpush3.msra.mxu0 %v5648_v63  ;;  %v5647_v52 = vadd.f32 %v6184_v62, %v5638_v40 }
0x2560   :  { %7354 = vmatprep.subr.mxu0 %v7537_v5 }
0x2561   :  { %7355 = vmatpush3.msra.mxu0 %v5647_v52 }
0x2562   :  { %7357 = vmatmul.mubr.msk.f32.vlgmr.msra.gmra.mxu0 %vm566_vm8, %v5650_v0  ;;  %7359 = vmatprep.subr.mxu0 %v7537_v5 }
0x2563   :  { %7360 = vmatpush3.msra.mxu0 %v5730_v1  ;;  %7367 = vmatprep.mubr.msk.f32.mxu0 %vm7538_vm0, %v7537_v5 }
0x2564   :  { %7361 = vmatprep.subr.mxu0 %v7537_v5 }
0x2565   :  { %7362 = vmatpush3.msra.mxu0 %v5729_v2 }
0x2566   :  { %7363 = vmatprep.subr.mxu0 %v7537_v5 }
0x2567   :  { %7364 = vmatpush3.msra.mxu0 %v5728_v55 }
0x2568   :  { %7365 = vmatprep.subr.mxu0 %v7537_v5 }
0x2569   :  { %7366 = vmatpush3.msra.mxu0 %v5727_v4 }
0x2622   :  { %v5723_v6 = vpop.f32.mrf.mxu0 }
0x2623   :  { %7368 = vmatmul.mubr.msk.f32.vlgmr.msra.gmra.mxu0 %vm196_vm5, %v5723_v6 }
0x2624   :  { %v7358_v39 = vpop.f32.mrf.mxu0 }
0x26e3   :  { %v5807_v45 = vpop.f32.mrf.mxu0 }
0x26e4   :  { %v5808_v25 = vadd.f32 %v6187_v7, %v5807_v45 }
0x26e5   :  { %v7369_v57 = vpop.f32.mrf.mxu0 }
0x26e6   :  { %5811 = vst.msk [vmem:[#allocation4] sm:$0x3] %vm2590_vm10, %v5808_v25 }
0x26e7   :  { %7522 = shalt.err (!%p7519_p1)
}
0x26e8   :  { %s9285_s8 = sld [smem:[#allocation21_spill]] }
0x26ee   :  { %5821 = dma.vmem_to_hbm [thread:$0]  %s5819_s11, 32, %s9285_s8, [#allocation5]  }
0x26ef   :  { %7533 = dma.done.wait [#allocation5], 32  }
0x26f0   :  { %7534 = vsyncadd [#allocation5], 4294967264 }
0x26f1   :  { %5825 = vsyncpa [#allocation5], 1 }

</bundles_post_ra>
